<compile_context>
chip_gen: v7x
topology: tpu7x:2x2x1
jax: 0.10.0
libtpu: 0.0.40
codegen_flags: <defaults>
</compile_context>

<pallas_src>
import jax
import jax.numpy as jnp
from jax import lax
from jax.experimental import pallas as pl
from jax.experimental.pallas import tpu as pltpu

NEG_SLOPE = 0.2


# --------------------------- VMEM limit (per chip) -----------------------------
def _vmem_limit_bytes():
    """3/4 of physical VMEM: ~96 MiB on v5e/v6e (128 MiB), ~48 MiB on v7x (64 MiB)."""
    cap = 0
    try:
        info = pltpu.get_tpu_info()
        cap = int(getattr(info, "vmem_capacity_bytes", 0) or 0)
    except Exception:
        cap = 0
    if cap <= 0:
        return 48 * 1024 * 1024          # conservative fallback, safe on all chips
    return int(cap * 3 // 4)


_VMEM_LIMIT = _vmem_limit_bytes()


# ----------------------------- Pallas kernels --------------------------------
def _conv_mm_kernel(a_ref, w_ref, b_ref, o_ref):
    """One conv layer as im2col-GEMM: bf16 MXU operands, f32 accumulate/epilogue."""
    acc = jnp.dot(a_ref[...], w_ref[...], preferred_element_type=jnp.float32)
    acc = acc + b_ref[...]                             # (tm, N) + (1, N)
    y = jnp.where(acc >= 0, acc, NEG_SLOPE * acc)      # LeakyReLU(0.2), f32
    o_ref[...] = y.astype(o_ref.dtype)                 # bf16 store


def _conv5_fc_kernel(a_ref, w_ref, b_ref, wfc_ref, bfc_ref, o_ref):
    """Per-batch: conv5 GEMM + bias + LeakyReLU fused with flatten + Linear + Sigmoid."""
    # a_ref: (1, hw, K) bf16 ; w_ref: (K, N) bf16 ; b_ref: (1, N) f32
    # wfc_ref: (hw, N) f32   ; bfc_ref: (1, 1) f32 ; o_ref: (1, 1, 1) f32
    acc = jnp.dot(a_ref[0], w_ref[...], preferred_element_type=jnp.float32)   # (hw, N)
    acc = acc + b_ref[...]
    y = jnp.where(acc >= 0, acc, NEG_SLOPE * acc)                              # f32
    s = jnp.sum(y * wfc_ref[...], axis=0, keepdims=True)                       # (1, N)
    z = jnp.sum(s, axis=1, keepdims=True) + bfc_ref[...]                       # (1, 1)
    o_ref[...] = jax.nn.sigmoid(z).reshape(1, 1, 1)                            # EUP exp


# ----------------------------- Pallas wrappers --------------------------------
def _pick_tile_m(m, k):
    """K-aware M tile: target ~8 MiB bf16 A tile, multiple of 256, clamped [512, 8192]."""
    bytes_per_row = 2 * k                          # bf16 A rows
    tm = (8 * 1024 * 1024) // max(bytes_per_row, 1)
    tm = (tm // 256) * 256
    tm = max(512, min(tm, 8192))
    if tm >= m:
        return m, 1                                # single full-array block
    return tm, (m + tm - 1) // tm                  # cdiv grid, ragged last block OK


def conv_matmul_act(cols, w_mat, bias2d):
    m, k = cols.shape
    _, n = w_mat.shape
    tm, grid_m = _pick_tile_m(m, k)
    cost = pl.CostEstimate(
        flops=2 * m * k * n, transcendentals=0,
        bytes_accessed=2 * m * k + 2 * k * n + 4 * n + 2 * m * n)
    return pl.pallas_call(
        _conv_mm_kernel,
        out_shape=jax.ShapeDtypeStruct((m, n), jnp.bfloat16),
        grid_spec=pl.GridSpec(
            grid=(grid_m,),
            in_specs=[pl.BlockSpec((tm, k), lambda i: (i, 0)),
                      pl.BlockSpec((k, n), lambda i: (0, 0)),
                      pl.BlockSpec((1, n), lambda i: (0, 0))],
            out_specs=pl.BlockSpec((tm, n), lambda i: (i, 0))),
        compiler_params=pltpu.CompilerParams(
            dimension_semantics=("parallel",),
            vmem_limit_bytes=_VMEM_LIMIT),
        cost_estimate=cost,
    )(cols, w_mat, bias2d)


def conv5_classifier(cols3d, w_mat, bias2d, wfc, bfc):
    batch, hw, k = cols3d.shape
    _, n = w_mat.shape
    cost = pl.CostEstimate(
        flops=2 * batch * hw * k * n + 2 * batch * hw * n,
        transcendentals=batch,
        bytes_accessed=2 * batch * hw * k + 2 * k * n + 4 * n + 4 * hw * n + 4 * batch)
    out = pl.pallas_call(
        _conv5_fc_kernel,
        out_shape=jax.ShapeDtypeStruct((batch, 1, 1), jnp.float32),
        grid_spec=pl.GridSpec(
            grid=(batch,),
            in_specs=[pl.BlockSpec((1, hw, k), lambda b: (b, 0, 0)),
                      pl.BlockSpec((k, n), lambda b: (0, 0)),
                      pl.BlockSpec((1, n), lambda b: (0, 0)),
                      pl.BlockSpec((hw, n), lambda b: (0, 0)),
                      pl.BlockSpec((1, 1), lambda b: (0, 0))],
            out_specs=pl.BlockSpec((1, 1, 1), lambda b: (b, 0, 0))),
        compiler_params=pltpu.CompilerParams(
            dimension_semantics=("parallel",),
            vmem_limit_bytes=_VMEM_LIMIT),
        cost_estimate=cost,
    )(cols3d, w_mat, bias2d, wfc, bfc)
    return out.reshape(batch, 1)


# ------------------------------ XLA glue --------------------------------------
def _im2col_nhwc(x, k, stride, pad):
    """NHWC -> (N, OH, OW, k*k*Cin) patch tensor, feature order (ki, kj, cin)."""
    n, h, w, c = x.shape
    xp = jnp.pad(x, ((0, 0), (pad, pad), (pad, pad), (0, 0)))
    oh = (h + 2 * pad - k) // stride + 1
    ow = (w + 2 * pad - k) // stride + 1
    taps = [xp[:, ki:ki + stride * oh:stride, kj:kj + stride * ow:stride, :]
            for ki in range(k) for kj in range(k)]
    cols = jnp.concatenate(taps, axis=-1)              # (N, OH, OW, k*k*C)
    return cols, (n, oh, ow)


def prepare_params(params, h5, w5):
    """One-time weight packing (outside jit): conv weights -> (K, Cout) bf16,
    biases -> (1, Cout) f32, classifier weight permuted to NHWC-flatten order."""
    prep = {}
    for i in range(1, 6):
        w = params["w%d" % i]                          # (Cout, Cin, 4, 4)
        cout, cin, kh, kw = w.shape
        prep["w%d" % i] = (jnp.transpose(w, (2, 3, 1, 0))
                           .reshape(kh * kw * cin, cout).astype(jnp.bfloat16))
        prep["b%d" % i] = params["b%d" % i].reshape(1, cout).astype(jnp.float32)
    c5 = params["w5"].shape[0]
    wfc = params["w_fc"].reshape(c5, h5, w5)           # NCHW flatten order (torch .view)
    prep["wfc"] = jnp.transpose(wfc, (1, 2, 0)).reshape(h5 * w5, c5).astype(jnp.float32)
    prep["bfc"] = params["b_fc"].reshape(1, 1).astype(jnp.float32)
    return prep


def discriminator2_mul2_forward(x_nchw, prep):
    """x: (B, 3, H, W) f32  ->  (B, 1) f32 sigmoid scores."""
    x = jnp.transpose(x_nchw, (0, 2, 3, 1)).astype(jnp.bfloat16)   # one layout change
    for i, stride in ((1, 1), (2, 2), (3, 2), (4, 2)):
        w = prep["w%d" % i]
        b = prep["b%d" % i]
        cols, (n, oh, ow) = _im2col_nhwc(x, 4, stride, 1)
        k = cols.shape[-1]
        y = conv_matmul_act(cols.reshape(n * oh * ow, k), w, b)    # (n*oh*ow, cout) bf16
        x = y.reshape(n, oh, ow, w.shape[1])
    cols5, (n, oh, ow) = _im2col_nhwc(x, 4, 1, 1)
    k5 = cols5.shape[-1]
    return conv5_classifier(cols5.reshape(n, oh * ow, k5),
                            prep["w5"], prep["b5"], prep["wfc"], prep["bfc"])


# -------------------------- pure-JAX reference --------------------------------
def _ref_forward(x, params):
    def conv(x, w, b, stride):
        y = lax.conv_general_dilated(
            x, w, window_strides=(stride, stride), padding=[(1, 1), (1, 1)],
            dimension_numbers=("NCHW", "OIHW", "NCHW"))
        return y + b[None, :, None, None]

    def lrelu(t):
        return jnp.where(t >= 0, t, NEG_SLOPE * t)

    x = lrelu(conv(x, params["w1"], params["b1"], 1))
    x = lrelu(conv(x, params["w2"], params["b2"], 2))
    x = lrelu(conv(x, params["w3"], params["b3"], 2))
    x = lrelu(conv(x, params["w4"], params["b4"], 2))
    x = lrelu(conv(x, params["w5"], params["b5"], 1))
    x = x.reshape(x.shape[0], -1)                      # NCHW flatten, like torch .view
    z = x @ params["w_fc"].T + params["b_fc"]
    return jax.nn.sigmoid(z)


# --------------------------------- main ----------------------------------------
if __name__ == "__main__":
    ndf = 8              # module default is 32; scaled down for a small test
    batch, spatial = 2, 33   # 33 -> 32 -> 16 -> 8 -> 4 -> 3 (mirrors 321 -> 39 at full scale)

    def _final_hw(h):
        h = h - 1                 # conv1, s=1
        h = (h - 2) // 2 + 1      # conv2
        h = (h - 2) // 2 + 1      # conv3
        h = (h - 2) // 2 + 1      # conv4
        return h - 1              # conv5, s=1

    h5 = w5 = _final_hw(spatial)
    c5 = ndf * 8
    feat = c5 * h5 * w5

    key = jax.random.PRNGKey(0)
    ks = jax.random.split(key, 13)

    def init_w(k, cout, cin, kh=4, kw=4):
        return jax.random.normal(k, (cout, cin, kh, kw), jnp.float32) / jnp.sqrt(cin * kh * kw)

    params = {
        "w1": init_w(ks[0], ndf, 3),            "b1": 0.01 * jax.random.normal(ks[1], (ndf,)),
        "w2": init_w(ks[2], ndf * 2, ndf),      "b2": 0.01 * jax.random.normal(ks[3], (ndf * 2,)),
        "w3": init_w(ks[4], ndf * 4, ndf * 2),  "b3": 0.01 * jax.random.normal(ks[5], (ndf * 4,)),
        "w4": init_w(ks[6], ndf * 8, ndf * 4),  "b4": 0.01 * jax.random.normal(ks[7], (ndf * 8,)),
        "w5": init_w(ks[8], c5, c5),            "b5": 0.01 * jax.random.normal(ks[9], (c5,)),
        "w_fc": jax.random.normal(ks[10], (1, feat), jnp.float32) / jnp.sqrt(feat),
        "b_fc": 0.01 * jax.random.normal(ks[11], (1,)),
    }

    x = jax.random.normal(ks[12], (batch, 3, spatial, spatial), jnp.float32)

    prep = prepare_params(params, h5, w5)      # one-time packing, outside jit
    fwd = jax.jit(discriminator2_mul2_forward)

    out = jax.block_until_ready(fwd(x, prep))
    ref = jax.block_until_ready(_ref_forward(x, params))

    assert out.shape == ref.shape == (batch, 1), (out.shape, ref.shape)
    max_err = float(jnp.max(jnp.abs(out.astype(jnp.float32) - ref)))
    assert max_err < 2e-2, max_err             # bf16 MXU operands vs f32 reference

    print("KERNEL_OK")
</pallas_src>

<mosaic_0001>
module attributes {stable_mosaic.version = 11 : i64} {
  func.func @_conv_mm_kernel(%arg0: i32, %arg1: memref<2048x48xbf16, #tpu.memory_space<vmem>>, %arg2: memref<48x8xbf16, #tpu.memory_space<vmem>>, %arg3: memref<1x8xf32, #tpu.memory_space<vmem>>, %arg4: memref<2048x8xbf16, #tpu.memory_space<vmem>>) attributes {dimension_semantics = [#tpu.dimension_semantics<parallel>], iteration_bounds = array<i64: 1>, scalar_prefetch = 0 : i64, scratch_operands = 0 : i64, tpu.core_type = #tpu.core_type<tc>, window_params = [{transform_indices = @transform_0, window_bounds = array<i64: 2048, 48>}, {pipeline_mode = #tpu.pipeline_mode<synchronous>, transform_indices = @transform_1, window_bounds = array<i64: 48, 8>}, {pipeline_mode = #tpu.pipeline_mode<synchronous>, transform_indices = @transform_2, window_bounds = array<i64: 1, 8>}, {transform_indices = @transform_3, window_bounds = array<i64: 2048, 8>}]} {
    %c0 = arith.constant 0 : index
    %c0_0 = arith.constant 0 : index
    %0 = vector.load %arg1[%c0, %c0_0] : memref<2048x48xbf16, #tpu.memory_space<vmem>>, vector<2048x48xbf16>
    %c0_1 = arith.constant 0 : index
    %c0_2 = arith.constant 0 : index
    %1 = vector.load %arg2[%c0_1, %c0_2] : memref<48x8xbf16, #tpu.memory_space<vmem>>, vector<48x8xbf16>
    %cst = arith.constant dense<0.000000e+00> : vector<2048x8xf32>
    %2 = tpu.matmul %0, %1, %cst {dimension_numbers = #tpu.dot_dimension_numbers<[1], [0], [0], [1], [0, 0, 1, 1], [], []>} : vector<2048x48xbf16>, vector<48x8xbf16>, vector<2048x8xf32> -> vector<2048x8xf32>
    %c0_3 = arith.constant 0 : index
    %c0_4 = arith.constant 0 : index
    %3 = vector.load %arg3[%c0_3, %c0_4] : memref<1x8xf32, #tpu.memory_space<vmem>>, vector<1x8xf32>
    %4 = vector.broadcast %3 : vector<1x8xf32> to vector<2048x8xf32>
    %5 = arith.addf %2, %4 : vector<2048x8xf32>
    %cst_5 = arith.constant 0.000000e+00 : f32
    %6 = vector.broadcast %cst_5 : f32 to vector<2048x8xf32>
    %7 = arith.cmpf oge, %5, %6 : vector<2048x8xf32>
    %cst_6 = arith.constant 2.000000e-01 : f32
    %8 = vector.broadcast %cst_6 : f32 to vector<2048x8xf32>
    %9 = arith.mulf %8, %5 : vector<2048x8xf32>
    %10 = arith.select %7, %5, %9 : vector<2048x8xi1>, vector<2048x8xf32>
    %11 = arith.truncf %10 : vector<2048x8xf32> to vector<2048x8xbf16>
    %c0_7 = arith.constant 0 : index
    %c0_8 = arith.constant 0 : index
    %12 = vector.load %arg4[%c0_7, %c0_8] : memref<2048x8xbf16, #tpu.memory_space<vmem>>, vector<2048x8xbf16>
    tpu.vector_store %arg4[%c0_7, %c0_8], %11 {strides = array<i32>} : memref<2048x8xbf16, #tpu.memory_space<vmem>>, vector<2048x8xbf16>,
    return
  }
  func.func @transform_0(%arg0: i32) -> (i32, i32) {
    %c0_i32 = arith.constant 0 : i32
    %c0_i32_0 = arith.constant 0 : i32
    return %arg0, %c0_i32 : i32, i32
  }
  func.func @transform_1(%arg0: i32) -> (i32, i32) {
    %c0_i32 = arith.constant 0 : i32
    %c0_i32_0 = arith.constant 0 : i32
    %c0_i32_1 = arith.constant 0 : i32
    return %c0_i32, %c0_i32_0 : i32, i32
  }
  func.func @transform_2(%arg0: i32) -> (i32, i32) {
    %c0_i32 = arith.constant 0 : i32
    %c0_i32_0 = arith.constant 0 : i32
    %c0_i32_1 = arith.constant 0 : i32
    return %c0_i32, %c0_i32_0 : i32, i32
  }
  func.func @transform_3(%arg0: i32) -> (i32, i32) {
    %c0_i32 = arith.constant 0 : i32
    %c0_i32_0 = arith.constant 0 : i32
    return %arg0, %c0_i32 : i32, i32
  }
}

module attributes {stable_mosaic.version = 11 : i64} {
  func.func @_conv_mm_kernel(%arg0: i32, %arg1: memref<512x128xbf16, #tpu.memory_space<vmem>>, %arg2: memref<128x16xbf16, #tpu.memory_space<vmem>>, %arg3: memref<1x16xf32, #tpu.memory_space<vmem>>, %arg4: memref<512x16xbf16, #tpu.memory_space<vmem>>) attributes {dimension_semantics = [#tpu.dimension_semantics<parallel>], iteration_bounds = array<i64: 1>, scalar_prefetch = 0 : i64, scratch_operands = 0 : i64, tpu.core_type = #tpu.core_type<tc>, window_params = [{transform_indices = @transform_0, window_bounds = array<i64: 512, 128>}, {pipeline_mode = #tpu.pipeline_mode<synchronous>, transform_indices = @transform_1, window_bounds = array<i64: 128, 16>}, {pipeline_mode = #tpu.pipeline_mode<synchronous>, transform_indices = @transform_2, window_bounds = array<i64: 1, 16>}, {transform_indices = @transform_3, window_bounds = array<i64: 512, 16>}]} {
    %c0 = arith.constant 0 : index
    %c0_0 = arith.constant 0 : index
    %0 = vector.load %arg1[%c0, %c0_0] : memref<512x128xbf16, #tpu.memory_space<vmem>>, vector<512x128xbf16>
    %c0_1 = arith.constant 0 : index
    %c0_2 = arith.constant 0 : index
    %1 = vector.load %arg2[%c0_1, %c0_2] : memref<128x16xbf16, #tpu.memory_space<vmem>>, vector<128x16xbf16>
    %cst = arith.constant dense<0.000000e+00> : vector<512x16xf32>
    %2 = tpu.matmul %0, %1, %cst {dimension_numbers = #tpu.dot_dimension_numbers<[1], [0], [0], [1], [0, 0, 1, 1], [], []>} : vector<512x128xbf16>, vector<128x16xbf16>, vector<512x16xf32> -> vector<512x16xf32>
    %c0_3 = arith.constant 0 : index
    %c0_4 = arith.constant 0 : index
    %3 = vector.load %arg3[%c0_3, %c0_4] : memref<1x16xf32, #tpu.memory_space<vmem>>, vector<1x16xf32>
    %4 = vector.broadcast %3 : vector<1x16xf32> to vector<512x16xf32>
    %5 = arith.addf %2, %4 : vector<512x16xf32>
    %cst_5 = arith.constant 0.000000e+00 : f32
    %6 = vector.broadcast %cst_5 : f32 to vector<512x16xf32>
    %7 = arith.cmpf oge, %5, %6 : vector<512x16xf32>
    %cst_6 = arith.constant 2.000000e-01 : f32
    %8 = vector.broadcast %cst_6 : f32 to vector<512x16xf32>
    %9 = arith.mulf %8, %5 : vector<512x16xf32>
    %10 = arith.select %7, %5, %9 : vector<512x16xi1>, vector<512x16xf32>
    %11 = arith.truncf %10 : vector<512x16xf32> to vector<512x16xbf16>
    %c0_7 = arith.constant 0 : index
    %c0_8 = arith.constant 0 : index
    %12 = vector.load %arg4[%c0_7, %c0_8] : memref<512x16xbf16, #tpu.memory_space<vmem>>, vector<512x16xbf16>
    tpu.vector_store %arg4[%c0_7, %c0_8], %11 {strides = array<i32>} : memref<512x16xbf16, #tpu.memory_space<vmem>>, vector<512x16xbf16>,
    return
  }
  func.func @transform_0(%arg0: i32) -> (i32, i32) {
    %c0_i32 = arith.constant 0 : i32
    %c0_i32_0 = arith.constant 0 : i32
    return %arg0, %c0_i32 : i32, i32
  }
  func.func @transform_1(%arg0: i32) -> (i32, i32) {
    %c0_i32 = arith.constant 0 : i32
    %c0_i32_0 = arith.constant 0 : i32
    %c0_i32_1 = arith.constant 0 : i32
    return %c0_i32, %c0_i32_0 : i32, i32
  }
  func.func @transform_2(%arg0: i32) -> (i32, i32) {
    %c0_i32 = arith.constant 0 : i32
    %c0_i32_0 = arith.constant 0 : i32
    %c0_i32_1 = arith.constant 0 : i32
    return %c0_i32, %c0_i32_0 : i32, i32
  }
  func.func @transform_3(%arg0: i32) -> (i32, i32) {
    %c0_i32 = arith.constant 0 : i32
    %c0_i32_0 = arith.constant 0 : i32
    return %arg0, %c0_i32 : i32, i32
  }
}

module attributes {stable_mosaic.version = 11 : i64} {
  func.func @_conv_mm_kernel(%arg0: i32, %arg1: memref<128x256xbf16, #tpu.memory_space<vmem>>, %arg2: memref<256x32xbf16, #tpu.memory_space<vmem>>, %arg3: memref<1x32xf32, #tpu.memory_space<vmem>>, %arg4: memref<128x32xbf16, #tpu.memory_space<vmem>>) attributes {dimension_semantics = [#tpu.dimension_semantics<parallel>], iteration_bounds = array<i64: 1>, scalar_prefetch = 0 : i64, scratch_operands = 0 : i64, tpu.core_type = #tpu.core_type<tc>, window_params = [{transform_indices = @transform_0, window_bounds = array<i64: 128, 256>}, {pipeline_mode = #tpu.pipeline_mode<synchronous>, transform_indices = @transform_1, window_bounds = array<i64: 256, 32>}, {pipeline_mode = #tpu.pipeline_mode<synchronous>, transform_indices = @transform_2, window_bounds = array<i64: 1, 32>}, {transform_indices = @transform_3, window_bounds = array<i64: 128, 32>}]} {
    %c0 = arith.constant 0 : index
    %c0_0 = arith.constant 0 : index
    %0 = vector.load %arg1[%c0, %c0_0] : memref<128x256xbf16, #tpu.memory_space<vmem>>, vector<128x256xbf16>
    %c0_1 = arith.constant 0 : index
    %c0_2 = arith.constant 0 : index
    %1 = vector.load %arg2[%c0_1, %c0_2] : memref<256x32xbf16, #tpu.memory_space<vmem>>, vector<256x32xbf16>
    %cst = arith.constant dense<0.000000e+00> : vector<128x32xf32>
    %2 = tpu.matmul %0, %1, %cst {dimension_numbers = #tpu.dot_dimension_numbers<[1], [0], [0], [1], [0, 0, 1, 1], [], []>} : vector<128x256xbf16>, vector<256x32xbf16>, vector<128x32xf32> -> vector<128x32xf32>
    %c0_3 = arith.constant 0 : index
    %c0_4 = arith.constant 0 : index
    %3 = vector.load %arg3[%c0_3, %c0_4] : memref<1x32xf32, #tpu.memory_space<vmem>>, vector<1x32xf32>
    %4 = vector.broadcast %3 : vector<1x32xf32> to vector<128x32xf32>
    %5 = arith.addf %2, %4 : vector<128x32xf32>
    %cst_5 = arith.constant 0.000000e+00 : f32
    %6 = vector.broadcast %cst_5 : f32 to vector<128x32xf32>
    %7 = arith.cmpf oge, %5, %6 : vector<128x32xf32>
    %cst_6 = arith.constant 2.000000e-01 : f32
    %8 = vector.broadcast %cst_6 : f32 to vector<128x32xf32>
    %9 = arith.mulf %8, %5 : vector<128x32xf32>
    %10 = arith.select %7, %5, %9 : vector<128x32xi1>, vector<128x32xf32>
    %11 = arith.truncf %10 : vector<128x32xf32> to vector<128x32xbf16>
    %c0_7 = arith.constant 0 : index
    %c0_8 = arith.constant 0 : index
    %12 = vector.load %arg4[%c0_7, %c0_8] : memref<128x32xbf16, #tpu.memory_space<vmem>>, vector<128x32xbf16>
    tpu.vector_store %arg4[%c0_7, %c0_8], %11 {strides = array<i32>} : memref<128x32xbf16, #tpu.memory_space<vmem>>, vector<128x32xbf16>,
    return
  }
  func.func @transform_0(%arg0: i32) -> (i32, i32) {
    %c0_i32 = arith.constant 0 : i32
    %c0_i32_0 = arith.constant 0 : i32
    return %arg0, %c0_i32 : i32, i32
  }
  func.func @transform_1(%arg0: i32) -> (i32, i32) {
    %c0_i32 = arith.constant 0 : i32
    %c0_i32_0 = arith.constant 0 : i32
    %c0_i32_1 = arith.constant 0 : i32
    return %c0_i32, %c0_i32_0 : i32, i32
  }
  func.func @transform_2(%arg0: i32) -> (i32, i32) {
    %c0_i32 = arith.constant 0 : i32
    %c0_i32_0 = arith.constant 0 : i32
    %c0_i32_1 = arith.constant 0 : i32
    return %c0_i32, %c0_i32_0 : i32, i32
  }
  func.func @transform_3(%arg0: i32) -> (i32, i32) {
    %c0_i32 = arith.constant 0 : i32
    %c0_i32_0 = arith.constant 0 : i32
    return %arg0, %c0_i32 : i32, i32
  }
}

module attributes {stable_mosaic.version = 11 : i64} {
  func.func @_conv_mm_kernel(%arg0: i32, %arg1: memref<32x512xbf16, #tpu.memory_space<vmem>>, %arg2: memref<512x64xbf16, #tpu.memory_space<vmem>>, %arg3: memref<1x64xf32, #tpu.memory_space<vmem>>, %arg4: memref<32x64xbf16, #tpu.memory_space<vmem>>) attributes {dimension_semantics = [#tpu.dimension_semantics<parallel>], iteration_bounds = array<i64: 1>, scalar_prefetch = 0 : i64, scratch_operands = 0 : i64, tpu.core_type = #tpu.core_type<tc>, window_params = [{transform_indices = @transform_0, window_bounds = array<i64: 32, 512>}, {pipeline_mode = #tpu.pipeline_mode<synchronous>, transform_indices = @transform_1, window_bounds = array<i64: 512, 64>}, {pipeline_mode = #tpu.pipeline_mode<synchronous>, transform_indices = @transform_2, window_bounds = array<i64: 1, 64>}, {transform_indices = @transform_3, window_bounds = array<i64: 32, 64>}]} {
    %c0 = arith.constant 0 : index
    %c0_0 = arith.constant 0 : index
    %0 = vector.load %arg1[%c0, %c0_0] : memref<32x512xbf16, #tpu.memory_space<vmem>>, vector<32x512xbf16>
    %c0_1 = arith.constant 0 : index
    %c0_2 = arith.constant 0 : index
    %1 = vector.load %arg2[%c0_1, %c0_2] : memref<512x64xbf16, #tpu.memory_space<vmem>>, vector<512x64xbf16>
    %cst = arith.constant dense<0.000000e+00> : vector<32x64xf32>
    %2 = tpu.matmul %0, %1, %cst {dimension_numbers = #tpu.dot_dimension_numbers<[1], [0], [0], [1], [0, 0, 1, 1], [], []>} : vector<32x512xbf16>, vector<512x64xbf16>, vector<32x64xf32> -> vector<32x64xf32>
    %c0_3 = arith.constant 0 : index
    %c0_4 = arith.constant 0 : index
    %3 = vector.load %arg3[%c0_3, %c0_4] : memref<1x64xf32, #tpu.memory_space<vmem>>, vector<1x64xf32>
    %4 = vector.broadcast %3 : vector<1x64xf32> to vector<32x64xf32>
    %5 = arith.addf %2, %4 : vector<32x64xf32>
    %cst_5 = arith.constant 0.000000e+00 : f32
    %6 = vector.broadcast %cst_5 : f32 to vector<32x64xf32>
    %7 = arith.cmpf oge, %5, %6 : vector<32x64xf32>
    %cst_6 = arith.constant 2.000000e-01 : f32
    %8 = vector.broadcast %cst_6 : f32 to vector<32x64xf32>
    %9 = arith.mulf %8, %5 : vector<32x64xf32>
    %10 = arith.select %7, %5, %9 : vector<32x64xi1>, vector<32x64xf32>
    %11 = arith.truncf %10 : vector<32x64xf32> to vector<32x64xbf16>
    %c0_7 = arith.constant 0 : index
    %c0_8 = arith.constant 0 : index
    %12 = vector.load %arg4[%c0_7, %c0_8] : memref<32x64xbf16, #tpu.memory_space<vmem>>, vector<32x64xbf16>
    tpu.vector_store %arg4[%c0_7, %c0_8], %11 {strides = array<i32>} : memref<32x64xbf16, #tpu.memory_space<vmem>>, vector<32x64xbf16>,
    return
  }
  func.func @transform_0(%arg0: i32) -> (i32, i32) {
    %c0_i32 = arith.constant 0 : i32
    %c0_i32_0 = arith.constant 0 : i32
    return %arg0, %c0_i32 : i32, i32
  }
  func.func @transform_1(%arg0: i32) -> (i32, i32) {
    %c0_i32 = arith.constant 0 : i32
    %c0_i32_0 = arith.constant 0 : i32
    %c0_i32_1 = arith.constant 0 : i32
    return %c0_i32, %c0_i32_0 : i32, i32
  }
  func.func @transform_2(%arg0: i32) -> (i32, i32) {
    %c0_i32 = arith.constant 0 : i32
    %c0_i32_0 = arith.constant 0 : i32
    %c0_i32_1 = arith.constant 0 : i32
    return %c0_i32, %c0_i32_0 : i32, i32
  }
  func.func @transform_3(%arg0: i32) -> (i32, i32) {
    %c0_i32 = arith.constant 0 : i32
    %c0_i32_0 = arith.constant 0 : i32
    return %arg0, %c0_i32 : i32, i32
  }
}

module attributes {stable_mosaic.version = 11 : i64} {
  func.func @_conv5_fc_kernel(%arg0: i32, %arg1: memref<1x9x1024xbf16, #tpu.memory_space<vmem>>, %arg2: memref<1024x64xbf16, #tpu.memory_space<vmem>>, %arg3: memref<1x64xf32, #tpu.memory_space<vmem>>, %arg4: memref<9x64xf32, #tpu.memory_space<vmem>>, %arg5: memref<1x1xf32, #tpu.memory_space<vmem>>, %arg6: memref<1x1x1xf32, #tpu.memory_space<vmem>>) attributes {dimension_semantics = [#tpu.dimension_semantics<parallel>], iteration_bounds = array<i64: 2>, scalar_prefetch = 0 : i64, scratch_operands = 0 : i64, tpu.core_type = #tpu.core_type<tc>, window_params = [{transform_indices = @transform_0, window_bounds = array<i64: 1, 9, 1024>}, {pipeline_mode = #tpu.pipeline_mode<synchronous>, transform_indices = @transform_1, window_bounds = array<i64: 1024, 64>}, {pipeline_mode = #tpu.pipeline_mode<synchronous>, transform_indices = @transform_2, window_bounds = array<i64: 1, 64>}, {pipeline_mode = #tpu.pipeline_mode<synchronous>, transform_indices = @transform_3, window_bounds = array<i64: 9, 64>}, {pipeline_mode = #tpu.pipeline_mode<synchronous>, transform_indices = @transform_4, window_bounds = array<i64: 1, 1>}, {transform_indices = @transform_5, window_bounds = array<i64: 1, 1, 1>}]} {
    %c0 = arith.constant 0 : index
    %c0_0 = arith.constant 0 : index
    %c0_1 = arith.constant 0 : index
    %0 = vector.load %arg1[%c0, %c0_0, %c0_1] : memref<1x9x1024xbf16, #tpu.memory_space<vmem>>, vector<1x9x1024xbf16>
    %1 = vector.shape_cast %0 : vector<1x9x1024xbf16> to vector<9x1024xbf16>
    %c0_2 = arith.constant 0 : index
    %c0_3 = arith.constant 0 : index
    %2 = vector.load %arg2[%c0_2, %c0_3] : memref<1024x64xbf16, #tpu.memory_space<vmem>>, vector<1024x64xbf16>
    %cst = arith.constant dense<0.000000e+00> : vector<9x64xf32>
    %3 = tpu.matmul %1, %2, %cst {dimension_numbers = #tpu.dot_dimension_numbers<[1], [0], [0], [1], [0, 0, 1, 1], [], []>} : vector<9x1024xbf16>, vector<1024x64xbf16>, vector<9x64xf32> -> vector<9x64xf32>
    %c0_4 = arith.constant 0 : index
    %c0_5 = arith.constant 0 : index
    %4 = vector.load %arg3[%c0_4, %c0_5] : memref<1x64xf32, #tpu.memory_space<vmem>>, vector<1x64xf32>
    %5 = vector.broadcast %4 : vector<1x64xf32> to vector<9x64xf32>
    %6 = arith.addf %3, %5 : vector<9x64xf32>
    %cst_6 = arith.constant 0.000000e+00 : f32
    %7 = vector.broadcast %cst_6 : f32 to vector<9x64xf32>
    %8 = arith.cmpf oge, %6, %7 : vector<9x64xf32>
    %cst_7 = arith.constant 2.000000e-01 : f32
    %9 = vector.broadcast %cst_7 : f32 to vector<9x64xf32>
    %10 = arith.mulf %9, %6 : vector<9x64xf32>
    %11 = arith.select %8, %6, %10 : vector<9x64xi1>, vector<9x64xf32>
    %c0_8 = arith.constant 0 : index
    %c0_9 = arith.constant 0 : index
    %12 = vector.load %arg4[%c0_8, %c0_9] : memref<9x64xf32, #tpu.memory_space<vmem>>, vector<9x64xf32>
    %13 = arith.mulf %11, %12 : vector<9x64xf32>
    %cst_10 = arith.constant dense<0.000000e+00> : vector<64xf32>
    %14 = vector.multi_reduction <add>, %13, %cst_10 [0] : vector<9x64xf32> to vector<64xf32>
    %15 = vector.shape_cast %14 : vector<64xf32> to vector<1x64xf32>
    %cst_11 = arith.constant dense<0.000000e+00> : vector<1xf32>
    %16 = vector.multi_reduction <add>, %15, %cst_11 [1] : vector<1x64xf32> to vector<1xf32>
    %17 = vector.shape_cast %16 : vector<1xf32> to vector<1x1xf32>
    %c0_12 = arith.constant 0 : index
    %c0_13 = arith.constant 0 : index
    %18 = vector.load %arg5[%c0_12, %c0_13] : memref<1x1xf32, #tpu.memory_space<vmem>>, vector<1x1xf32>
    %19 = arith.addf %17, %18 : vector<1x1xf32>
    %20 = arith.negf %19 : vector<1x1xf32>
    %21 = math.exp %20 : vector<1x1xf32>
    %cst_14 = arith.constant 1.000000e+00 : f32
    %22 = vector.broadcast %cst_14 : f32 to vector<1x1xf32>
    %23 = arith.addf %22, %21 : vector<1x1xf32>
    %24 = arith.divf %22, %23 : vector<1x1xf32>
    %25 = vector.shape_cast %24 : vector<1x1xf32> to vector<1x1x1xf32>
    %c0_15 = arith.constant 0 : index
    %c0_16 = arith.constant 0 : index
    %c0_17 = arith.constant 0 : index
    %26 = vector.load %arg6[%c0_15, %c0_16, %c0_17] : memref<1x1x1xf32, #tpu.memory_space<vmem>>, vector<1x1x1xf32>
    tpu.vector_store %arg6[%c0_15, %c0_16, %c0_17], %25 {strides = array<i32>} : memref<1x1x1xf32, #tpu.memory_space<vmem>>, vector<1x1x1xf32>,
    return
  }
  func.func @transform_0(%arg0: i32) -> (i32, i32, i32) {
    %c0_i32 = arith.constant 0 : i32
    %c0_i32_0 = arith.constant 0 : i32
    %c0_i32_1 = arith.constant 0 : i32
    return %arg0, %c0_i32, %c0_i32_0 : i32, i32, i32
  }
  func.func @transform_1(%arg0: i32) -> (i32, i32) {
    %c0_i32 = arith.constant 0 : i32
    %c0_i32_0 = arith.constant 0 : i32
    %c0_i32_1 = arith.constant 0 : i32
    return %c0_i32, %c0_i32_0 : i32, i32
  }
  func.func @transform_2(%arg0: i32) -> (i32, i32) {
    %c0_i32 = arith.constant 0 : i32
    %c0_i32_0 = arith.constant 0 : i32
    %c0_i32_1 = arith.constant 0 : i32
    return %c0_i32, %c0_i32_0 : i32, i32
  }
  func.func @transform_3(%arg0: i32) -> (i32, i32) {
    %c0_i32 = arith.constant 0 : i32
    %c0_i32_0 = arith.constant 0 : i32
    %c0_i32_1 = arith.constant 0 : i32
    return %c0_i32, %c0_i32_0 : i32, i32
  }
  func.func @transform_4(%arg0: i32) -> (i32, i32) {
    %c0_i32 = arith.constant 0 : i32
    %c0_i32_0 = arith.constant 0 : i32
    %c0_i32_1 = arith.constant 0 : i32
    return %c0_i32, %c0_i32_0 : i32, i32
  }
  func.func @transform_5(%arg0: i32) -> (i32, i32, i32) {
    %c0_i32 = arith.constant 0 : i32
    %c0_i32_0 = arith.constant 0 : i32
    %c0_i32_1 = arith.constant 0 : i32
    return %arg0, %c0_i32, %c0_i32_0 : i32, i32, i32
  }
}

</mosaic_0001>

<bundles_post_ra>
// kernel: discriminator2_mul2_forward.6
= control target key start
LH: loop header
LB: loop body
LE: loop exit
PB: predicated region body
PF: predicated region fallthrough
CT: control target
= control target key end

     0   :  { %vm1079_vm0 = vcmask 125952   ;;  %s2037_s1 = inlined_call_operand.vmem [shape: bf16[128,16], index: 1, kind: input, shape index: {}]   ;;  %s2038_s0 = inlined_call_operand.vmem [shape: bf16[512,128], index: 0, kind: input, shape index: {}]   ;;  %s2039_s2 = inlined_call_operand.vmem [shape: f32[1,16], index: 2, kind: input, shape index: {}]   ;;  %s2040_s3 = inlined_call_operand.vmem [shape: bf16[512,16], index: 3, kind: output, shape index: {}]  }
   0x1   :  { %v1453_v0 = vld [vmem:[%s2037_s1] sm:$0xff]   ;;  %v1454_v1 = vld [vmem:[%s2037_s1 + $0x8] sm:$0xff]   ;;  %v1455_v2 = vld [vmem:[%s2037_s1 + $0x10] sm:$0xff]  }
   0x2   :  { %1357 = vmatprep.subr.bf16.mxu0 %v1453_v0  ;;  %1437 = vmatprep.subr.bf16.mxu1 %v1453_v0  ;;  %v1456_v3 = vld [vmem:[%s2037_s1 + $0x18] sm:$0xff]   ;;  %v1461_v4 = vld [vmem:[%s2038_s0] sm:$0xff]   ;;  %v1458_v7 = vld [vmem:[%s2037_s1 + $0x28] sm:$0xff]  }
   0x3   :  { %1358 = vmatpush3.bf16.msra.mxu0 %v1453_v0  ;;  %1445 = vmatpush3.bf16.msra.mxu1 %v1453_v0  ;;  %v1462_v5 = vld [vmem:[%s2038_s0 + $0x80] sm:$0xff]   ;;  %v1459_v8 = vld [vmem:[%s2037_s1 + $0x30] sm:$0xff]   ;;  %v1460_v9 = vld [vmem:[%s2037_s1 + $0x38] sm:$0xff]  }
   0x4   :  { %1359 = vmatprep.subr.bf16.mxu0 %v1454_v1  ;;  %1438 = vmatprep.subr.bf16.mxu1 %v1454_v1  ;;  %v1457_v6 = vld [vmem:[%s2037_s1 + $0x20] sm:$0xff]   ;;  %v1463_v10 = vld [vmem:[%s2038_s0 + $0x8] sm:$0xff]   ;;  %v1465_v12 = vld [vmem:[%s2038_s0 + $0x10] sm:$0xff]  }
   0x5   :  { %1373 = vmatprep.mubr.bf16.mxu0 %v1461_v4  ;;  %1405 = vmatprep.mubr.bf16.mxu1 %v1462_v5  ;;  %v1464_v11 = vld [vmem:[%s2038_s0 + $0x88] sm:$0xff]   ;;  %v1466_v13 = vld [vmem:[%s2038_s0 + $0x90] sm:$0xff]   ;;  %v1467_v14 = vld [vmem:[%s2038_s0 + $0x18] sm:$0xff]  }
   0x6   :  { %v1468_v15 = vld [vmem:[%s2038_s0 + $0x98] sm:$0xff]   ;;  %v1469_v16 = vld [vmem:[%s2038_s0 + $0x20] sm:$0xff]   ;;  %v1471_v18 = vld [vmem:[%s2038_s0 + $0x28] sm:$0xff]  }
   0x7   :  { %1360 = vmatpush3.bf16.msra.mxu0 %v1454_v1  ;;  %1446 = vmatpush3.bf16.msra.mxu1 %v1454_v1  ;;  %v1470_v17 = vld [vmem:[%s2038_s0 + $0xa0] sm:$0xff]   ;;  %v1472_v19 = vld [vmem:[%s2038_s0 + $0xa8] sm:$0xff]   ;;  %v1473_v20 = vld [vmem:[%s2038_s0 + $0x30] sm:$0xff]  }
   0x8   :  { %1361 = vmatprep.subr.bf16.mxu0 %v1455_v2  ;;  %1439 = vmatprep.subr.bf16.mxu1 %v1455_v2  ;;  %v1474_v21 = vld [vmem:[%s2038_s0 + $0xb0] sm:$0xff]   ;;  %v1475_v22 = vld [vmem:[%s2038_s0 + $0x38] sm:$0xff]   ;;  %v1477_v24 = vld [vmem:[%s2038_s0 + $0x40] sm:$0xff]  }
   0x9   :  { %v1476_v23 = vld [vmem:[%s2038_s0 + $0xb8] sm:$0xff]   ;;  %v1478_v25 = vld [vmem:[%s2038_s0 + $0xc0] sm:$0xff]   ;;  %v1479_v26 = vld [vmem:[%s2038_s0 + $0x48] sm:$0xff]  }
   0xa   :  { %v1480_v27 = vld [vmem:[%s2038_s0 + $0xc8] sm:$0xff]   ;;  %v1481_v28 = vld [vmem:[%s2038_s0 + $0x50] sm:$0xff]   ;;  %v1483_v30 = vld [vmem:[%s2038_s0 + $0x58] sm:$0xff]  }
   0xb   :  { %1362 = vmatpush3.bf16.msra.mxu0 %v1455_v2  ;;  %1447 = vmatpush3.bf16.msra.mxu1 %v1455_v2  ;;  %v1482_v29 = vld [vmem:[%s2038_s0 + $0xd0] sm:$0xff]   ;;  %v1484_v31 = vld [vmem:[%s2038_s0 + $0xd8] sm:$0xff]   ;;  %v1485_v32 = vld [vmem:[%s2038_s0 + $0x60] sm:$0xff]  }
   0xc   :  { %1363 = vmatprep.subr.bf16.mxu0 %v1456_v3  ;;  %1440 = vmatprep.subr.bf16.mxu1 %v1456_v3  ;;  %v1486_v33 = vld [vmem:[%s2038_s0 + $0xe0] sm:$0xff]   ;;  %v1487_v34 = vld [vmem:[%s2038_s0 + $0x68] sm:$0xff]   ;;  %v1489_v36 = vld [vmem:[%s2038_s0 + $0x70] sm:$0xff]  }
   0xd   :  { %v1488_v35 = vld [vmem:[%s2038_s0 + $0xe8] sm:$0xff]   ;;  %v1490_v37 = vld [vmem:[%s2038_s0 + $0xf0] sm:$0xff]   ;;  %v1491_v38 = vld [vmem:[%s2038_s0 + $0x78] sm:$0xff]  }
   0xe   :  { %v1492_v39 = vld [vmem:[%s2038_s0 + $0xf8] sm:$0xff]   ;;  %v1636_v40 = vld [vmem:[%s2039_s2] ss:$0 sm:$0xff] }
   0xf   :  { %1364 = vmatpush3.bf16.msra.mxu0 %v1456_v3  ;;  %1448 = vmatpush3.bf16.msra.mxu1 %v1456_v3 }
  0x10   :  { %1365 = vmatprep.subr.bf16.mxu0 %v1457_v6  ;;  %1441 = vmatprep.subr.bf16.mxu1 %v1457_v6 }
  0x13   :  { %1366 = vmatpush3.bf16.msra.mxu0 %v1457_v6  ;;  %1449 = vmatpush3.bf16.msra.mxu1 %v1457_v6 }
  0x14   :  { %1367 = vmatprep.subr.bf16.mxu0 %v1458_v7  ;;  %1442 = vmatprep.subr.bf16.mxu1 %v1458_v7 }
  0x17   :  { %1368 = vmatpush3.bf16.msra.mxu0 %v1458_v7  ;;  %1450 = vmatpush3.bf16.msra.mxu1 %v1458_v7 }
  0x18   :  { %1369 = vmatprep.subr.bf16.mxu0 %v1459_v8  ;;  %1443 = vmatprep.subr.bf16.mxu1 %v1459_v8 }
  0x1b   :  { %1370 = vmatpush3.bf16.msra.mxu0 %v1459_v8  ;;  %1451 = vmatpush3.bf16.msra.mxu1 %v1459_v8 }
  0x1c   :  { %1371 = vmatprep.subr.bf16.mxu0 %v1460_v9  ;;  %1444 = vmatprep.subr.bf16.mxu1 %v1460_v9 }
  0x1f   :  { %1372 = vmatpush3.bf16.msra.mxu0 %v1460_v9  ;;  %1452 = vmatpush3.bf16.msra.mxu1 %v1460_v9 }
  0x22   :  { %1374 = vmatmul.mubr.bf16.vlgmr.msra.gmra.mrb[0].mxu0 %v1463_v10  ;;  %1406 = vmatmul.mubr.bf16.vlgmr.msra.gmra.mrb[0].mxu1 %v1464_v11 }
  0x23   :  { %1377 = vmatprep.mubr.bf16.mxu0 %v1465_v12  ;;  %1409 = vmatprep.mubr.bf16.mxu1 %v1466_v13 }
  0x2a   :  { %1378 = vmatmul.mubr.bf16.gmra.mrb[4].mxu0 %v1467_v14  ;;  %1410 = vmatmul.mubr.bf16.gmra.mrb[4].mxu1 %v1468_v15 }
  0x2b   :  { %1381 = vmatprep.mubr.bf16.mxu0 %v1469_v16  ;;  %1413 = vmatprep.mubr.bf16.mxu1 %v1470_v17 }
  0x32   :  { %1382 = vmatmul.mubr.bf16.gmra.mrb[8].mxu0 %v1471_v18  ;;  %1414 = vmatmul.mubr.bf16.gmra.mrb[8].mxu1 %v1472_v19 }
  0x33   :  { %1385 = vmatprep.mubr.bf16.mxu0 %v1473_v20  ;;  %1417 = vmatprep.mubr.bf16.mxu1 %v1474_v21 }
  0x3a   :  { %1386 = vmatmul.mubr.bf16.gmra.mrb[12].mxu0 %v1475_v22  ;;  %1418 = vmatmul.mubr.bf16.gmra.mrb[12].mxu1 %v1476_v23 }
  0x3b   :  { %1389 = vmatprep.mubr.bf16.mxu0 %v1477_v24  ;;  %1421 = vmatprep.mubr.bf16.mxu1 %v1478_v25 }
  0x42   :  { %1390 = vmatmul.mubr.bf16.gmra.mrb[16].mxu0 %v1479_v26  ;;  %1422 = vmatmul.mubr.bf16.gmra.mrb[16].mxu1 %v1480_v27 }
  0x43   :  { %1393 = vmatprep.mubr.bf16.mxu0 %v1481_v28  ;;  %1425 = vmatprep.mubr.bf16.mxu1 %v1482_v29 }
  0x4a   :  { %1394 = vmatmul.mubr.bf16.gmra.mrb[20].mxu0 %v1483_v30  ;;  %1426 = vmatmul.mubr.bf16.gmra.mrb[20].mxu1 %v1484_v31 }
  0x4b   :  { %1397 = vmatprep.mubr.bf16.mxu0 %v1485_v32  ;;  %1429 = vmatprep.mubr.bf16.mxu1 %v1486_v33 }
  0x52   :  { %1398 = vmatmul.mubr.bf16.gmra.mrb[24].mxu0 %v1487_v34  ;;  %1430 = vmatmul.mubr.bf16.gmra.mrb[24].mxu1 %v1488_v35 }
  0x53   :  { %1401 = vmatprep.mubr.bf16.mxu0 %v1489_v36  ;;  %1433 = vmatprep.mubr.bf16.mxu1 %v1490_v37 }
  0x5a   :  { %1402 = vmatmul.mubr.bf16.gmra.mrb[28].mxu0 %v1491_v38  ;;  %1434 = vmatmul.mubr.bf16.gmra.mrb[28].mxu1 %v1492_v39 }
  0xf5   :  { %v1375_v41 = vpop.f32.mrb[0].mxu0  ;;  %v1407_v42 = vpop.f32.mrb[0].mxu1 }
  0xf6   :  { %v385_v43 = vadd.f32 %v1375_v41, %v1636_v40  ;;  %v513_v44 = vadd.f32 %v1407_v42, %v1636_v40  ;;  %v376_v45 = vpop.f32.mrb[1].mxu0  ;;  %v504_v46 = vpop.f32.mrb[1].mxu1 }
  0xf7   :  { %v377_v47 = vadd.f32 %v1636_v40, %v376_v45  ;;  %v505_v48 = vadd.f32 %v1636_v40, %v504_v46  ;;  %v1376_v49 = vpop.f32.mrb[2].mxu0  ;;  %v1408_v50 = vpop.f32.mrb[2].mxu1 }
  0xf8   :  { %vm633_vm1 = vcmp.ge.f32.partialorder %v385_v43, 0.0  ;;  %v697_v51 = vmul.f32 0.2, %v385_v43  ;;  %vm665_vm2 = vcmp.ge.f32.partialorder %v513_v44, 0.0  ;;  %v729_v52 = vmul.f32 0.2, %v513_v44 }
  0xf9   :  { %vm631_vm3 = vcmp.ge.f32.partialorder %v377_v47, 0.0  ;;  %v695_v53 = vmul.f32 0.2, %v377_v47  ;;  %vm663_vm4 = vcmp.ge.f32.partialorder %v505_v48, 0.0  ;;  %v727_v54 = vmul.f32 0.2, %v505_v48 }
  0xfa   :  { %v761_v55 = vsel %vm633_vm1, %v385_v43, %v697_v51  ;;  %v793_v56 = vsel %vm665_vm2, %v513_v44, %v729_v52  ;;  %v388_v57 = vadd.f32 %v1376_v49, %v1636_v40  ;;  %v516_v58 = vadd.f32 %v1408_v50, %v1636_v40  ;;  %v379_v59 = vpop.f32.mrb[3].mxu0  ;;  %v507_v60 = vpop.f32.mrb[3].mxu1 }
  0xfb   :  { %v1255_v61 = vpack.c.bf16 %v761_v55, %v761_v55  ;;  %v1287_v62 = vpack.c.bf16 %v793_v56, %v793_v56  ;;  %v759_v63 = vsel %vm631_vm3, %v377_v47, %v695_v53  ;;  %v791_v0 = vsel %vm663_vm4, %v505_v48, %v727_v54 }
  0xfc   :  { %v1253_v1 = vpack.c.bf16 %v759_v63, %v759_v63  ;;  %v1285_v2 = vpack.c.bf16 %v791_v0, %v791_v0  ;;  %vm634_vm5 = vcmp.ge.f32.partialorder %v388_v57, 0.0  ;;  %v698_v3 = vmul.f32 0.2, %v388_v57 }
  0xfd   :  { %1082 = vst.msk [vmem:[%s2040_s3 + $0x8] sm:$0xf] %vm1079_vm0, %v1255_v61  ;;  %1114 = vst.msk [vmem:[%s2040_s3 + $0x88] sm:$0xf] %vm1079_vm0, %v1287_v62  ;;  %vm666_vm6 = vcmp.ge.f32.partialorder %v516_v58, 0.0  ;;  %v380_v5 = vadd.f32 %v1636_v40, %v379_v59  ;;  %v508_v6 = vadd.f32 %v1636_v40, %v507_v60  ;;  %v1379_v7 = vpop.f32.mrb[4].mxu0 }
  0xfe   :  { %v730_v4 = vmul.f32 0.2, %v516_v58  ;;  %v1411_v8 = vpop.f32.mrb[4].mxu1  ;;  %1080 = vst.msk [vmem:[%s2040_s3] sm:$0xf] %vm1079_vm0, %v1253_v1  ;;  %v762_v9 = vsel %vm634_vm5, %v388_v57, %v698_v3  ;;  %v401_v10 = vadd.f32 %v1379_v7, %v1636_v40  ;;  %v392_v12 = vpop.f32.mrb[5].mxu0 }
  0xff   :  { %1112 = vst.msk [vmem:[%s2040_s3 + $0x80] sm:$0xf] %vm1079_vm0, %v1285_v2  ;;  %v529_v11 = vadd.f32 %v1411_v8, %v1636_v40  ;;  %v520_v13 = vpop.f32.mrb[5].mxu1  ;;  %v1256_v14 = vpack.c.bf16 %v762_v9, %v762_v9  ;;  %vm632_vm7 = vcmp.ge.f32.partialorder %v380_v5, 0.0  ;;  %v696_v16 = vmul.f32 0.2, %v380_v5 }
 0x100   :  { %v794_v15 = vsel %vm666_vm6, %v516_v58, %v730_v4  ;;  %v1380_v17 = vpop.f32.mrb[6].mxu0  ;;  %v1412_v18 = vpop.f32.mrb[6].mxu1  ;;  %vm664_vm8 = vcmp.ge.f32.partialorder %v508_v6, 0.0  ;;  %v728_v20 = vmul.f32 0.2, %v508_v6  ;;  %vm637_vm9 = vcmp.ge.f32.partialorder %v401_v10, 0.0 }
 0x101   :  { %v1288_v19 = vpack.c.bf16 %v794_v15, %v794_v15  ;;  %v395_v21 = vpop.f32.mrb[7].mxu0  ;;  %v523_v22 = vpop.f32.mrb[7].mxu1  ;;  %1083 = vst.msk [vmem:[%s2040_s3 + $0xc] sm:$0xf] %vm1079_vm0, %v1256_v14  ;;  %v760_v23 = vsel %vm632_vm7, %v380_v5, %v696_v16  ;;  %v701_v24 = vmul.f32 0.2, %v401_v10  ;;  %v393_v28 = vadd.f32 %v1636_v40, %v392_v12 }
 0x102   :  { %vm669_vm10 = vcmp.ge.f32.partialorder %v529_v11, 0.0  ;;  %v733_v25 = vmul.f32 0.2, %v529_v11  ;;  %v1254_v26 = vpack.c.bf16 %v760_v23, %v760_v23  ;;  %v792_v27 = vsel %vm664_vm8, %v508_v6, %v728_v20 }
 0x103   :  { %1115 = vst.msk [vmem:[%s2040_s3 + $0x8c] sm:$0xf] %vm1079_vm0, %v1288_v19  ;;  %v521_v29 = vadd.f32 %v1636_v40, %v520_v13  ;;  %v1286_v30 = vpack.c.bf16 %v792_v27, %v792_v27  ;;  %v765_v31 = vsel %vm637_vm9, %v401_v10, %v701_v24  ;;  %v404_v33 = vadd.f32 %v1380_v17, %v1636_v40 }
 0x104   :  { %v797_v32 = vsel %vm669_vm10, %v529_v11, %v733_v25  ;;  %1081 = vst.msk [vmem:[%s2040_s3 + $0x4] sm:$0xf] %vm1079_vm0, %v1254_v26  ;;  %v1259_v34 = vpack.c.bf16 %v765_v31, %v765_v31  ;;  %vm635_vm11 = vcmp.ge.f32.partialorder %v393_v28, 0.0  ;;  %v699_v36 = vmul.f32 0.2, %v393_v28 }
 0x105   :  { %v1291_v35 = vpack.c.bf16 %v797_v32, %v797_v32  ;;  %1113 = vst.msk [vmem:[%s2040_s3 + $0x84] sm:$0xf] %vm1079_vm0, %v1286_v30  ;;  %vm667_vm12 = vcmp.ge.f32.partialorder %v521_v29, 0.0  ;;  %v731_v37 = vmul.f32 0.2, %v521_v29  ;;  %vm638_vm13 = vcmp.ge.f32.partialorder %v404_v33, 0.0 }
 0x106   :  { %v702_v38 = vmul.f32 0.2, %v404_v33  ;;  %1086 = vst.msk [vmem:[%s2040_s3 + $0x18] sm:$0xf] %vm1079_vm0, %v1259_v34  ;;  %v763_v39 = vsel %vm635_vm11, %v393_v28, %v699_v36  ;;  %v532_v41 = vadd.f32 %v1412_v18, %v1636_v40  ;;  %v396_v42 = vadd.f32 %v1636_v40, %v395_v21  ;;  %v1383_v44 = vpop.f32.mrb[8].mxu0  ;;  %v1415_v45 = vpop.f32.mrb[8].mxu1 }
 0x107   :  { %1118 = vst.msk [vmem:[%s2040_s3 + $0x98] sm:$0xf] %vm1079_vm0, %v1291_v35  ;;  %v524_v43 = vadd.f32 %v1636_v40, %v523_v22  ;;  %v1257_v46 = vpack.c.bf16 %v763_v39, %v763_v39  ;;  %v795_v47 = vsel %vm667_vm12, %v521_v29, %v731_v37  ;;  %v417_v49 = vadd.f32 %v1383_v44, %v1636_v40  ;;  %v408_v50 = vpop.f32.mrb[9].mxu0  ;;  %v536_v51 = vpop.f32.mrb[9].mxu1 }
 0x108   :  { %v766_v48 = vsel %vm638_vm13, %v404_v33, %v702_v38  ;;  %v1289_v52 = vpack.c.bf16 %v795_v47, %v795_v47  ;;  %vm670_vm14 = vcmp.ge.f32.partialorder %v532_v41, 0.0  ;;  %v734_v54 = vmul.f32 0.2, %v532_v41  ;;  %v1384_v55 = vpop.f32.mrb[10].mxu0  ;;  %v1416_v56 = vpop.f32.mrb[10].mxu1 }
 0x109   :  { %v1260_v53 = vpack.c.bf16 %v766_v48, %v766_v48  ;;  %1084 = vst.msk [vmem:[%s2040_s3 + $0x10] sm:$0xf] %vm1079_vm0, %v1257_v46  ;;  %vm636_vm15 = vcmp.ge.f32.partialorder %v396_v42, 0.0  ;;  %v700_v57 = vmul.f32 0.2, %v396_v42  ;;  %vm668_vm1 = vcmp.ge.f32.partialorder %v524_v43, 0.0 }
 0x10a   :  { %v732_v58 = vmul.f32 0.2, %v524_v43  ;;  %1116 = vst.msk [vmem:[%s2040_s3 + $0x90] sm:$0xf] %vm1079_vm0, %v1289_v52  ;;  %v798_v59 = vsel %vm670_vm14, %v532_v41, %v734_v54  ;;  %vm641_vm2 = vcmp.ge.f32.partialorder %v417_v49, 0.0  ;;  %v545_v61 = vadd.f32 %v1415_v45, %v1636_v40  ;;  %v411_v62 = vpop.f32.mrb[11].mxu0 }
 0x10b   :  { %1087 = vst.msk [vmem:[%s2040_s3 + $0x1c] sm:$0xf] %vm1079_vm0, %v1260_v53  ;;  %v705_v60 = vmul.f32 0.2, %v417_v49  ;;  %v539_v63 = vpop.f32.mrb[11].mxu1  ;;  %v1292_v0 = vpack.c.bf16 %v798_v59, %v798_v59  ;;  %v764_v1 = vsel %vm636_vm15, %v396_v42, %v700_v57  ;;  %v409_v3 = vadd.f32 %v1636_v40, %v408_v50 }
 0x10c   :  { %v796_v2 = vsel %vm668_vm1, %v524_v43, %v732_v58  ;;  %v1258_v4 = vpack.c.bf16 %v764_v1, %v764_v1  ;;  %vm673_vm3 = vcmp.ge.f32.partialorder %v545_v61, 0.0  ;;  %v737_v8 = vmul.f32 0.2, %v545_v61 }
 0x10d   :  { %v1290_v5 = vpack.c.bf16 %v796_v2, %v796_v2  ;;  %v769_v6 = vsel %vm641_vm2, %v417_v49, %v705_v60  ;;  %1119 = vst.msk [vmem:[%s2040_s3 + $0x9c] sm:$0xf] %vm1079_vm0, %v1292_v0  ;;  %vm639_vm4 = vcmp.ge.f32.partialorder %v409_v3, 0.0  ;;  %v703_v9 = vmul.f32 0.2, %v409_v3  ;;  %v1387_v10 = vpop.f32.mrb[12].mxu0 }
 0x10e   :  { %v1263_v7 = vpack.c.bf16 %v769_v6, %v769_v6  ;;  %1085 = vst.msk [vmem:[%s2040_s3 + $0x14] sm:$0xf] %vm1079_vm0, %v1258_v4  ;;  %v537_v11 = vadd.f32 %v1636_v40, %v536_v51  ;;  %v420_v12 = vadd.f32 %v1384_v55, %v1636_v40  ;;  %v548_v13 = vadd.f32 %v1416_v56, %v1636_v40  ;;  %v1419_v15 = vpop.f32.mrb[12].mxu1  ;;  %v424_v16 = vpop.f32.mrb[13].mxu0 }
 0x10f   :  { %1117 = vst.msk [vmem:[%s2040_s3 + $0x94] sm:$0xf] %vm1079_vm0, %v1290_v5  ;;  %v412_v14 = vadd.f32 %v1636_v40, %v411_v62  ;;  %v801_v17 = vsel %vm673_vm3, %v545_v61, %v737_v8  ;;  %v767_v18 = vsel %vm639_vm4, %v409_v3, %v703_v9  ;;  %v540_v19 = vadd.f32 %v1636_v40, %v539_v63  ;;  %v552_v21 = vpop.f32.mrb[13].mxu1  ;;  %v1388_v22 = vpop.f32.mrb[14].mxu0 }
 0x110   :  { %1090 = vst.msk [vmem:[%s2040_s3 + $0x28] sm:$0xf] %vm1079_vm0, %v1263_v7  ;;  %v433_v20 = vadd.f32 %v1387_v10, %v1636_v40  ;;  %v1295_v23 = vpack.c.bf16 %v801_v17, %v801_v17  ;;  %v1261_v24 = vpack.c.bf16 %v767_v18, %v767_v18  ;;  %vm671_vm5 = vcmp.ge.f32.partialorder %v537_v11, 0.0  ;;  %v1420_v26 = vpop.f32.mrb[14].mxu1  ;;  %v427_v27 = vpop.f32.mrb[15].mxu0 }
 0x111   :  { %v735_v25 = vmul.f32 0.2, %v537_v11  ;;  %vm642_vm6 = vcmp.ge.f32.partialorder %v420_v12, 0.0  ;;  %v706_v28 = vmul.f32 0.2, %v420_v12  ;;  %vm674_vm7 = vcmp.ge.f32.partialorder %v548_v13, 0.0 }
 0x112   :  { %v738_v29 = vmul.f32 0.2, %v548_v13  ;;  %1122 = vst.msk [vmem:[%s2040_s3 + $0xa8] sm:$0xf] %vm1079_vm0, %v1295_v23  ;;  %1088 = vst.msk [vmem:[%s2040_s3 + $0x20] sm:$0xf] %vm1079_vm0, %v1261_v24  ;;  %v561_v44 = vadd.f32 %v1419_v15, %v1636_v40  ;;  %v425_v48 = vadd.f32 %v1636_v40, %v424_v16  ;;  %v553_v49 = vadd.f32 %v1636_v40, %v552_v21 }
 0x113   :  { %v799_v30 = vsel %vm671_vm5, %v537_v11, %v735_v25  ;;  %vm640_vm8 = vcmp.ge.f32.partialorder %v412_v14, 0.0  ;;  %v704_v31 = vmul.f32 0.2, %v412_v14  ;;  %vm672_vm9 = vcmp.ge.f32.partialorder %v540_v19, 0.0  ;;  %v555_v32 = vpop.f32.mrb[15].mxu1 }
 0x114   :  { %v1293_v33 = vpack.c.bf16 %v799_v30, %v799_v30  ;;  %v770_v34 = vsel %vm642_vm6, %v420_v12, %v706_v28  ;;  %v802_v35 = vsel %vm674_vm7, %v548_v13, %v738_v29  ;;  %v736_v36 = vmul.f32 0.2, %v540_v19 }
 0x115   :  { %v1264_v37 = vpack.c.bf16 %v770_v34, %v770_v34  ;;  %v1296_v38 = vpack.c.bf16 %v802_v35, %v802_v35  ;;  %v768_v39 = vsel %vm640_vm8, %v412_v14, %v704_v31  ;;  %vm645_vm10 = vcmp.ge.f32.partialorder %v433_v20, 0.0  ;;  %v1391_v45 = vpop.f32.mrb[16].mxu0  ;;  %v1423_v46 = vpop.f32.mrb[16].mxu1 }
 0x116   :  { %1120 = vst.msk [vmem:[%s2040_s3 + $0xa0] sm:$0xf] %vm1079_vm0, %v1293_v33  ;;  %v1262_v41 = vpack.c.bf16 %v768_v39, %v768_v39  ;;  %v800_v42 = vsel %vm672_vm9, %v540_v19, %v736_v36  ;;  %v709_v43 = vmul.f32 0.2, %v433_v20  ;;  %v436_v50 = vadd.f32 %v1388_v22, %v1636_v40  ;;  %v440_v51 = vpop.f32.mrb[17].mxu0  ;;  %v568_v52 = vpop.f32.mrb[17].mxu1 }
 0x117   :  { %1091 = vst.msk [vmem:[%s2040_s3 + $0x2c] sm:$0xf] %vm1079_vm0, %v1264_v37  ;;  %1123 = vst.msk [vmem:[%s2040_s3 + $0xac] sm:$0xf] %vm1079_vm0, %v1296_v38  ;;  %v1294_v47 = vpack.c.bf16 %v800_v42, %v800_v42  ;;  %vm677_vm11 = vcmp.ge.f32.partialorder %v561_v44, 0.0  ;;  %v564_v55 = vadd.f32 %v1420_v26, %v1636_v40  ;;  %v1762_v56 = vpop.f32.mrb[18].mxu0  ;;  %v428_v7 = vadd.f32 %v1636_v40, %v427_v27 }
 0x118   :  { %1089 = vst.msk [vmem:[%s2040_s3 + $0x24] sm:$0xf] %vm1079_vm0, %v1262_v41  ;;  %v773_v53 = vsel %vm645_vm10, %v433_v20, %v709_v43  ;;  %v741_v54 = vmul.f32 0.2, %v561_v44  ;;  %v1764_v57 = vpop.f32.mrb[18].mxu1  ;;  %vm643_vm12 = vcmp.ge.f32.partialorder %v425_v48, 0.0  ;;  %v556_v11 = vadd.f32 %v1636_v40, %v555_v32 }
 0x119   :  { %1121 = vst.msk [vmem:[%s2040_s3 + $0xa4] sm:$0xf] %vm1079_vm0, %v1294_v47  ;;  %v1267_v58 = vpack.c.bf16 %v773_v53, %v773_v53  ;;  %v707_v59 = vmul.f32 0.2, %v425_v48  ;;  %vm675_vm13 = vcmp.ge.f32.partialorder %v553_v49, 0.0  ;;  %v1770_v60 = vpop.f32.mrb[19].mxu0  ;;  %v449_v14 = vadd.f32 %v1391_v45, %v1636_v40 }
 0x11a   :  { %v1772_v61 = vpop.f32.mrb[19].mxu1  ;;  %v805_v62 = vsel %vm677_vm11, %v561_v44, %v741_v54  ;;  %v739_v63 = vmul.f32 0.2, %v553_v49  ;;  %vm646_vm14 = vcmp.ge.f32.partialorder %v436_v50, 0.0  ;;  %v710_v0 = vmul.f32 0.2, %v436_v50 }
 0x11b   :  { %1094 = vst.msk [vmem:[%s2040_s3 + $0x38] sm:$0xf] %vm1079_vm0, %v1267_v58  ;;  %v1299_v1 = vpack.c.bf16 %v805_v62, %v805_v62  ;;  %v771_v2 = vsel %vm643_vm12, %v425_v48, %v707_v59  ;;  %vm678_vm15 = vcmp.ge.f32.partialorder %v564_v55, 0.0  ;;  %v742_v3 = vmul.f32 0.2, %v564_v55 }
 0x11c   :  { %v1265_v4 = vpack.c.bf16 %v771_v2, %v771_v2  ;;  %v803_v5 = vsel %vm675_vm13, %v553_v49, %v739_v63  ;;  %v774_v6 = vsel %vm646_vm14, %v436_v50, %v710_v0  ;;  %vm644_vm1 = vcmp.ge.f32.partialorder %v428_v7, 0.0 }
 0x11d   :  { %1126 = vst.msk [vmem:[%s2040_s3 + $0xb8] sm:$0xf] %vm1079_vm0, %v1299_v1  ;;  %v1297_v8 = vpack.c.bf16 %v803_v5, %v803_v5  ;;  %v1268_v9 = vpack.c.bf16 %v774_v6, %v774_v6  ;;  %v806_v10 = vsel %vm678_vm15, %v564_v55, %v742_v3  ;;  %v708_v13 = vmul.f32 0.2, %v428_v7  ;;  %v1395_v15 = vpop.f32.mrb[20].mxu0  ;;  %v1427_v16 = vpop.f32.mrb[20].mxu1 }
 0x11e   :  { %1092 = vst.msk [vmem:[%s2040_s3 + $0x30] sm:$0xf] %vm1079_vm0, %v1265_v4  ;;  %v1300_v12 = vpack.c.bf16 %v806_v10, %v806_v10  ;;  %vm676_vm2 = vcmp.ge.f32.partialorder %v556_v11, 0.0  ;;  %v740_v17 = vmul.f32 0.2, %v556_v11  ;;  %v577_v18 = vadd.f32 %v1423_v46, %v1636_v40  ;;  %v456_v20 = vpop.f32.mrb[21].mxu0 }
 0x11f   :  { %1124 = vst.msk [vmem:[%s2040_s3 + $0xb0] sm:$0xf] %vm1079_vm0, %v1297_v8  ;;  %1095 = vst.msk [vmem:[%s2040_s3 + $0x3c] sm:$0xf] %vm1079_vm0, %v1268_v9  ;;  %v441_v19 = vadd.f32 %v1636_v40, %v440_v51  ;;  %v1799_v21 = vpop.f32.mrb[21].mxu1  ;;  %v772_v22 = vsel %vm644_vm1, %v428_v7, %v708_v13  ;;  %vm649_vm3 = vcmp.ge.f32.partialorder %v449_v14, 0.0  ;;  %v569_v24 = vadd.f32 %v1636_v40, %v568_v52 }
 0x120   :  { %1127 = vst.msk [vmem:[%s2040_s3 + $0xbc] sm:$0xf] %vm1079_vm0, %v1300_v12  ;;  %v713_v23 = vmul.f32 0.2, %v449_v14  ;;  %v1806_v25 = vpop.f32.mrb[22].mxu0  ;;  %v1808_v26 = vpop.f32.mrb[22].mxu1  ;;  %v1266_v27 = vpack.c.bf16 %v772_v22, %v772_v22  ;;  %v804_v28 = vsel %vm676_vm2, %v556_v11, %v740_v17  ;;  %v452_v41 = vadd.f32 %v1762_v56, %v1636_v40 }
 0x121   :  { %vm681_vm4 = vcmp.ge.f32.partialorder %v577_v18, 0.0  ;;  %v745_v29 = vmul.f32 0.2, %v577_v18  ;;  %v1810_v30 = vpop.f32.mrb[23].mxu0  ;;  %v1812_v31 = vpop.f32.mrb[23].mxu1  ;;  %v1298_v32 = vpack.c.bf16 %v804_v28, %v804_v28  ;;  %vm647_vm5 = vcmp.ge.f32.partialorder %v441_v19, 0.0 }
 0x122   :  { %v777_v33 = vsel %vm649_vm3, %v449_v14, %v713_v23  ;;  %v711_v34 = vmul.f32 0.2, %v441_v19  ;;  %1093 = vst.msk [vmem:[%s2040_s3 + $0x34] sm:$0xf] %vm1079_vm0, %v1266_v27  ;;  %vm679_vm6 = vcmp.ge.f32.partialorder %v569_v24, 0.0  ;;  %v580_v42 = vadd.f32 %v1764_v57, %v1636_v40 }
 0x123   :  { %v1271_v35 = vpack.c.bf16 %v777_v33, %v777_v33  ;;  %v809_v36 = vsel %vm681_vm4, %v577_v18, %v745_v29  ;;  %v743_v37 = vmul.f32 0.2, %v569_v24  ;;  %1125 = vst.msk [vmem:[%s2040_s3 + $0xb4] sm:$0xf] %vm1079_vm0, %v1298_v32  ;;  %v444_v45 = vadd.f32 %v1636_v40, %v1770_v60 }
 0x124   :  { %v1303_v38 = vpack.c.bf16 %v809_v36, %v809_v36  ;;  %v775_v39 = vsel %vm647_vm5, %v441_v19, %v711_v34  ;;  %v572_v46 = vadd.f32 %v1636_v40, %v1772_v61  ;;  %vm650_vm7 = vcmp.ge.f32.partialorder %v452_v41, 0.0 }
 0x125   :  { %1098 = vst.msk [vmem:[%s2040_s3 + $0x48] sm:$0xf] %vm1079_vm0, %v1271_v35  ;;  %v1269_v43 = vpack.c.bf16 %v775_v39, %v775_v39  ;;  %v807_v44 = vsel %vm679_vm6, %v569_v24, %v743_v37  ;;  %v714_v48 = vmul.f32 0.2, %v452_v41  ;;  %vm682_vm8 = vcmp.ge.f32.partialorder %v580_v42, 0.0  ;;  %v1838_v49 = vpop.f32.mrb[24].mxu0 }
 0x126   :  { %1130 = vst.msk [vmem:[%s2040_s3 + $0xc8] sm:$0xf] %vm1079_vm0, %v1303_v38  ;;  %v1301_v47 = vpack.c.bf16 %v807_v44, %v807_v44  ;;  %v1840_v50 = vpop.f32.mrb[24].mxu1  ;;  %v746_v51 = vmul.f32 0.2, %v580_v42  ;;  %vm648_vm9 = vcmp.ge.f32.partialorder %v444_v45, 0.0  ;;  %v465_v55 = vadd.f32 %v1395_v15, %v1636_v40 }
 0x127   :  { %1096 = vst.msk [vmem:[%s2040_s3 + $0x40] sm:$0xf] %vm1079_vm0, %v1269_v43  ;;  %v712_v52 = vmul.f32 0.2, %v444_v45  ;;  %vm680_vm10 = vcmp.ge.f32.partialorder %v572_v46, 0.0  ;;  %v778_v53 = vsel %vm650_vm7, %v452_v41, %v714_v48  ;;  %v593_v56 = vadd.f32 %v1427_v16, %v1636_v40  ;;  %v1852_v57 = vpop.f32.mrb[25].mxu0 }
 0x128   :  { %1128 = vst.msk [vmem:[%s2040_s3 + $0xc0] sm:$0xf] %vm1079_vm0, %v1301_v47  ;;  %v744_v54 = vmul.f32 0.2, %v572_v46  ;;  %v1854_v58 = vpop.f32.mrb[25].mxu1  ;;  %v1272_v59 = vpack.c.bf16 %v778_v53, %v778_v53  ;;  %v810_v60 = vsel %vm682_vm8, %v580_v42, %v746_v51  ;;  %v457_v62 = vadd.f32 %v1636_v40, %v456_v20  ;;  %v1858_v63 = vpop.f32.mrb[26].mxu0 }
 0x129   :  { %v776_v61 = vsel %vm648_vm9, %v444_v45, %v712_v52  ;;  %v1860_v0 = vpop.f32.mrb[26].mxu1  ;;  %v1304_v1 = vpack.c.bf16 %v810_v60, %v810_v60  ;;  %vm653_vm11 = vcmp.ge.f32.partialorder %v465_v55, 0.0  ;;  %v1863_v4 = vpop.f32.mrb[27].mxu0  ;;  %v717_v7 = vmul.f32 0.2, %v465_v55 }
 0x12a   :  { %v1270_v2 = vpack.c.bf16 %v776_v61, %v776_v61  ;;  %v808_v3 = vsel %vm680_vm10, %v572_v46, %v744_v54  ;;  %v1865_v5 = vpop.f32.mrb[27].mxu1  ;;  %1099 = vst.msk [vmem:[%s2040_s3 + $0x4c] sm:$0xf] %vm1079_vm0, %v1272_v59  ;;  %vm685_vm12 = vcmp.ge.f32.partialorder %v593_v56, 0.0  ;;  %v749_v8 = vmul.f32 0.2, %v593_v56 }
 0x12b   :  { %v1302_v6 = vpack.c.bf16 %v808_v3, %v808_v3  ;;  %1131 = vst.msk [vmem:[%s2040_s3 + $0xcc] sm:$0xf] %vm1079_vm0, %v1304_v1  ;;  %vm651_vm13 = vcmp.ge.f32.partialorder %v457_v62, 0.0  ;;  %v715_v9 = vmul.f32 0.2, %v457_v62  ;;  %v585_v10 = vadd.f32 %v1636_v40, %v1799_v21 }
 0x12c   :  { %1097 = vst.msk [vmem:[%s2040_s3 + $0x44] sm:$0xf] %vm1079_vm0, %v1270_v2  ;;  %v468_v11 = vadd.f32 %v1806_v25, %v1636_v40  ;;  %v781_v12 = vsel %vm653_vm11, %v465_v55, %v717_v7  ;;  %v813_v13 = vsel %vm685_vm12, %v593_v56, %v749_v8  ;;  %v596_v14 = vadd.f32 %v1808_v26, %v1636_v40 }
 0x12d   :  { %1129 = vst.msk [vmem:[%s2040_s3 + $0xc4] sm:$0xf] %vm1079_vm0, %v1302_v6  ;;  %v460_v15 = vadd.f32 %v1636_v40, %v1810_v30  ;;  %v1275_v16 = vpack.c.bf16 %v781_v12, %v781_v12  ;;  %v1307_v17 = vpack.c.bf16 %v813_v13, %v813_v13  ;;  %v779_v18 = vsel %vm651_vm13, %v457_v62, %v715_v9  ;;  %v1891_v19 = vpop.f32.mrb[28].mxu0  ;;  %v1893_v20 = vpop.f32.mrb[28].mxu1 }
 0x12e   :  { %vm683_vm14 = vcmp.ge.f32.partialorder %v585_v10, 0.0  ;;  %v1273_v21 = vpack.c.bf16 %v779_v18, %v779_v18  ;;  %v747_v22 = vmul.f32 0.2, %v585_v10  ;;  %vm654_vm15 = vcmp.ge.f32.partialorder %v468_v11, 0.0  ;;  %v1895_v24 = vpop.f32.mrb[29].mxu0  ;;  %v1913_v32 = vpop.f32.mrb[29].mxu1 }
 0x12f   :  { %v718_v23 = vmul.f32 0.2, %v468_v11  ;;  %1102 = vst.msk [vmem:[%s2040_s3 + $0x58] sm:$0xf] %vm1079_vm0, %v1275_v16  ;;  %1134 = vst.msk [vmem:[%s2040_s3 + $0xd8] sm:$0xf] %vm1079_vm0, %v1307_v17  ;;  %v588_v29 = vadd.f32 %v1636_v40, %v1812_v31  ;;  %v481_v30 = vadd.f32 %v1838_v49, %v1636_v40  ;;  %v609_v45 = vadd.f32 %v1840_v50, %v1636_v40 }
 0x130   :  { %vm686_vm1 = vcmp.ge.f32.partialorder %v596_v14, 0.0  ;;  %v750_v25 = vmul.f32 0.2, %v596_v14  ;;  %vm652_vm2 = vcmp.ge.f32.partialorder %v460_v15, 0.0  ;;  %v716_v26 = vmul.f32 0.2, %v460_v15 }
 0x131   :  { %1100 = vst.msk [vmem:[%s2040_s3 + $0x50] sm:$0xf] %vm1079_vm0, %v1273_v21  ;;  %v811_v27 = vsel %vm683_vm14, %v585_v10, %v747_v22  ;;  %v782_v28 = vsel %vm654_vm15, %v468_v11, %v718_v23  ;;  %v1915_v33 = vpop.f32.mrb[30].mxu0  ;;  %v1917_v38 = vpop.f32.mrb[30].mxu1  ;;  %vm684_vm3 = vcmp.ge.f32.partialorder %v588_v29, 0.0  ;;  %vm657_vm4 = vcmp.ge.f32.partialorder %v481_v30, 0.0 }
 0x132   :  { %v1305_v34 = vpack.c.bf16 %v811_v27, %v811_v27  ;;  %v1276_v35 = vpack.c.bf16 %v782_v28, %v782_v28  ;;  %v814_v36 = vsel %vm686_vm1, %v596_v14, %v750_v25  ;;  %v780_v37 = vsel %vm652_vm2, %v460_v15, %v716_v26  ;;  %v1919_v39 = vpop.f32.mrb[31].mxu0  ;;  %v1921_v31 = vpop.f32.mrb[31].mxu1 }
 0x133   :  { %v1308_v41 = vpack.c.bf16 %v814_v36, %v814_v36  ;;  %v1274_v42 = vpack.c.bf16 %v780_v37, %v780_v37  ;;  %v748_v43 = vmul.f32 0.2, %v588_v29  ;;  %v721_v44 = vmul.f32 0.2, %v481_v30 }
 0x134   :  { %1132 = vst.msk [vmem:[%s2040_s3 + $0xd0] sm:$0xf] %vm1079_vm0, %v1305_v34  ;;  %1103 = vst.msk [vmem:[%s2040_s3 + $0x5c] sm:$0xf] %vm1079_vm0, %v1276_v35  ;;  %v473_v46 = vadd.f32 %v1636_v40, %v1852_v57  ;;  %v601_v48 = vadd.f32 %v1636_v40, %v1854_v58  ;;  %v484_v49 = vadd.f32 %v1858_v63, %v1636_v40  ;;  %vm689_vm5 = vcmp.ge.f32.partialorder %v609_v45, 0.0 }
 0x135   :  { %1135 = vst.msk [vmem:[%s2040_s3 + $0xdc] sm:$0xf] %vm1079_vm0, %v1308_v41  ;;  %1101 = vst.msk [vmem:[%s2040_s3 + $0x54] sm:$0xf] %vm1079_vm0, %v1274_v42  ;;  %v812_v47 = vsel %vm684_vm3, %v588_v29, %v748_v43  ;;  %v612_v50 = vadd.f32 %v1860_v0, %v1636_v40  ;;  %v785_v52 = vsel %vm657_vm4, %v481_v30, %v721_v44  ;;  %v753_v53 = vmul.f32 0.2, %v609_v45 }
 0x136   :  { %v1306_v51 = vpack.c.bf16 %v812_v47, %v812_v47  ;;  %v1279_v54 = vpack.c.bf16 %v785_v52, %v785_v52  ;;  %vm655_vm6 = vcmp.ge.f32.partialorder %v473_v46, 0.0  ;;  %v719_v55 = vmul.f32 0.2, %v473_v46 }
 0x137   :  { %vm687_vm7 = vcmp.ge.f32.partialorder %v601_v48, 0.0  ;;  %v817_v56 = vsel %vm689_vm5, %v609_v45, %v753_v53  ;;  %v751_v57 = vmul.f32 0.2, %v601_v48  ;;  %vm658_vm8 = vcmp.ge.f32.partialorder %v484_v49, 0.0 }
 0x138   :  { %1133 = vst.msk [vmem:[%s2040_s3 + $0xd4] sm:$0xf] %vm1079_vm0, %v1306_v51  ;;  %v722_v58 = vmul.f32 0.2, %v484_v49  ;;  %1106 = vst.msk [vmem:[%s2040_s3 + $0x68] sm:$0xf] %vm1079_vm0, %v1279_v54  ;;  %v1311_v59 = vpack.c.bf16 %v817_v56, %v817_v56  ;;  %v783_v60 = vsel %vm655_vm6, %v473_v46, %v719_v55  ;;  %v476_v1 = vadd.f32 %v1636_v40, %v1863_v4 }
 0x139   :  { %vm690_vm9 = vcmp.ge.f32.partialorder %v612_v50, 0.0  ;;  %v754_v61 = vmul.f32 0.2, %v612_v50  ;;  %v1277_v62 = vpack.c.bf16 %v783_v60, %v783_v60  ;;  %v815_v63 = vsel %vm687_vm7, %v601_v48, %v751_v57 }
 0x13a   :  { %v786_v0 = vsel %vm658_vm8, %v484_v49, %v722_v58  ;;  %1138 = vst.msk [vmem:[%s2040_s3 + $0xe8] sm:$0xf] %vm1079_vm0, %v1311_v59  ;;  %v1309_v2 = vpack.c.bf16 %v815_v63, %v815_v63  ;;  %v604_v7 = vadd.f32 %v1636_v40, %v1865_v5  ;;  %vm656_vm10 = vcmp.ge.f32.partialorder %v476_v1, 0.0 }
 0x13b   :  { %v1280_v3 = vpack.c.bf16 %v786_v0, %v786_v0  ;;  %v818_v6 = vsel %vm690_vm9, %v612_v50, %v754_v61  ;;  %1104 = vst.msk [vmem:[%s2040_s3 + $0x60] sm:$0xf] %vm1079_vm0, %v1277_v62  ;;  %v720_v9 = vmul.f32 0.2, %v476_v1  ;;  %v497_v4 = vadd.f32 %v1891_v19, %v1636_v40 }
 0x13c   :  { %v1312_v8 = vpack.c.bf16 %v818_v6, %v818_v6  ;;  %1136 = vst.msk [vmem:[%s2040_s3 + $0xe0] sm:$0xf] %vm1079_vm0, %v1309_v2  ;;  %vm688_vm11 = vcmp.ge.f32.partialorder %v604_v7, 0.0  ;;  %v752_v5 = vmul.f32 0.2, %v604_v7  ;;  %v625_v10 = vadd.f32 %v1893_v20, %v1636_v40 }
 0x13d   :  { %1107 = vst.msk [vmem:[%s2040_s3 + $0x6c] sm:$0xf] %vm1079_vm0, %v1280_v3  ;;  %v489_v11 = vadd.f32 %v1636_v40, %v1895_v24  ;;  %v784_v12 = vsel %vm656_vm10, %v476_v1, %v720_v9  ;;  %vm661_vm12 = vcmp.ge.f32.partialorder %v497_v4, 0.0  ;;  %v725_v13 = vmul.f32 0.2, %v497_v4 }
 0x13e   :  { %1139 = vst.msk [vmem:[%s2040_s3 + $0xec] sm:$0xf] %vm1079_vm0, %v1312_v8  ;;  %v617_v14 = vadd.f32 %v1636_v40, %v1913_v32  ;;  %v1278_v15 = vpack.c.bf16 %v784_v12, %v784_v12  ;;  %v816_v16 = vsel %vm688_vm11, %v604_v7, %v752_v5  ;;  %vm693_vm13 = vcmp.ge.f32.partialorder %v625_v10, 0.0 }
 0x13f   :  { %v757_v17 = vmul.f32 0.2, %v625_v10  ;;  %v1310_v18 = vpack.c.bf16 %v816_v16, %v816_v16  ;;  %v789_v19 = vsel %vm661_vm12, %v497_v4, %v725_v13  ;;  %vm659_vm14 = vcmp.ge.f32.partialorder %v489_v11, 0.0 }
 0x140   :  { %v723_v20 = vmul.f32 0.2, %v489_v11  ;;  %1105 = vst.msk [vmem:[%s2040_s3 + $0x64] sm:$0xf] %vm1079_vm0, %v1278_v15  ;;  %v1283_v21 = vpack.c.bf16 %v789_v19, %v789_v19  ;;  %vm691_vm15 = vcmp.ge.f32.partialorder %v617_v14, 0.0  ;;  %v500_v26 = vadd.f32 %v1915_v33, %v1636_v40 }
 0x141   :  { %v821_v22 = vsel %vm693_vm13, %v625_v10, %v757_v17  ;;  %v755_v23 = vmul.f32 0.2, %v617_v14  ;;  %1137 = vst.msk [vmem:[%s2040_s3 + $0xe4] sm:$0xf] %vm1079_vm0, %v1310_v18  ;;  %v628_v27 = vadd.f32 %v1917_v38, %v1636_v40  ;;  %v492_v30 = vadd.f32 %v1636_v40, %v1919_v39 }
 0x142   :  { %v1315_v24 = vpack.c.bf16 %v821_v22, %v821_v22  ;;  %v787_v25 = vsel %vm659_vm14, %v489_v11, %v723_v20  ;;  %1110 = vst.msk [vmem:[%s2040_s3 + $0x78] sm:$0xf] %vm1079_vm0, %v1283_v21  ;;  %v620_v32 = vadd.f32 %v1636_v40, %v1921_v31  ;;  %vm662_vm1 = vcmp.ge.f32.partialorder %v500_v26, 0.0 }
 0x143   :  { %v1281_v28 = vpack.c.bf16 %v787_v25, %v787_v25  ;;  %v819_v29 = vsel %vm691_vm15, %v617_v14, %v755_v23  ;;  %v726_v34 = vmul.f32 0.2, %v500_v26  ;;  %vm694_vm2 = vcmp.ge.f32.partialorder %v628_v27, 0.0 }
 0x144   :  { %1142 = vst.msk [vmem:[%s2040_s3 + $0xf8] sm:$0xf] %vm1079_vm0, %v1315_v24  ;;  %v1313_v33 = vpack.c.bf16 %v819_v29, %v819_v29  ;;  %v758_v35 = vmul.f32 0.2, %v628_v27  ;;  %vm660_vm3 = vcmp.ge.f32.partialorder %v492_v30, 0.0  ;;  %vm692_vm4 = vcmp.ge.f32.partialorder %v620_v32, 0.0 }
 0x145   :  { %1108 = vst.msk [vmem:[%s2040_s3 + $0x70] sm:$0xf] %vm1079_vm0, %v1281_v28  ;;  %v724_v36 = vmul.f32 0.2, %v492_v30  ;;  %v790_v40 = vsel %vm662_vm1, %v500_v26, %v726_v34  ;;  %v756_v37 = vmul.f32 0.2, %v620_v32 }
 0x146   :  { %1140 = vst.msk [vmem:[%s2040_s3 + $0xf0] sm:$0xf] %vm1079_vm0, %v1313_v33  ;;  %v1284_v38 = vpack.c.bf16 %v790_v40, %v790_v40  ;;  %v822_v39 = vsel %vm694_vm2, %v628_v27, %v758_v35 }
 0x147   :  { %v788_v41 = vsel %vm660_vm3, %v492_v30, %v724_v36  ;;  %v1316_v42 = vpack.c.bf16 %v822_v39, %v822_v39  ;;  %v820_v31 = vsel %vm692_vm4, %v620_v32, %v756_v37 }
 0x148   :  { %v1282_v43 = vpack.c.bf16 %v788_v41, %v788_v41  ;;  %1111 = vst.msk [vmem:[%s2040_s3 + $0x7c] sm:$0xf] %vm1079_vm0, %v1284_v38  ;;  %v1314_v44 = vpack.c.bf16 %v820_v31, %v820_v31 }
 0x149   :  { %1143 = vst.msk [vmem:[%s2040_s3 + $0xfc] sm:$0xf] %vm1079_vm0, %v1316_v42 }
 0x14a   :  { %1109 = vst.msk [vmem:[%s2040_s3 + $0x74] sm:$0xf] %vm1079_vm0, %v1282_v43  ;;  %1141 = vst.msk [vmem:[%s2040_s3 + $0xf4] sm:$0xf] %vm1079_vm0, %v1314_v44 }

// kernel: discriminator2_mul2_forward.5
= control target key start
LH: loop header
LB: loop body
LE: loop exit
PB: predicated region body
PF: predicated region fallthrough
CT: control target
= control target key end

     0   :  { %vm942_vm0 = vcmask 392192   ;;  %vm4176_vm1 = vcmask 60416   ;;  %s8258_s1 = inlined_call_operand.vmem [shape: bf16[48,8], index: 1, kind: input, shape index: {}]   ;;  %s8259_s0 = inlined_call_operand.vmem [shape: bf16[2048,48], index: 0, kind: input, shape index: {}]   ;;  %s8260_s2 = inlined_call_operand.vmem [shape: f32[1,8], index: 2, kind: input, shape index: {}]   ;;  %s8261_s3 = inlined_call_operand.vmem [shape: bf16[2048,8], index: 3, kind: output, shape index: {}]  }
   0x1   :  { %v5608_v0 = vld [vmem:[%s8258_s1] sm:$0xff]   ;;  %v5609_v1 = vld [vmem:[%s8258_s1 + $0x8] sm:$0xff]   ;;  %v5610_v2 = vld [vmem:[%s8258_s1 + $0x10] sm:$0xff]  }
   0x2   :  { %5340 = vmatprep.subr.bf16.mxu0 %v5608_v0  ;;  %5602 = vmatprep.subr.bf16.mxu1 %v5608_v0  ;;  %v5611_v3 = vld [vmem:[%s8259_s0] sm:$0xff]   ;;  %v5613_v5 = vld [vmem:[%s8259_s0 + $0x8] sm:$0xff]   ;;  %v5615_v7 = vld [vmem:[%s8259_s0 + $0x10] sm:$0xff]  }
   0x3   :  { %5341 = vmatpush3.bf16.msra.mxu0 %v5608_v0  ;;  %5605 = vmatpush3.bf16.msra.mxu1 %v5608_v0  ;;  %v5612_v4 = vld [vmem:[%s8259_s0 + $0x200] sm:$0xff]   ;;  %v5614_v6 = vld [vmem:[%s8259_s0 + $0x208] sm:$0xff]   ;;  %v5616_v8 = vld [vmem:[%s8259_s0 + $0x210] sm:$0xff]  }
   0x4   :  { %5342 = vmatprep.subr.bf16.mxu0 %v5609_v1  ;;  %5603 = vmatprep.subr.bf16.mxu1 %v5609_v1  ;;  %v5617_v9 = vld [vmem:[%s8259_s0 + $0x18] sm:$0xff]   ;;  %v5619_v11 = vld [vmem:[%s8259_s0 + $0x20] sm:$0xff]   ;;  %v5621_v13 = vld [vmem:[%s8259_s0 + $0x28] sm:$0xff]  }
   0x5   :  { %5346 = vmatprep.mubr.msk.bf16.mxu0 %vm942_vm0, %v5611_v3  ;;  %5474 = vmatprep.mubr.msk.bf16.mxu1 %vm942_vm0, %v5612_v4  ;;  %v5618_v10 = vld [vmem:[%s8259_s0 + $0x218] sm:$0xff]   ;;  %v5620_v12 = vld [vmem:[%s8259_s0 + $0x220] sm:$0xff]   ;;  %v5622_v14 = vld [vmem:[%s8259_s0 + $0x228] sm:$0xff]  }
   0x6   :  { %v5623_v15 = vld [vmem:[%s8259_s0 + $0x30] sm:$0xff]   ;;  %v5625_v17 = vld [vmem:[%s8259_s0 + $0x38] sm:$0xff]   ;;  %v5627_v19 = vld [vmem:[%s8259_s0 + $0x40] sm:$0xff]  }
   0x7   :  { %5343 = vmatpush3.bf16.msra.mxu0 %v5609_v1  ;;  %5606 = vmatpush3.bf16.msra.mxu1 %v5609_v1  ;;  %v5624_v16 = vld [vmem:[%s8259_s0 + $0x230] sm:$0xff]   ;;  %v5626_v18 = vld [vmem:[%s8259_s0 + $0x238] sm:$0xff]   ;;  %v5628_v20 = vld [vmem:[%s8259_s0 + $0x240] sm:$0xff]  }
   0x8   :  { %5344 = vmatprep.subr.bf16.mxu0 %v5610_v2  ;;  %5604 = vmatprep.subr.bf16.mxu1 %v5610_v2  ;;  %v5629_v21 = vld [vmem:[%s8259_s0 + $0x48] sm:$0xff]   ;;  %v5631_v23 = vld [vmem:[%s8259_s0 + $0x50] sm:$0xff]   ;;  %v5633_v25 = vld [vmem:[%s8259_s0 + $0x58] sm:$0xff]  }
   0x9   :  { %v5630_v22 = vld [vmem:[%s8259_s0 + $0x248] sm:$0xff]   ;;  %v5632_v24 = vld [vmem:[%s8259_s0 + $0x250] sm:$0xff]   ;;  %v5634_v26 = vld [vmem:[%s8259_s0 + $0x258] sm:$0xff]  }
   0xa   :  { %v5635_v27 = vld [vmem:[%s8259_s0 + $0x60] sm:$0xff]   ;;  %v5637_v29 = vld [vmem:[%s8259_s0 + $0x68] sm:$0xff]   ;;  %v5639_v31 = vld [vmem:[%s8259_s0 + $0x70] sm:$0xff]  }
   0xb   :  { %5345 = vmatpush3.bf16.msra.mxu0 %v5610_v2  ;;  %5607 = vmatpush3.bf16.msra.mxu1 %v5610_v2  ;;  %v5636_v28 = vld [vmem:[%s8259_s0 + $0x260] sm:$0xff]   ;;  %v5638_v30 = vld [vmem:[%s8259_s0 + $0x268] sm:$0xff]   ;;  %v5640_v32 = vld [vmem:[%s8259_s0 + $0x270] sm:$0xff]  }
   0xc   :  { %v5641_v33 = vld [vmem:[%s8259_s0 + $0x78] sm:$0xff]   ;;  %v5643_v35 = vld [vmem:[%s8259_s0 + $0x80] sm:$0xff]   ;;  %v5645_v37 = vld [vmem:[%s8259_s0 + $0x88] sm:$0xff]  }
   0xd   :  { %v5642_v34 = vld [vmem:[%s8259_s0 + $0x278] sm:$0xff]   ;;  %v5644_v36 = vld [vmem:[%s8259_s0 + $0x280] sm:$0xff]   ;;  %v5646_v38 = vld [vmem:[%s8259_s0 + $0x288] sm:$0xff]  }
   0xe   :  { %5347 = vmatmul.mubr.msk.bf16.vlgmr.msra.gmra.mrb[0].mxu0 %vm942_vm0, %v5613_v5  ;;  %5475 = vmatmul.mubr.msk.bf16.vlgmr.msra.gmra.mrb[0].mxu1 %vm942_vm0, %v5614_v6  ;;  %v5647_v39 = vld [vmem:[%s8259_s0 + $0x90] sm:$0xff]   ;;  %v5649_v41 = vld [vmem:[%s8259_s0 + $0x98] sm:$0xff]   ;;  %v5651_v43 = vld [vmem:[%s8259_s0 + $0xa0] sm:$0xff]  }
   0xf   :  { %5350 = vmatprep.mubr.msk.bf16.mxu0 %vm942_vm0, %v5615_v7  ;;  %5478 = vmatprep.mubr.msk.bf16.mxu1 %vm942_vm0, %v5616_v8  ;;  %v5648_v40 = vld [vmem:[%s8259_s0 + $0x290] sm:$0xff]   ;;  %v5650_v42 = vld [vmem:[%s8259_s0 + $0x298] sm:$0xff]   ;;  %v5652_v44 = vld [vmem:[%s8259_s0 + $0x2a0] sm:$0xff]  }
  0x10   :  { %v5653_v45 = vld [vmem:[%s8259_s0 + $0xa8] sm:$0xff]   ;;  %v5655_v47 = vld [vmem:[%s8259_s0 + $0xb0] sm:$0xff]   ;;  %v5657_v49 = vld [vmem:[%s8259_s0 + $0xb8] sm:$0xff]  }
  0x11   :  { %v5654_v46 = vld [vmem:[%s8259_s0 + $0x2a8] sm:$0xff]   ;;  %v5656_v48 = vld [vmem:[%s8259_s0 + $0x2b0] sm:$0xff]   ;;  %v5658_v50 = vld [vmem:[%s8259_s0 + $0x2b8] sm:$0xff]  }
  0x12   :  { %v5659_v51 = vld [vmem:[%s8259_s0 + $0xc0] sm:$0xff]   ;;  %v5661_v53 = vld [vmem:[%s8259_s0 + $0xc8] sm:$0xff]   ;;  %v5663_v55 = vld [vmem:[%s8259_s0 + $0xd0] sm:$0xff]  }
  0x13   :  { %v5660_v52 = vld [vmem:[%s8259_s0 + $0x2c0] sm:$0xff]   ;;  %v5662_v54 = vld [vmem:[%s8259_s0 + $0x2c8] sm:$0xff]   ;;  %v5664_v56 = vld [vmem:[%s8259_s0 + $0x2d0] sm:$0xff]  }
  0x14   :  { %v5665_v57 = vld [vmem:[%s8259_s0 + $0xd8] sm:$0xff]   ;;  %v5667_v59 = vld [vmem:[%s8259_s0 + $0xe0] sm:$0xff]   ;;  %v5669_v61 = vld [vmem:[%s8259_s0 + $0xe8] sm:$0xff]  }
  0x15   :  { %v5666_v58 = vld [vmem:[%s8259_s0 + $0x2d8] sm:$0xff]   ;;  %v5668_v60 = vld [vmem:[%s8259_s0 + $0x2e0] sm:$0xff]   ;;  %v5670_v62 = vld [vmem:[%s8259_s0 + $0x2e8] sm:$0xff]  }
  0x16   :  { %5351 = vmatmul.mubr.msk.bf16.gmra.mrb[4].mxu0 %vm942_vm0, %v5617_v9  ;;  %5479 = vmatmul.mubr.msk.bf16.gmra.mrb[4].mxu1 %vm942_vm0, %v5618_v10  ;;  %v5671_v63 = vld [vmem:[%s8259_s0 + $0xf0] sm:$0xff]   ;;  %v5673_v1 = vld [vmem:[%s8259_s0 + $0xf8] sm:$0xff]   ;;  %v5675_v3 = vld [vmem:[%s8259_s0 + $0x100] sm:$0xff]  }
  0x17   :  { %5354 = vmatprep.mubr.msk.bf16.mxu0 %vm942_vm0, %v5619_v11  ;;  %5482 = vmatprep.mubr.msk.bf16.mxu1 %vm942_vm0, %v5620_v12  ;;  %v5672_v0 = vld [vmem:[%s8259_s0 + $0x2f0] sm:$0xff]   ;;  %v5674_v2 = vld [vmem:[%s8259_s0 + $0x2f8] sm:$0xff]   ;;  %v5676_v4 = vld [vmem:[%s8259_s0 + $0x300] sm:$0xff]  }
  0x18   :  { %v5677_v5 = vld [vmem:[%s8259_s0 + $0x108] sm:$0xff]   ;;  %v5679_v7 = vld [vmem:[%s8259_s0 + $0x110] sm:$0xff]   ;;  %v5681_v9 = vld [vmem:[%s8259_s0 + $0x118] sm:$0xff]  }
  0x19   :  { %v5678_v6 = vld [vmem:[%s8259_s0 + $0x308] sm:$0xff]   ;;  %v5680_v8 = vld [vmem:[%s8259_s0 + $0x310] sm:$0xff]   ;;  %v5682_v10 = vld [vmem:[%s8259_s0 + $0x318] sm:$0xff]  }
  0x1a   :  { %v5683_v11 = vld [vmem:[%s8259_s0 + $0x120] sm:$0xff]  }
  0x1b   :  { %v5684_v12 = vld [vmem:[%s8259_s0 + $0x320] sm:$0xff]  }
  0x1e   :  { %5355 = vmatmul.mubr.msk.bf16.gmra.mrb[8].mxu0 %vm942_vm0, %v5621_v13  ;;  %5483 = vmatmul.mubr.msk.bf16.gmra.mrb[8].mxu1 %vm942_vm0, %v5622_v14  ;;  %v5685_v13 = vld [vmem:[%s8259_s0 + $0x128] sm:$0xff]  }
  0x1f   :  { %5358 = vmatprep.mubr.msk.bf16.mxu0 %vm942_vm0, %v5623_v15  ;;  %5486 = vmatprep.mubr.msk.bf16.mxu1 %vm942_vm0, %v5624_v16  ;;  %v5686_v14 = vld [vmem:[%s8259_s0 + $0x328] sm:$0xff]   ;;  %v5687_v15 = vld [vmem:[%s8259_s0 + $0x130] sm:$0xff]  }
  0x20   :  { %v5688_v16 = vld [vmem:[%s8259_s0 + $0x330] sm:$0xff]  }
  0x26   :  { %5359 = vmatmul.mubr.msk.bf16.gmra.mrb[12].mxu0 %vm942_vm0, %v5625_v17  ;;  %5487 = vmatmul.mubr.msk.bf16.gmra.mrb[12].mxu1 %vm942_vm0, %v5626_v18  ;;  %v5689_v17 = vld [vmem:[%s8259_s0 + $0x138] sm:$0xff]  }
  0x27   :  { %5362 = vmatprep.mubr.msk.bf16.mxu0 %vm942_vm0, %v5627_v19  ;;  %5490 = vmatprep.mubr.msk.bf16.mxu1 %vm942_vm0, %v5628_v20  ;;  %v5690_v18 = vld [vmem:[%s8259_s0 + $0x338] sm:$0xff]   ;;  %v5691_v19 = vld [vmem:[%s8259_s0 + $0x140] sm:$0xff]  }
  0x28   :  { %v5692_v20 = vld [vmem:[%s8259_s0 + $0x340] sm:$0xff]  }
  0x2e   :  { %5363 = vmatmul.mubr.msk.bf16.gmra.mrb[16].mxu0 %vm942_vm0, %v5629_v21  ;;  %5491 = vmatmul.mubr.msk.bf16.gmra.mrb[16].mxu1 %vm942_vm0, %v5630_v22  ;;  %v5693_v21 = vld [vmem:[%s8259_s0 + $0x148] sm:$0xff]  }
  0x2f   :  { %5366 = vmatprep.mubr.msk.bf16.mxu0 %vm942_vm0, %v5631_v23  ;;  %5494 = vmatprep.mubr.msk.bf16.mxu1 %vm942_vm0, %v5632_v24  ;;  %v5694_v22 = vld [vmem:[%s8259_s0 + $0x348] sm:$0xff]   ;;  %v5695_v23 = vld [vmem:[%s8259_s0 + $0x150] sm:$0xff]  }
  0x30   :  { %v5696_v24 = vld [vmem:[%s8259_s0 + $0x350] sm:$0xff]  }
  0x36   :  { %5367 = vmatmul.mubr.msk.bf16.gmra.mrb[20].mxu0 %vm942_vm0, %v5633_v25  ;;  %5495 = vmatmul.mubr.msk.bf16.gmra.mrb[20].mxu1 %vm942_vm0, %v5634_v26  ;;  %v5697_v25 = vld [vmem:[%s8259_s0 + $0x158] sm:$0xff]  }
  0x37   :  { %5370 = vmatprep.mubr.msk.bf16.mxu0 %vm942_vm0, %v5635_v27  ;;  %5498 = vmatprep.mubr.msk.bf16.mxu1 %vm942_vm0, %v5636_v28  ;;  %v5698_v26 = vld [vmem:[%s8259_s0 + $0x358] sm:$0xff]   ;;  %v5699_v27 = vld [vmem:[%s8259_s0 + $0x160] sm:$0xff]  }
  0x38   :  { %v5700_v28 = vld [vmem:[%s8259_s0 + $0x360] sm:$0xff]  }
  0x3e   :  { %5371 = vmatmul.mubr.msk.bf16.gmra.mrb[24].mxu0 %vm942_vm0, %v5637_v29  ;;  %5499 = vmatmul.mubr.msk.bf16.gmra.mrb[24].mxu1 %vm942_vm0, %v5638_v30  ;;  %v5701_v29 = vld [vmem:[%s8259_s0 + $0x168] sm:$0xff]  }
  0x3f   :  { %5374 = vmatprep.mubr.msk.bf16.mxu0 %vm942_vm0, %v5639_v31  ;;  %5502 = vmatprep.mubr.msk.bf16.mxu1 %vm942_vm0, %v5640_v32  ;;  %v5702_v30 = vld [vmem:[%s8259_s0 + $0x368] sm:$0xff]   ;;  %v5703_v31 = vld [vmem:[%s8259_s0 + $0x170] sm:$0xff]  }
  0x40   :  { %v5704_v32 = vld [vmem:[%s8259_s0 + $0x370] sm:$0xff]  }
  0x46   :  { %5375 = vmatmul.mubr.msk.bf16.gmra.mrb[28].mxu0 %vm942_vm0, %v5641_v33  ;;  %5503 = vmatmul.mubr.msk.bf16.gmra.mrb[28].mxu1 %vm942_vm0, %v5642_v34  ;;  %v5705_v33 = vld [vmem:[%s8259_s0 + $0x178] sm:$0xff]  }
  0x47   :  { %5378 = vmatprep.mubr.msk.bf16.mxu0 %vm942_vm0, %v5643_v35  ;;  %5506 = vmatprep.mubr.msk.bf16.mxu1 %vm942_vm0, %v5644_v36  ;;  %v5706_v34 = vld [vmem:[%s8259_s0 + $0x378] sm:$0xff]   ;;  %v5707_v35 = vld [vmem:[%s8259_s0 + $0x180] sm:$0xff]  }
  0x48   :  { %v5708_v36 = vld [vmem:[%s8259_s0 + $0x380] sm:$0xff]  }
  0x4e   :  { %5379 = vmatmul.mubr.msk.bf16.gmra.mrb[32].mxu0 %vm942_vm0, %v5645_v37  ;;  %5507 = vmatmul.mubr.msk.bf16.gmra.mrb[32].mxu1 %vm942_vm0, %v5646_v38  ;;  %v5709_v37 = vld [vmem:[%s8259_s0 + $0x188] sm:$0xff]  }
  0x4f   :  { %5382 = vmatprep.mubr.msk.bf16.mxu0 %vm942_vm0, %v5647_v39  ;;  %5510 = vmatprep.mubr.msk.bf16.mxu1 %vm942_vm0, %v5648_v40  ;;  %v5710_v38 = vld [vmem:[%s8259_s0 + $0x388] sm:$0xff]   ;;  %v5711_v39 = vld [vmem:[%s8259_s0 + $0x190] sm:$0xff]  }
  0x50   :  { %v5712_v40 = vld [vmem:[%s8259_s0 + $0x390] sm:$0xff]  }
  0x56   :  { %5383 = vmatmul.mubr.msk.bf16.gmra.mrb[36].mxu0 %vm942_vm0, %v5649_v41  ;;  %5511 = vmatmul.mubr.msk.bf16.gmra.mrb[36].mxu1 %vm942_vm0, %v5650_v42  ;;  %v5713_v41 = vld [vmem:[%s8259_s0 + $0x198] sm:$0xff]  }
  0x57   :  { %5386 = vmatprep.mubr.msk.bf16.mxu0 %vm942_vm0, %v5651_v43  ;;  %5514 = vmatprep.mubr.msk.bf16.mxu1 %vm942_vm0, %v5652_v44  ;;  %v5714_v42 = vld [vmem:[%s8259_s0 + $0x398] sm:$0xff]   ;;  %v5715_v43 = vld [vmem:[%s8259_s0 + $0x1a0] sm:$0xff]  }
  0x58   :  { %v5716_v44 = vld [vmem:[%s8259_s0 + $0x3a0] sm:$0xff]  }
  0x5e   :  { %5387 = vmatmul.mubr.msk.bf16.gmra.mrb[40].mxu0 %vm942_vm0, %v5653_v45  ;;  %5515 = vmatmul.mubr.msk.bf16.gmra.mrb[40].mxu1 %vm942_vm0, %v5654_v46  ;;  %v5717_v45 = vld [vmem:[%s8259_s0 + $0x1a8] sm:$0xff]  }
  0x5f   :  { %5390 = vmatprep.mubr.msk.bf16.mxu0 %vm942_vm0, %v5655_v47  ;;  %5518 = vmatprep.mubr.msk.bf16.mxu1 %vm942_vm0, %v5656_v48  ;;  %v5718_v46 = vld [vmem:[%s8259_s0 + $0x3a8] sm:$0xff]   ;;  %v5719_v47 = vld [vmem:[%s8259_s0 + $0x1b0] sm:$0xff]  }
  0x60   :  { %v5720_v48 = vld [vmem:[%s8259_s0 + $0x3b0] sm:$0xff]  }
  0x66   :  { %5391 = vmatmul.mubr.msk.bf16.gmra.mrb[44].mxu0 %vm942_vm0, %v5657_v49  ;;  %5519 = vmatmul.mubr.msk.bf16.gmra.mrb[44].mxu1 %vm942_vm0, %v5658_v50  ;;  %v6212_v49 = vld [vmem:[%s8260_s2] ss:$0 sm:$0xff] }
  0x67   :  { %5394 = vmatprep.mubr.msk.bf16.mxu0 %vm942_vm0, %v5659_v51  ;;  %5522 = vmatprep.mubr.msk.bf16.mxu1 %vm942_vm0, %v5660_v52 }
  0x6e   :  { %5395 = vmatmul.mubr.msk.bf16.gmra.mrb[48].mxu0 %vm942_vm0, %v5661_v53  ;;  %5523 = vmatmul.mubr.msk.bf16.gmra.mrb[48].mxu1 %vm942_vm0, %v5662_v54 }
  0x6f   :  { %5398 = vmatprep.mubr.msk.bf16.mxu0 %vm942_vm0, %v5663_v55  ;;  %5526 = vmatprep.mubr.msk.bf16.mxu1 %vm942_vm0, %v5664_v56  ;;  %v5721_v56 = vld [vmem:[%s8259_s0 + $0x1b8] sm:$0xff]  }
  0x76   :  { %5399 = vmatmul.mubr.msk.bf16.gmra.mrb[52].mxu0 %vm942_vm0, %v5665_v57  ;;  %5527 = vmatmul.mubr.msk.bf16.gmra.mrb[52].mxu1 %vm942_vm0, %v5666_v58 }
  0x77   :  { %5402 = vmatprep.mubr.msk.bf16.mxu0 %vm942_vm0, %v5667_v59  ;;  %5530 = vmatprep.mubr.msk.bf16.mxu1 %vm942_vm0, %v5668_v60 }
  0x7e   :  { %5403 = vmatmul.mubr.msk.bf16.gmra.mrb[56].mxu0 %vm942_vm0, %v5669_v61  ;;  %5531 = vmatmul.mubr.msk.bf16.gmra.mrb[56].mxu1 %vm942_vm0, %v5670_v62  ;;  %v5722_v61 = vld [vmem:[%s8259_s0 + $0x3b8] sm:$0xff]   ;;  %v5723_v62 = vld [vmem:[%s8259_s0 + $0x1c0] sm:$0xff]  }
  0x7f   :  { %5406 = vmatprep.mubr.msk.bf16.mxu0 %vm942_vm0, %v5671_v63  ;;  %5534 = vmatprep.mubr.msk.bf16.mxu1 %vm942_vm0, %v5672_v0  ;;  %v5724_v63 = vld [vmem:[%s8259_s0 + $0x3c0] sm:$0xff]  }
  0x86   :  { %5407 = vmatmul.mubr.msk.bf16.gmra.mrb[60].mxu0 %vm942_vm0, %v5673_v1  ;;  %5535 = vmatmul.mubr.msk.bf16.gmra.mrb[60].mxu1 %vm942_vm0, %v5674_v2 }
  0x87   :  { %5410 = vmatprep.mubr.msk.bf16.mxu0 %vm942_vm0, %v5675_v3  ;;  %5538 = vmatprep.mubr.msk.bf16.mxu1 %vm942_vm0, %v5676_v4 }
  0x8e   :  { %5411 = vmatmul.mubr.msk.bf16.gmra.mrb[64].mxu0 %vm942_vm0, %v5677_v5  ;;  %5539 = vmatmul.mubr.msk.bf16.gmra.mrb[64].mxu1 %vm942_vm0, %v5678_v6 }
  0x8f   :  { %5414 = vmatprep.mubr.msk.bf16.mxu0 %vm942_vm0, %v5679_v7  ;;  %5542 = vmatprep.mubr.msk.bf16.mxu1 %vm942_vm0, %v5680_v8 }
  0x96   :  { %5415 = vmatmul.mubr.msk.bf16.gmra.mrb[68].mxu0 %vm942_vm0, %v5681_v9  ;;  %5543 = vmatmul.mubr.msk.bf16.gmra.mrb[68].mxu1 %vm942_vm0, %v5682_v10 }
  0x97   :  { %5418 = vmatprep.mubr.msk.bf16.mxu0 %vm942_vm0, %v5683_v11  ;;  %5546 = vmatprep.mubr.msk.bf16.mxu1 %vm942_vm0, %v5684_v12 }
  0x9e   :  { %5419 = vmatmul.mubr.msk.bf16.gmra.mrb[72].mxu0 %vm942_vm0, %v5685_v13  ;;  %5547 = vmatmul.mubr.msk.bf16.gmra.mrb[72].mxu1 %vm942_vm0, %v5686_v14 }
  0x9f   :  { %5422 = vmatprep.mubr.msk.bf16.mxu0 %vm942_vm0, %v5687_v15  ;;  %5550 = vmatprep.mubr.msk.bf16.mxu1 %vm942_vm0, %v5688_v16 }
  0xa6   :  { %5423 = vmatmul.mubr.msk.bf16.gmra.mrb[76].mxu0 %vm942_vm0, %v5689_v17  ;;  %5551 = vmatmul.mubr.msk.bf16.gmra.mrb[76].mxu1 %vm942_vm0, %v5690_v18 }
  0xa7   :  { %5426 = vmatprep.mubr.msk.bf16.mxu0 %vm942_vm0, %v5691_v19  ;;  %5554 = vmatprep.mubr.msk.bf16.mxu1 %vm942_vm0, %v5692_v20 }
  0xae   :  { %5427 = vmatmul.mubr.msk.bf16.gmra.mrb[80].mxu0 %vm942_vm0, %v5693_v21  ;;  %5555 = vmatmul.mubr.msk.bf16.gmra.mrb[80].mxu1 %vm942_vm0, %v5694_v22 }
  0xaf   :  { %5430 = vmatprep.mubr.msk.bf16.mxu0 %vm942_vm0, %v5695_v23  ;;  %5558 = vmatprep.mubr.msk.bf16.mxu1 %vm942_vm0, %v5696_v24 }
  0xb6   :  { %5431 = vmatmul.mubr.msk.bf16.gmra.mrb[84].mxu0 %vm942_vm0, %v5697_v25  ;;  %5559 = vmatmul.mubr.msk.bf16.gmra.mrb[84].mxu1 %vm942_vm0, %v5698_v26 }
  0xb7   :  { %5434 = vmatprep.mubr.msk.bf16.mxu0 %vm942_vm0, %v5699_v27  ;;  %5562 = vmatprep.mubr.msk.bf16.mxu1 %vm942_vm0, %v5700_v28  ;;  %v5725_v27 = vld [vmem:[%s8259_s0 + $0x1c8] sm:$0xff]  }
  0xb8   :  { %v5726_v28 = vld [vmem:[%s8259_s0 + $0x3c8] sm:$0xff]  }
  0xbe   :  { %5435 = vmatmul.mubr.msk.bf16.gmra.mrb[88].mxu0 %vm942_vm0, %v5701_v29  ;;  %5563 = vmatmul.mubr.msk.bf16.gmra.mrb[88].mxu1 %vm942_vm0, %v5702_v30  ;;  %v5727_v29 = vld [vmem:[%s8259_s0 + $0x1d0] sm:$0xff]  }
  0xbf   :  { %5438 = vmatprep.mubr.msk.bf16.mxu0 %vm942_vm0, %v5703_v31  ;;  %5566 = vmatprep.mubr.msk.bf16.mxu1 %vm942_vm0, %v5704_v32 }
  0xc6   :  { %5439 = vmatmul.mubr.msk.bf16.gmra.mrb[92].mxu0 %vm942_vm0, %v5705_v33  ;;  %5567 = vmatmul.mubr.msk.bf16.gmra.mrb[92].mxu1 %vm942_vm0, %v5706_v34 }
  0xc7   :  { %5442 = vmatprep.mubr.msk.bf16.mxu0 %vm942_vm0, %v5707_v35  ;;  %5570 = vmatprep.mubr.msk.bf16.mxu1 %vm942_vm0, %v5708_v36  ;;  %v5728_v35 = vld [vmem:[%s8259_s0 + $0x3d0] sm:$0xff]  }
  0xce   :  { %5443 = vmatmul.mubr.msk.bf16.gmra.mrb[96].mxu0 %vm942_vm0, %v5709_v37  ;;  %5571 = vmatmul.mubr.msk.bf16.gmra.mrb[96].mxu1 %vm942_vm0, %v5710_v38 }
  0xcf   :  { %5446 = vmatprep.mubr.msk.bf16.mxu0 %vm942_vm0, %v5711_v39  ;;  %5574 = vmatprep.mubr.msk.bf16.mxu1 %vm942_vm0, %v5712_v40 }
  0xd6   :  { %5447 = vmatmul.mubr.msk.bf16.gmra.mrb[100].mxu0 %vm942_vm0, %v5713_v41  ;;  %5575 = vmatmul.mubr.msk.bf16.gmra.mrb[100].mxu1 %vm942_vm0, %v5714_v42 }
  0xd7   :  { %5450 = vmatprep.mubr.msk.bf16.mxu0 %vm942_vm0, %v5715_v43  ;;  %5578 = vmatprep.mubr.msk.bf16.mxu1 %vm942_vm0, %v5716_v44 }
  0xde   :  { %5451 = vmatmul.mubr.msk.bf16.gmra.mrb[104].mxu0 %vm942_vm0, %v5717_v45  ;;  %5579 = vmatmul.mubr.msk.bf16.gmra.mrb[104].mxu1 %vm942_vm0, %v5718_v46 }
  0xdf   :  { %5454 = vmatprep.mubr.msk.bf16.mxu0 %vm942_vm0, %v5719_v47  ;;  %5582 = vmatprep.mubr.msk.bf16.mxu1 %vm942_vm0, %v5720_v48 }
  0xe1   :  { %v5348_v50 = vpop.f32.mrb[0].mxu0  ;;  %v5476_v51 = vpop.f32.mrb[0].mxu1 }
  0xe2   :  { %v1370_v52 = vadd.f32 %v5348_v50, %v6212_v49  ;;  %v1882_v53 = vadd.f32 %v5476_v51, %v6212_v49  ;;  %v1361_v54 = vpop.f32.mrb[1].mxu0  ;;  %v1873_v55 = vpop.f32.mrb[1].mxu1 }
  0xe3   :  { %v1362_v57 = vadd.f32 %v6212_v49, %v1361_v54  ;;  %v1874_v58 = vadd.f32 %v6212_v49, %v1873_v55  ;;  %v5349_v59 = vpop.f32.mrb[2].mxu0  ;;  %v5477_v60 = vpop.f32.mrb[2].mxu1 }
  0xe4   :  { %vm2386_vm2 = vcmp.ge.f32.partialorder %v1370_v52, 0.0  ;;  %v2642_v0 = vmul.f32 0.2, %v1370_v52  ;;  %vm2514_vm3 = vcmp.ge.f32.partialorder %v1882_v53, 0.0  ;;  %v2770_v1 = vmul.f32 0.2, %v1882_v53 }
  0xe5   :  { %vm2384_vm4 = vcmp.ge.f32.partialorder %v1362_v57, 0.0  ;;  %v2640_v2 = vmul.f32 0.2, %v1362_v57  ;;  %vm2512_vm5 = vcmp.ge.f32.partialorder %v1874_v58, 0.0  ;;  %v2768_v3 = vmul.f32 0.2, %v1874_v58 }
  0xe6   :  { %v2898_v4 = vsel %vm2386_vm2, %v1370_v52, %v2642_v0  ;;  %v3026_v5 = vsel %vm2514_vm3, %v1882_v53, %v2770_v1  ;;  %v1373_v6 = vadd.f32 %v5349_v59, %v6212_v49  ;;  %v1885_v7 = vadd.f32 %v5477_v60, %v6212_v49  ;;  %v1364_v8 = vpop.f32.mrb[3].mxu0  ;;  %v1876_v9 = vpop.f32.mrb[3].mxu1  ;;  %5455 = vmatmul.mubr.msk.bf16.gmra.mrb[108].mxu0 %vm942_vm0, %v5721_v56 }
  0xe7   :  { %v4955_v10 = vpack.c.bf16 %v2898_v4, %v2898_v4  ;;  %v5083_v11 = vpack.c.bf16 %v3026_v5, %v3026_v5  ;;  %v2896_v12 = vsel %vm2384_vm4, %v1362_v57, %v2640_v2  ;;  %v3024_v13 = vsel %vm2512_vm5, %v1874_v58, %v2768_v3  ;;  %5583 = vmatmul.mubr.msk.bf16.gmra.mrb[108].mxu1 %vm942_vm0, %v5722_v61 }
  0xe8   :  { %v4953_v14 = vpack.c.bf16 %v2896_v12, %v2896_v12  ;;  %v5081_v15 = vpack.c.bf16 %v3024_v13, %v3024_v13  ;;  %vm2387_vm6 = vcmp.ge.f32.partialorder %v1373_v6, 0.0  ;;  %v2643_v16 = vmul.f32 0.2, %v1373_v6  ;;  %5458 = vmatprep.mubr.msk.bf16.mxu0 %vm942_vm0, %v5723_v62  ;;  %5586 = vmatprep.mubr.msk.bf16.mxu1 %vm942_vm0, %v5724_v63  ;;  %v5729_v63 = vld [vmem:[%s8259_s0 + $0x1d8] sm:$0xff]   ;;  %v5732_v13 = vld [vmem:[%s8259_s0 + $0x3e0] sm:$0xff]  }
  0xe9   :  { %4179 = vst.msk [vmem:[%s8261_s3 + $0x8] sm:$0xf] %vm4176_vm1, %v4955_v10  ;;  %4307 = vst.msk [vmem:[%s8261_s3 + $0x208] sm:$0xf] %vm4176_vm1, %v5083_v11  ;;  %vm2515_vm7 = vcmp.ge.f32.partialorder %v1885_v7, 0.0  ;;  %v1365_v18 = vadd.f32 %v6212_v49, %v1364_v8  ;;  %v1877_v19 = vadd.f32 %v6212_v49, %v1876_v9  ;;  %v5352_v20 = vpop.f32.mrb[4].mxu0 }
  0xea   :  { %v2771_v17 = vmul.f32 0.2, %v1885_v7  ;;  %v5480_v21 = vpop.f32.mrb[4].mxu1  ;;  %4177 = vst.msk [vmem:[%s8261_s3] sm:$0xf] %vm4176_vm1, %v4953_v14  ;;  %v2899_v22 = vsel %vm2387_vm6, %v1373_v6, %v2643_v16  ;;  %v1386_v23 = vadd.f32 %v5352_v20, %v6212_v49  ;;  %v1377_v25 = vpop.f32.mrb[5].mxu0 }
  0xeb   :  { %4305 = vst.msk [vmem:[%s8261_s3 + $0x200] sm:$0xf] %vm4176_vm1, %v5081_v15  ;;  %v1898_v24 = vadd.f32 %v5480_v21, %v6212_v49  ;;  %v1889_v26 = vpop.f32.mrb[5].mxu1  ;;  %v4956_v30 = vpack.c.bf16 %v2899_v22, %v2899_v22  ;;  %vm2385_vm8 = vcmp.ge.f32.partialorder %v1365_v18, 0.0  ;;  %v2641_v32 = vmul.f32 0.2, %v1365_v18 }
  0xec   :  { %v3027_v31 = vsel %vm2515_vm7, %v1885_v7, %v2771_v17  ;;  %v5353_v33 = vpop.f32.mrb[6].mxu0  ;;  %v5481_v34 = vpop.f32.mrb[6].mxu1  ;;  %vm2513_vm9 = vcmp.ge.f32.partialorder %v1877_v19, 0.0  ;;  %v2769_v37 = vmul.f32 0.2, %v1877_v19  ;;  %vm2390_vm10 = vcmp.ge.f32.partialorder %v1386_v23, 0.0 }
  0xed   :  { %v5084_v36 = vpack.c.bf16 %v3027_v31, %v3027_v31  ;;  %v1380_v38 = vpop.f32.mrb[7].mxu0  ;;  %v1892_v39 = vpop.f32.mrb[7].mxu1  ;;  %4180 = vst.msk [vmem:[%s8261_s3 + $0xc] sm:$0xf] %vm4176_vm1, %v4956_v30  ;;  %v2897_v40 = vsel %vm2385_vm8, %v1365_v18, %v2641_v32  ;;  %v2646_v41 = vmul.f32 0.2, %v1386_v23  ;;  %v1378_v45 = vadd.f32 %v6212_v49, %v1377_v25 }
  0xee   :  { %vm2518_vm11 = vcmp.ge.f32.partialorder %v1898_v24, 0.0  ;;  %v2774_v42 = vmul.f32 0.2, %v1898_v24  ;;  %v4954_v43 = vpack.c.bf16 %v2897_v40, %v2897_v40  ;;  %v3025_v44 = vsel %vm2513_vm9, %v1877_v19, %v2769_v37  ;;  %5459 = vmatmul.mubr.msk.bf16.gmra.mrb[112].mxu0 %vm942_vm0, %v5725_v27  ;;  %v5730_v6 = vld [vmem:[%s8259_s0 + $0x3d8] sm:$0xff]   ;;  %v5731_v7 = vld [vmem:[%s8259_s0 + $0x1e0] sm:$0xff]  }
  0xef   :  { %4308 = vst.msk [vmem:[%s8261_s3 + $0x20c] sm:$0xf] %vm4176_vm1, %v5084_v36  ;;  %v1890_v46 = vadd.f32 %v6212_v49, %v1889_v26  ;;  %v5082_v47 = vpack.c.bf16 %v3025_v44, %v3025_v44  ;;  %v2902_v48 = vsel %vm2390_vm10, %v1386_v23, %v2646_v41  ;;  %v1389_v51 = vadd.f32 %v5353_v33, %v6212_v49 }
  0xf0   :  { %v3030_v50 = vsel %vm2518_vm11, %v1898_v24, %v2774_v42  ;;  %5587 = vmatmul.mubr.msk.bf16.gmra.mrb[112].mxu1 %vm942_vm0, %v5726_v28  ;;  %4178 = vst.msk [vmem:[%s8261_s3 + $0x4] sm:$0xf] %vm4176_vm1, %v4954_v43  ;;  %v4959_v52 = vpack.c.bf16 %v2902_v48, %v2902_v48  ;;  %vm2388_vm12 = vcmp.ge.f32.partialorder %v1378_v45, 0.0  ;;  %v2644_v54 = vmul.f32 0.2, %v1378_v45  ;;  %5462 = vmatprep.mubr.msk.bf16.mxu0 %vm942_vm0, %v5727_v29 }
  0xf1   :  { %v5087_v53 = vpack.c.bf16 %v3030_v50, %v3030_v50  ;;  %5590 = vmatprep.mubr.msk.bf16.mxu1 %vm942_vm0, %v5728_v35  ;;  %4306 = vst.msk [vmem:[%s8261_s3 + $0x204] sm:$0xf] %vm4176_vm1, %v5082_v47  ;;  %vm2516_vm13 = vcmp.ge.f32.partialorder %v1890_v46, 0.0  ;;  %v2772_v55 = vmul.f32 0.2, %v1890_v46  ;;  %vm2391_vm14 = vcmp.ge.f32.partialorder %v1389_v51, 0.0 }
  0xf2   :  { %v2647_v56 = vmul.f32 0.2, %v1389_v51  ;;  %4183 = vst.msk [vmem:[%s8261_s3 + $0x18] sm:$0xf] %vm4176_vm1, %v4959_v52  ;;  %v2900_v57 = vsel %vm2388_vm12, %v1378_v45, %v2644_v54  ;;  %v1901_v58 = vadd.f32 %v5481_v34, %v6212_v49  ;;  %v1381_v59 = vadd.f32 %v6212_v49, %v1380_v38  ;;  %v5356_v61 = vpop.f32.mrb[8].mxu0  ;;  %v5484_v62 = vpop.f32.mrb[8].mxu1 }
  0xf3   :  { %4311 = vst.msk [vmem:[%s8261_s3 + $0x218] sm:$0xf] %vm4176_vm1, %v5087_v53  ;;  %v1893_v60 = vadd.f32 %v6212_v49, %v1892_v39  ;;  %v4957_v0 = vpack.c.bf16 %v2900_v57, %v2900_v57  ;;  %v3028_v1 = vsel %vm2516_vm13, %v1890_v46, %v2772_v55  ;;  %v1402_v3 = vadd.f32 %v5356_v61, %v6212_v49  ;;  %v1393_v4 = vpop.f32.mrb[9].mxu0  ;;  %v1905_v5 = vpop.f32.mrb[9].mxu1  ;;  %v5733_v38 = vld [vmem:[%s8259_s0 + $0x1e8] sm:$0xff]   ;;  %v5735_v46 = vld [vmem:[%s8259_s0 + $0x1f0] sm:$0xff]  }
  0xf4   :  { %v2903_v2 = vsel %vm2391_vm14, %v1389_v51, %v2647_v56  ;;  %v5085_v8 = vpack.c.bf16 %v3028_v1, %v3028_v1  ;;  %vm2519_vm15 = vcmp.ge.f32.partialorder %v1901_v58, 0.0  ;;  %v2775_v10 = vmul.f32 0.2, %v1901_v58  ;;  %v5357_v11 = vpop.f32.mrb[10].mxu0  ;;  %v5485_v12 = vpop.f32.mrb[10].mxu1  ;;  %v5734_v45 = vld [vmem:[%s8259_s0 + $0x3e8] sm:$0xff]  }
  0xf5   :  { %v4960_v9 = vpack.c.bf16 %v2903_v2, %v2903_v2  ;;  %4181 = vst.msk [vmem:[%s8261_s3 + $0x10] sm:$0xf] %vm4176_vm1, %v4957_v0  ;;  %vm2389_vm2 = vcmp.ge.f32.partialorder %v1381_v59, 0.0  ;;  %v2645_v14 = vmul.f32 0.2, %v1381_v59  ;;  %vm2517_vm3 = vcmp.ge.f32.partialorder %v1893_v60, 0.0 }
  0xf6   :  { %v2773_v15 = vmul.f32 0.2, %v1893_v60  ;;  %4309 = vst.msk [vmem:[%s8261_s3 + $0x210] sm:$0xf] %vm4176_vm1, %v5085_v8  ;;  %v3031_v16 = vsel %vm2519_vm15, %v1901_v58, %v2775_v10  ;;  %vm2394_vm4 = vcmp.ge.f32.partialorder %v1402_v3, 0.0  ;;  %v1914_v18 = vadd.f32 %v5484_v62, %v6212_v49  ;;  %v1396_v19 = vpop.f32.mrb[11].mxu0  ;;  %5463 = vmatmul.mubr.msk.bf16.gmra.mrb[116].mxu0 %vm942_vm0, %v5729_v63 }
  0xf7   :  { %4184 = vst.msk [vmem:[%s8261_s3 + $0x1c] sm:$0xf] %vm4176_vm1, %v4960_v9  ;;  %v2650_v17 = vmul.f32 0.2, %v1402_v3  ;;  %v1908_v20 = vpop.f32.mrb[11].mxu1  ;;  %v5088_v21 = vpack.c.bf16 %v3031_v16, %v3031_v16  ;;  %v2901_v22 = vsel %vm2389_vm2, %v1381_v59, %v2645_v14  ;;  %v1394_v24 = vadd.f32 %v6212_v49, %v1393_v4  ;;  %5466 = vmatprep.mubr.msk.bf16.mxu0 %vm942_vm0, %v5731_v7  ;;  %v5736_v53 = vld [vmem:[%s8259_s0 + $0x3f0] sm:$0xff]  }
  0xf8   :  { %v3029_v23 = vsel %vm2517_vm3, %v1893_v60, %v2773_v15  ;;  %5591 = vmatmul.mubr.msk.bf16.gmra.mrb[116].mxu1 %vm942_vm0, %v5730_v6  ;;  %v4958_v25 = vpack.c.bf16 %v2901_v22, %v2901_v22  ;;  %vm2522_vm5 = vcmp.ge.f32.partialorder %v1914_v18, 0.0  ;;  %v2778_v29 = vmul.f32 0.2, %v1914_v18  ;;  %v5737_v14 = vld [vmem:[%s8259_s0 + $0x1f8] sm:$0xff]  }
  0xf9   :  { %v5086_v26 = vpack.c.bf16 %v3029_v23, %v3029_v23  ;;  %v2906_v27 = vsel %vm2394_vm4, %v1402_v3, %v2650_v17  ;;  %5594 = vmatprep.mubr.msk.bf16.mxu1 %vm942_vm0, %v5732_v13  ;;  %4312 = vst.msk [vmem:[%s8261_s3 + $0x21c] sm:$0xf] %vm4176_vm1, %v5088_v21  ;;  %vm2392_vm6 = vcmp.ge.f32.partialorder %v1394_v24, 0.0  ;;  %v2648_v30 = vmul.f32 0.2, %v1394_v24  ;;  %v5360_v31 = vpop.f32.mrb[12].mxu0 }
  0xfa   :  { %v4963_v28 = vpack.c.bf16 %v2906_v27, %v2906_v27  ;;  %4182 = vst.msk [vmem:[%s8261_s3 + $0x14] sm:$0xf] %vm4176_vm1, %v4958_v25  ;;  %v1906_v32 = vadd.f32 %v6212_v49, %v1905_v5  ;;  %v1405_v33 = vadd.f32 %v5357_v11, %v6212_v49  ;;  %v1917_v34 = vadd.f32 %v5485_v12, %v6212_v49  ;;  %v5488_v36 = vpop.f32.mrb[12].mxu1  ;;  %v1409_v37 = vpop.f32.mrb[13].mxu0 }
  0xfb   :  { %4310 = vst.msk [vmem:[%s8261_s3 + $0x214] sm:$0xf] %vm4176_vm1, %v5086_v26  ;;  %v1397_v35 = vadd.f32 %v6212_v49, %v1396_v19  ;;  %v3034_v39 = vsel %vm2522_vm5, %v1914_v18, %v2778_v29  ;;  %v2904_v40 = vsel %vm2392_vm6, %v1394_v24, %v2648_v30  ;;  %v1909_v41 = vadd.f32 %v6212_v49, %v1908_v20  ;;  %v1921_v43 = vpop.f32.mrb[13].mxu1  ;;  %v5361_v44 = vpop.f32.mrb[14].mxu0  ;;  %v5738_v20 = vld [vmem:[%s8259_s0 + $0x3f8] sm:$0xff]  }
  0xfc   :  { %4187 = vst.msk [vmem:[%s8261_s3 + $0x28] sm:$0xf] %vm4176_vm1, %v4963_v28  ;;  %v1418_v42 = vadd.f32 %v5360_v31, %v6212_v49  ;;  %v5091_v47 = vpack.c.bf16 %v3034_v39, %v3034_v39  ;;  %v4961_v48 = vpack.c.bf16 %v2904_v40, %v2904_v40  ;;  %vm2520_vm7 = vcmp.ge.f32.partialorder %v1906_v32, 0.0  ;;  %v5489_v51 = vpop.f32.mrb[14].mxu1  ;;  %v6368_v52 = vpop.f32.mrb[15].mxu0 }
  0xfd   :  { %v2776_v50 = vmul.f32 0.2, %v1906_v32  ;;  %vm2395_vm8 = vcmp.ge.f32.partialorder %v1405_v33, 0.0  ;;  %v2651_v54 = vmul.f32 0.2, %v1405_v33  ;;  %vm2523_vm9 = vcmp.ge.f32.partialorder %v1917_v34, 0.0 }
  0xfe   :  { %v2779_v55 = vmul.f32 0.2, %v1917_v34  ;;  %4315 = vst.msk [vmem:[%s8261_s3 + $0x228] sm:$0xf] %vm4176_vm1, %v5091_v47  ;;  %4185 = vst.msk [vmem:[%s8261_s3 + $0x20] sm:$0xf] %vm4176_vm1, %v4961_v48  ;;  %5467 = vmatmul.mubr.msk.bf16.gmra.mrb[120].mxu0 %vm942_vm0, %v5733_v38  ;;  %v1930_v5 = vadd.f32 %v5488_v36, %v6212_v49  ;;  %v1410_v9 = vadd.f32 %v6212_v49, %v1409_v37 }
  0xff   :  { %v3032_v56 = vsel %vm2520_vm7, %v1906_v32, %v2776_v50  ;;  %vm2393_vm10 = vcmp.ge.f32.partialorder %v1397_v35, 0.0  ;;  %v2649_v57 = vmul.f32 0.2, %v1397_v35  ;;  %vm2521_vm11 = vcmp.ge.f32.partialorder %v1909_v41, 0.0  ;;  %v6381_v58 = vpop.f32.mrb[15].mxu1  ;;  %5470 = vmatprep.mubr.msk.bf16.mxu0 %vm942_vm0, %v5735_v46 }
 0x100   :  { %v5089_v59 = vpack.c.bf16 %v3032_v56, %v3032_v56  ;;  %v2907_v60 = vsel %vm2395_vm8, %v1405_v33, %v2651_v54  ;;  %v3035_v61 = vsel %vm2523_vm9, %v1917_v34, %v2779_v55  ;;  %v2777_v62 = vmul.f32 0.2, %v1909_v41  ;;  %5595 = vmatmul.mubr.msk.bf16.gmra.mrb[120].mxu1 %vm942_vm0, %v5734_v45 }
 0x101   :  { %v4964_v63 = vpack.c.bf16 %v2907_v60, %v2907_v60  ;;  %v5092_v0 = vpack.c.bf16 %v3035_v61, %v3035_v61  ;;  %v2905_v1 = vsel %vm2393_vm10, %v1397_v35, %v2649_v57  ;;  %vm2398_vm12 = vcmp.ge.f32.partialorder %v1418_v42, 0.0  ;;  %5598 = vmatprep.mubr.msk.bf16.mxu1 %vm942_vm0, %v5736_v53  ;;  %v5364_v6 = vpop.f32.mrb[16].mxu0  ;;  %v5492_v7 = vpop.f32.mrb[16].mxu1 }
 0x102   :  { %4313 = vst.msk [vmem:[%s8261_s3 + $0x220] sm:$0xf] %vm4176_vm1, %v5089_v59  ;;  %v4962_v2 = vpack.c.bf16 %v2905_v1, %v2905_v1  ;;  %v3033_v3 = vsel %vm2521_vm11, %v1909_v41, %v2777_v62  ;;  %v2654_v4 = vmul.f32 0.2, %v1418_v42  ;;  %v1922_v10 = vadd.f32 %v6212_v49, %v1921_v43  ;;  %v1425_v12 = vpop.f32.mrb[17].mxu0  ;;  %v1937_v13 = vpop.f32.mrb[17].mxu1 }
 0x103   :  { %4188 = vst.msk [vmem:[%s8261_s3 + $0x2c] sm:$0xf] %vm4176_vm1, %v4964_v63  ;;  %4316 = vst.msk [vmem:[%s8261_s3 + $0x22c] sm:$0xf] %vm4176_vm1, %v5092_v0  ;;  %v5090_v8 = vpack.c.bf16 %v3033_v3, %v3033_v3  ;;  %v1421_v11 = vadd.f32 %v5361_v44, %v6212_v49  ;;  %vm2526_vm13 = vcmp.ge.f32.partialorder %v1930_v5, 0.0  ;;  %v1933_v17 = vadd.f32 %v5489_v51, %v6212_v49  ;;  %v6413_v18 = vpop.f32.mrb[18].mxu0 }
 0x104   :  { %4186 = vst.msk [vmem:[%s8261_s3 + $0x24] sm:$0xf] %vm4176_vm1, %v4962_v2  ;;  %v2910_v15 = vsel %vm2398_vm12, %v1418_v42, %v2654_v4  ;;  %v2782_v16 = vmul.f32 0.2, %v1930_v5  ;;  %v6415_v19 = vpop.f32.mrb[18].mxu1  ;;  %vm2396_vm14 = vcmp.ge.f32.partialorder %v1410_v9, 0.0  ;;  %v1413_v34 = vadd.f32 %v6212_v49, %v6368_v52 }
 0x105   :  { %4314 = vst.msk [vmem:[%s8261_s3 + $0x224] sm:$0xf] %vm4176_vm1, %v5090_v8  ;;  %v4967_v21 = vpack.c.bf16 %v2910_v15, %v2910_v15  ;;  %v2652_v22 = vmul.f32 0.2, %v1410_v9  ;;  %vm2524_vm15 = vcmp.ge.f32.partialorder %v1922_v10, 0.0  ;;  %v6424_v23 = vpop.f32.mrb[19].mxu0  ;;  %v1925_v38 = vadd.f32 %v6212_v49, %v6381_v58 }
 0x106   :  { %v6426_v24 = vpop.f32.mrb[19].mxu1  ;;  %v3038_v25 = vsel %vm2526_vm13, %v1930_v5, %v2782_v16  ;;  %v2780_v26 = vmul.f32 0.2, %v1922_v10  ;;  %vm2399_vm2 = vcmp.ge.f32.partialorder %v1421_v11, 0.0  ;;  %v2655_v27 = vmul.f32 0.2, %v1421_v11  ;;  %5471 = vmatmul.mubr.msk.bf16.gmra.mrb[124].mxu0 %vm942_vm0, %v5737_v14 }
 0x107   :  { %4191 = vst.msk [vmem:[%s8261_s3 + $0x38] sm:$0xf] %vm4176_vm1, %v4967_v21  ;;  %v5095_v28 = vpack.c.bf16 %v3038_v25, %v3038_v25  ;;  %v2908_v29 = vsel %vm2396_vm14, %v1410_v9, %v2652_v22  ;;  %vm2527_vm3 = vcmp.ge.f32.partialorder %v1933_v17, 0.0  ;;  %v2783_v30 = vmul.f32 0.2, %v1933_v17 }
 0x108   :  { %v4965_v31 = vpack.c.bf16 %v2908_v29, %v2908_v29  ;;  %v3036_v32 = vsel %vm2524_vm15, %v1922_v10, %v2780_v26  ;;  %v2911_v33 = vsel %vm2399_vm2, %v1421_v11, %v2655_v27  ;;  %5599 = vmatmul.mubr.msk.bf16.gmra.mrb[124].mxu1 %vm942_vm0, %v5738_v20  ;;  %vm2397_vm4 = vcmp.ge.f32.partialorder %v1413_v34, 0.0 }
 0x109   :  { %4319 = vst.msk [vmem:[%s8261_s3 + $0x238] sm:$0xf] %vm4176_vm1, %v5095_v28  ;;  %v5093_v35 = vpack.c.bf16 %v3036_v32, %v3036_v32  ;;  %v4968_v36 = vpack.c.bf16 %v2911_v33, %v2911_v33  ;;  %v3039_v37 = vsel %vm2527_vm3, %v1933_v17, %v2783_v30  ;;  %v2653_v40 = vmul.f32 0.2, %v1413_v34  ;;  %v5368_v42 = vpop.f32.mrb[20].mxu0  ;;  %v5496_v43 = vpop.f32.mrb[20].mxu1 }
 0x10a   :  { %4189 = vst.msk [vmem:[%s8261_s3 + $0x30] sm:$0xf] %vm4176_vm1, %v4965_v31  ;;  %v5096_v39 = vpack.c.bf16 %v3039_v37, %v3039_v37  ;;  %v1434_v41 = vadd.f32 %v5364_v6, %v6212_v49  ;;  %vm2525_vm0 = vcmp.ge.f32.partialorder %v1925_v38, 0.0  ;;  %v2781_v44 = vmul.f32 0.2, %v1925_v38  ;;  %v1441_v47 = vpop.f32.mrb[21].mxu0 }
 0x10b   :  { %4317 = vst.msk [vmem:[%s8261_s3 + $0x230] sm:$0xf] %vm4176_vm1, %v5093_v35  ;;  %4192 = vst.msk [vmem:[%s8261_s3 + $0x3c] sm:$0xf] %vm4176_vm1, %v4968_v36  ;;  %v1946_v45 = vadd.f32 %v5492_v7, %v6212_v49  ;;  %v1426_v46 = vadd.f32 %v6212_v49, %v1425_v12  ;;  %v6457_v48 = vpop.f32.mrb[21].mxu1  ;;  %v2909_v50 = vsel %vm2397_vm4, %v1413_v34, %v2653_v40  ;;  %v6464_v53 = vpop.f32.mrb[22].mxu0 }
 0x10c   :  { %4320 = vst.msk [vmem:[%s8261_s3 + $0x23c] sm:$0xf] %vm4176_vm1, %v5096_v39  ;;  %vm2402_vm5 = vcmp.ge.f32.partialorder %v1434_v41, 0.0  ;;  %v2658_v51 = vmul.f32 0.2, %v1434_v41  ;;  %v1938_v52 = vadd.f32 %v6212_v49, %v1937_v13  ;;  %v6466_v54 = vpop.f32.mrb[22].mxu1  ;;  %v4966_v55 = vpack.c.bf16 %v2909_v50, %v2909_v50 }
 0x10d   :  { %v3037_v56 = vsel %vm2525_vm0, %v1925_v38, %v2781_v44  ;;  %vm2530_vm6 = vcmp.ge.f32.partialorder %v1946_v45, 0.0  ;;  %v2786_v57 = vmul.f32 0.2, %v1946_v45  ;;  %v6468_v58 = vpop.f32.mrb[23].mxu0  ;;  %v6470_v59 = vpop.f32.mrb[23].mxu1  ;;  %vm2400_vm7 = vcmp.ge.f32.partialorder %v1426_v46, 0.0 }
 0x10e   :  { %v5094_v60 = vpack.c.bf16 %v3037_v56, %v3037_v56  ;;  %v2914_v61 = vsel %vm2402_vm5, %v1434_v41, %v2658_v51  ;;  %v2656_v62 = vmul.f32 0.2, %v1426_v46  ;;  %4190 = vst.msk [vmem:[%s8261_s3 + $0x34] sm:$0xf] %vm4176_vm1, %v4966_v55  ;;  %vm2528_vm8 = vcmp.ge.f32.partialorder %v1938_v52, 0.0 }
 0x10f   :  { %v4971_v63 = vpack.c.bf16 %v2914_v61, %v2914_v61  ;;  %v3042_v0 = vsel %vm2530_vm6, %v1946_v45, %v2786_v57  ;;  %v2784_v1 = vmul.f32 0.2, %v1938_v52  ;;  %v1437_v4 = vadd.f32 %v6413_v18, %v6212_v49 }
 0x110   :  { %4318 = vst.msk [vmem:[%s8261_s3 + $0x234] sm:$0xf] %vm4176_vm1, %v5094_v60  ;;  %v5099_v2 = vpack.c.bf16 %v3042_v0, %v3042_v0  ;;  %v2912_v3 = vsel %vm2400_vm7, %v1426_v46, %v2656_v62  ;;  %v1949_v5 = vadd.f32 %v6415_v19, %v6212_v49  ;;  %v1429_v8 = vadd.f32 %v6212_v49, %v6424_v23 }
 0x111   :  { %4195 = vst.msk [vmem:[%s8261_s3 + $0x48] sm:$0xf] %vm4176_vm1, %v4971_v63  ;;  %v4969_v6 = vpack.c.bf16 %v2912_v3, %v2912_v3  ;;  %v3040_v7 = vsel %vm2528_vm8, %v1938_v52, %v2784_v1  ;;  %v1941_v9 = vadd.f32 %v6212_v49, %v6426_v24  ;;  %vm2403_vm9 = vcmp.ge.f32.partialorder %v1437_v4, 0.0  ;;  %v6496_v12 = vpop.f32.mrb[24].mxu0  ;;  %v6498_v13 = vpop.f32.mrb[24].mxu1 }
 0x112   :  { %4323 = vst.msk [vmem:[%s8261_s3 + $0x248] sm:$0xf] %vm4176_vm1, %v5099_v2  ;;  %v5097_v10 = vpack.c.bf16 %v3040_v7, %v3040_v7  ;;  %v2659_v11 = vmul.f32 0.2, %v1437_v4  ;;  %vm2531_vm10 = vcmp.ge.f32.partialorder %v1949_v5, 0.0  ;;  %vm2401_vm11 = vcmp.ge.f32.partialorder %v1429_v8, 0.0 }
 0x113   :  { %4193 = vst.msk [vmem:[%s8261_s3 + $0x40] sm:$0xf] %vm4176_vm1, %v4969_v6  ;;  %v2787_v14 = vmul.f32 0.2, %v1949_v5  ;;  %v2657_v15 = vmul.f32 0.2, %v1429_v8  ;;  %v1450_v18 = vadd.f32 %v5368_v42, %v6212_v49  ;;  %v1962_v19 = vadd.f32 %v5496_v43, %v6212_v49 }
 0x114   :  { %vm2529_vm12 = vcmp.ge.f32.partialorder %v1941_v9, 0.0  ;;  %4321 = vst.msk [vmem:[%s8261_s3 + $0x240] sm:$0xf] %vm4176_vm1, %v5097_v10  ;;  %v2915_v16 = vsel %vm2403_vm9, %v1437_v4, %v2659_v11  ;;  %v2785_v17 = vmul.f32 0.2, %v1941_v9  ;;  %v6510_v20 = vpop.f32.mrb[25].mxu0  ;;  %v1442_v25 = vadd.f32 %v6212_v49, %v1441_v47 }
 0x115   :  { %v6512_v21 = vpop.f32.mrb[25].mxu1  ;;  %v4972_v22 = vpack.c.bf16 %v2915_v16, %v2915_v16  ;;  %v3043_v23 = vsel %vm2531_vm10, %v1949_v5, %v2787_v14  ;;  %v2913_v24 = vsel %vm2401_vm11, %v1429_v8, %v2657_v15  ;;  %v6516_v26 = vpop.f32.mrb[26].mxu0  ;;  %vm2406_vm13 = vcmp.ge.f32.partialorder %v1450_v18, 0.0 }
 0x116   :  { %v6518_v27 = vpop.f32.mrb[26].mxu1  ;;  %v5100_v28 = vpack.c.bf16 %v3043_v23, %v3043_v23  ;;  %v4970_v29 = vpack.c.bf16 %v2913_v24, %v2913_v24  ;;  %v3041_v30 = vsel %vm2529_vm12, %v1941_v9, %v2785_v17  ;;  %v6521_v31 = vpop.f32.mrb[27].mxu0  ;;  %v2662_v34 = vmul.f32 0.2, %v1450_v18 }
 0x117   :  { %v6523_v32 = vpop.f32.mrb[27].mxu1  ;;  %4196 = vst.msk [vmem:[%s8261_s3 + $0x4c] sm:$0xf] %vm4176_vm1, %v4972_v22  ;;  %v5098_v33 = vpack.c.bf16 %v3041_v30, %v3041_v30  ;;  %vm2534_vm14 = vcmp.ge.f32.partialorder %v1962_v19, 0.0  ;;  %v2790_v35 = vmul.f32 0.2, %v1962_v19  ;;  %v1954_v37 = vadd.f32 %v6212_v49, %v6457_v48 }
 0x118   :  { %4324 = vst.msk [vmem:[%s8261_s3 + $0x24c] sm:$0xf] %vm4176_vm1, %v5100_v28  ;;  %4194 = vst.msk [vmem:[%s8261_s3 + $0x44] sm:$0xf] %vm4176_vm1, %v4970_v29  ;;  %vm2404_vm15 = vcmp.ge.f32.partialorder %v1442_v25, 0.0  ;;  %v1453_v38 = vadd.f32 %v6464_v53, %v6212_v49  ;;  %v2918_v39 = vsel %vm2406_vm13, %v1450_v18, %v2662_v34  ;;  %v1965_v41 = vadd.f32 %v6466_v54, %v6212_v49 }
 0x119   :  { %v2660_v36 = vmul.f32 0.2, %v1442_v25  ;;  %4322 = vst.msk [vmem:[%s8261_s3 + $0x244] sm:$0xf] %vm4176_vm1, %v5098_v33  ;;  %v3046_v40 = vsel %vm2534_vm14, %v1962_v19, %v2790_v35  ;;  %v1445_v42 = vadd.f32 %v6212_v49, %v6468_v58  ;;  %v4975_v43 = vpack.c.bf16 %v2918_v39, %v2918_v39  ;;  %v6549_v46 = vpop.f32.mrb[28].mxu0  ;;  %v6551_v47 = vpop.f32.mrb[28].mxu1 }
 0x11a   :  { %v5103_v44 = vpack.c.bf16 %v3046_v40, %v3046_v40  ;;  %vm2532_vm2 = vcmp.ge.f32.partialorder %v1954_v37, 0.0  ;;  %v2788_v50 = vmul.f32 0.2, %v1954_v37  ;;  %vm2407_vm3 = vcmp.ge.f32.partialorder %v1453_v38, 0.0  ;;  %v6553_v52 = vpop.f32.mrb[29].mxu0  ;;  %v6571_v60 = vpop.f32.mrb[29].mxu1 }
 0x11b   :  { %v2916_v45 = vsel %vm2404_vm15, %v1442_v25, %v2660_v36  ;;  %v2663_v51 = vmul.f32 0.2, %v1453_v38  ;;  %4199 = vst.msk [vmem:[%s8261_s3 + $0x58] sm:$0xf] %vm4176_vm1, %v4975_v43  ;;  %vm2535_vm4 = vcmp.ge.f32.partialorder %v1965_v41, 0.0  ;;  %vm2405_vm0 = vcmp.ge.f32.partialorder %v1445_v42, 0.0 }
 0x11c   :  { %v4973_v48 = vpack.c.bf16 %v2916_v45, %v2916_v45  ;;  %4327 = vst.msk [vmem:[%s8261_s3 + $0x258] sm:$0xf] %vm4176_vm1, %v5103_v44  ;;  %v2791_v53 = vmul.f32 0.2, %v1965_v41  ;;  %v2661_v54 = vmul.f32 0.2, %v1445_v42  ;;  %v3044_v55 = vsel %vm2532_vm2, %v1954_v37, %v2788_v50 }
 0x11d   :  { %v2919_v56 = vsel %vm2407_vm3, %v1453_v38, %v2663_v51  ;;  %v1957_v57 = vadd.f32 %v6212_v49, %v6470_v59  ;;  %v1466_v58 = vadd.f32 %v6496_v12, %v6212_v49  ;;  %v6573_v61 = vpop.f32.mrb[30].mxu0  ;;  %v5101_v62 = vpack.c.bf16 %v3044_v55, %v3044_v55  ;;  %v6575_v2 = vpop.f32.mrb[30].mxu1 }
 0x11e   :  { %4197 = vst.msk [vmem:[%s8261_s3 + $0x50] sm:$0xf] %vm4176_vm1, %v4973_v48  ;;  %v4976_v63 = vpack.c.bf16 %v2919_v56, %v2919_v56  ;;  %v3047_v0 = vsel %vm2535_vm4, %v1965_v41, %v2791_v53  ;;  %v2917_v1 = vsel %vm2405_vm0, %v1445_v42, %v2661_v54  ;;  %v6577_v3 = vpop.f32.mrb[31].mxu0  ;;  %v6579_v59 = vpop.f32.mrb[31].mxu1  ;;  %v1978_v8 = vadd.f32 %v6498_v13, %v6212_v49 }
 0x11f   :  { %v5104_v4 = vpack.c.bf16 %v3047_v0, %v3047_v0  ;;  %v4974_v5 = vpack.c.bf16 %v2917_v1, %v2917_v1  ;;  %vm2533_vm5 = vcmp.ge.f32.partialorder %v1957_v57, 0.0  ;;  %v2789_v6 = vmul.f32 0.2, %v1957_v57  ;;  %4325 = vst.msk [vmem:[%s8261_s3 + $0x250] sm:$0xf] %vm4176_vm1, %v5101_v62 }
 0x120   :  { %4200 = vst.msk [vmem:[%s8261_s3 + $0x5c] sm:$0xf] %vm4176_vm1, %v4976_v63  ;;  %vm2410_vm6 = vcmp.ge.f32.partialorder %v1466_v58, 0.0  ;;  %v2666_v7 = vmul.f32 0.2, %v1466_v58  ;;  %v1458_v9 = vadd.f32 %v6212_v49, %v6510_v20  ;;  %v1970_v11 = vadd.f32 %v6212_v49, %v6512_v21 }
 0x121   :  { %4328 = vst.msk [vmem:[%s8261_s3 + $0x25c] sm:$0xf] %vm4176_vm1, %v5104_v4  ;;  %4198 = vst.msk [vmem:[%s8261_s3 + $0x54] sm:$0xf] %vm4176_vm1, %v4974_v5  ;;  %v3045_v10 = vsel %vm2533_vm5, %v1957_v57, %v2789_v6  ;;  %v1469_v12 = vadd.f32 %v6516_v26, %v6212_v49  ;;  %v1981_v13 = vadd.f32 %v6518_v27, %v6212_v49  ;;  %vm2538_vm7 = vcmp.ge.f32.partialorder %v1978_v8, 0.0  ;;  %v6607_v17 = vpop.f32.mrb[32].mxu0 }
 0x122   :  { %v5102_v14 = vpack.c.bf16 %v3045_v10, %v3045_v10  ;;  %v2922_v15 = vsel %vm2410_vm6, %v1466_v58, %v2666_v7  ;;  %v2794_v16 = vmul.f32 0.2, %v1978_v8  ;;  %v6609_v18 = vpop.f32.mrb[32].mxu1  ;;  %vm2408_vm8 = vcmp.ge.f32.partialorder %v1458_v9, 0.0  ;;  %v6611_v22 = vpop.f32.mrb[33].mxu0 }
 0x123   :  { %v4979_v19 = vpack.c.bf16 %v2922_v15, %v2922_v15  ;;  %v2664_v20 = vmul.f32 0.2, %v1458_v9  ;;  %vm2536_vm9 = vcmp.ge.f32.partialorder %v1970_v11, 0.0  ;;  %v6613_v21 = vpop.f32.mrb[33].mxu1  ;;  %v2792_v24 = vmul.f32 0.2, %v1970_v11 }
 0x124   :  { %4326 = vst.msk [vmem:[%s8261_s3 + $0x254] sm:$0xf] %vm4176_vm1, %v5102_v14  ;;  %v3050_v23 = vsel %vm2538_vm7, %v1978_v8, %v2794_v16  ;;  %vm2411_vm10 = vcmp.ge.f32.partialorder %v1469_v12, 0.0  ;;  %v2667_v25 = vmul.f32 0.2, %v1469_v12  ;;  %v6619_v26 = vpop.f32.mrb[34].mxu0  ;;  %v1461_v37 = vadd.f32 %v6212_v49, %v6521_v31 }
 0x125   :  { %4203 = vst.msk [vmem:[%s8261_s3 + $0x68] sm:$0xf] %vm4176_vm1, %v4979_v19  ;;  %v5107_v27 = vpack.c.bf16 %v3050_v23, %v3050_v23  ;;  %v2920_v28 = vsel %vm2408_vm8, %v1458_v9, %v2664_v20  ;;  %vm2539_vm11 = vcmp.ge.f32.partialorder %v1981_v13, 0.0  ;;  %v2795_v29 = vmul.f32 0.2, %v1981_v13  ;;  %v6625_v30 = vpop.f32.mrb[34].mxu1 }
 0x126   :  { %v6627_v33 = vpop.f32.mrb[35].mxu0  ;;  %v4977_v34 = vpack.c.bf16 %v2920_v28, %v2920_v28  ;;  %v3048_v35 = vsel %vm2536_vm9, %v1970_v11, %v2792_v24  ;;  %v2923_v36 = vsel %vm2411_vm10, %v1469_v12, %v2667_v25  ;;  %v6632_v38 = vpop.f32.mrb[35].mxu1  ;;  %v1973_v42 = vadd.f32 %v6212_v49, %v6523_v32 }
 0x127   :  { %4331 = vst.msk [vmem:[%s8261_s3 + $0x268] sm:$0xf] %vm4176_vm1, %v5107_v27  ;;  %v5105_v39 = vpack.c.bf16 %v3048_v35, %v3048_v35  ;;  %v4980_v40 = vpack.c.bf16 %v2923_v36, %v2923_v36  ;;  %v3051_v41 = vsel %vm2539_vm11, %v1981_v13, %v2795_v29  ;;  %vm2409_vm12 = vcmp.ge.f32.partialorder %v1461_v37, 0.0 }
 0x128   :  { %4201 = vst.msk [vmem:[%s8261_s3 + $0x60] sm:$0xf] %vm4176_vm1, %v4977_v34  ;;  %v5108_v43 = vpack.c.bf16 %v3051_v41, %v3051_v41  ;;  %v2665_v31 = vmul.f32 0.2, %v1461_v37  ;;  %v1482_v44 = vadd.f32 %v6549_v46, %v6212_v49  ;;  %vm2537_vm13 = vcmp.ge.f32.partialorder %v1973_v42, 0.0 }
 0x129   :  { %4329 = vst.msk [vmem:[%s8261_s3 + $0x260] sm:$0xf] %vm4176_vm1, %v5105_v39  ;;  %4204 = vst.msk [vmem:[%s8261_s3 + $0x6c] sm:$0xf] %vm4176_vm1, %v4980_v40  ;;  %v2793_v32 = vmul.f32 0.2, %v1973_v42  ;;  %v1994_v45 = vadd.f32 %v6551_v47, %v6212_v49  ;;  %v1474_v48 = vadd.f32 %v6212_v49, %v6553_v52  ;;  %v1986_v51 = vadd.f32 %v6212_v49, %v6571_v60 }
 0x12a   :  { %4332 = vst.msk [vmem:[%s8261_s3 + $0x26c] sm:$0xf] %vm4176_vm1, %v5108_v43  ;;  %v2921_v46 = vsel %vm2409_vm12, %v1461_v37, %v2665_v31  ;;  %vm2414_vm14 = vcmp.ge.f32.partialorder %v1482_v44, 0.0  ;;  %v2670_v50 = vmul.f32 0.2, %v1482_v44  ;;  %v6664_v53 = vpop.f32.mrb[36].mxu0  ;;  %v1485_v10 = vadd.f32 %v6573_v61, %v6212_v49 }
 0x12b   :  { %v6666_v54 = vpop.f32.mrb[36].mxu1  ;;  %v4978_v55 = vpack.c.bf16 %v2921_v46, %v2921_v46  ;;  %v3049_v47 = vsel %vm2537_vm13, %v1973_v42, %v2793_v32  ;;  %vm2542_vm15 = vcmp.ge.f32.partialorder %v1994_v45, 0.0  ;;  %v2798_v56 = vmul.f32 0.2, %v1994_v45  ;;  %v6668_v52 = vpop.f32.mrb[37].mxu0 }
 0x12c   :  { %v6670_v57 = vpop.f32.mrb[37].mxu1  ;;  %v5106_v58 = vpack.c.bf16 %v3049_v47, %v3049_v47  ;;  %v2926_v62 = vsel %vm2414_vm14, %v1482_v44, %v2670_v50  ;;  %vm2412_vm2 = vcmp.ge.f32.partialorder %v1474_v48, 0.0  ;;  %v2668_v63 = vmul.f32 0.2, %v1474_v48  ;;  %v6672_v0 = vpop.f32.mrb[38].mxu0 }
 0x12d   :  { %v6674_v1 = vpop.f32.mrb[38].mxu1  ;;  %4202 = vst.msk [vmem:[%s8261_s3 + $0x64] sm:$0xf] %vm4176_vm1, %v4978_v55  ;;  %v4983_v60 = vpack.c.bf16 %v2926_v62, %v2926_v62  ;;  %v3054_v4 = vsel %vm2542_vm15, %v1994_v45, %v2798_v56  ;;  %vm2540_vm3 = vcmp.ge.f32.partialorder %v1986_v51, 0.0  ;;  %v2796_v5 = vmul.f32 0.2, %v1986_v51 }
 0x12e   :  { %v6680_v6 = vpop.f32.mrb[39].mxu0  ;;  %v6682_v7 = vpop.f32.mrb[39].mxu1  ;;  %4330 = vst.msk [vmem:[%s8261_s3 + $0x264] sm:$0xf] %vm4176_vm1, %v5106_v58  ;;  %v5111_v8 = vpack.c.bf16 %v3054_v4, %v3054_v4  ;;  %v2924_v9 = vsel %vm2412_vm2, %v1474_v48, %v2668_v63  ;;  %v1997_v11 = vadd.f32 %v6575_v2, %v6212_v49  ;;  %v1477_v14 = vadd.f32 %v6212_v49, %v6577_v3  ;;  %v6748_v31 = vld [vmem:[%s8260_s2] ss:$0 sm:$0xff] }
 0x12f   :  { %4207 = vst.msk [vmem:[%s8261_s3 + $0x78] sm:$0xf] %vm4176_vm1, %v4983_v60  ;;  %v4981_v12 = vpack.c.bf16 %v2924_v9, %v2924_v9  ;;  %v3052_v13 = vsel %vm2540_vm3, %v1986_v51, %v2796_v5  ;;  %v1989_v15 = vadd.f32 %v6212_v49, %v6579_v59  ;;  %vm2415_vm4 = vcmp.ge.f32.partialorder %v1485_v10, 0.0 }
 0x130   :  { %4335 = vst.msk [vmem:[%s8261_s3 + $0x278] sm:$0xf] %vm4176_vm1, %v5111_v8  ;;  %v5109_v61 = vpack.c.bf16 %v3052_v13, %v3052_v13  ;;  %v2671_v2 = vmul.f32 0.2, %v1485_v10  ;;  %vm2543_vm0 = vcmp.ge.f32.partialorder %v1997_v11, 0.0  ;;  %vm2413_vm5 = vcmp.ge.f32.partialorder %v1477_v14, 0.0 }
 0x131   :  { %4205 = vst.msk [vmem:[%s8261_s3 + $0x70] sm:$0xf] %vm4176_vm1, %v4981_v12  ;;  %v2799_v16 = vmul.f32 0.2, %v1997_v11  ;;  %v2669_v3 = vmul.f32 0.2, %v1477_v14  ;;  %v1498_v20 = vadd.f32 %v6607_v17, %v6212_v49  ;;  %v2010_v23 = vadd.f32 %v6609_v18, %v6212_v49 }
 0x132   :  { %vm2541_vm6 = vcmp.ge.f32.partialorder %v1989_v15, 0.0  ;;  %4333 = vst.msk [vmem:[%s8261_s3 + $0x270] sm:$0xf] %vm4176_vm1, %v5109_v61  ;;  %v2927_v59 = vsel %vm2415_vm4, %v1485_v10, %v2671_v2  ;;  %v2797_v19 = vmul.f32 0.2, %v1989_v15  ;;  %v6716_v24 = vpop.f32.mrb[40].mxu0  ;;  %v1490_v34 = vadd.f32 %v6212_v49, %v6611_v22 }
 0x133   :  { %v6718_v25 = vpop.f32.mrb[40].mxu1  ;;  %v4984_v27 = vpack.c.bf16 %v2927_v59, %v2927_v59  ;;  %v3055_v28 = vsel %vm2543_vm0, %v1997_v11, %v2799_v16  ;;  %v2925_v29 = vsel %vm2413_vm5, %v1477_v14, %v2669_v3  ;;  %v6722_v35 = vpop.f32.mrb[41].mxu0  ;;  %vm2418_vm7 = vcmp.ge.f32.partialorder %v1498_v20, 0.0 }
 0x134   :  { %v6724_v36 = vpop.f32.mrb[41].mxu1  ;;  %v5112_v37 = vpack.c.bf16 %v3055_v28, %v3055_v28  ;;  %v4982_v39 = vpack.c.bf16 %v2925_v29, %v2925_v29  ;;  %v3053_v17 = vsel %vm2541_vm6, %v1989_v15, %v2797_v19  ;;  %v6727_v18 = vpop.f32.mrb[42].mxu0  ;;  %v2674_v49 = vmul.f32 0.2, %v1498_v20 }
 0x135   :  { %v6729_v40 = vpop.f32.mrb[42].mxu1  ;;  %4208 = vst.msk [vmem:[%s8261_s3 + $0x7c] sm:$0xf] %vm4176_vm1, %v4984_v27  ;;  %v5110_v41 = vpack.c.bf16 %v3053_v17, %v3053_v17  ;;  %vm2546_vm8 = vcmp.ge.f32.partialorder %v2010_v23, 0.0  ;;  %v2802_v22 = vmul.f32 0.2, %v2010_v23  ;;  %v2002_v44 = vadd.f32 %v6748_v31, %v6613_v21 }
 0x136   :  { %v6735_v42 = vpop.f32.mrb[43].mxu0  ;;  %4336 = vst.msk [vmem:[%s8261_s3 + $0x27c] sm:$0xf] %vm4176_vm1, %v5112_v37  ;;  %4206 = vst.msk [vmem:[%s8261_s3 + $0x74] sm:$0xf] %vm4176_vm1, %v4982_v39  ;;  %vm2416_vm9 = vcmp.ge.f32.partialorder %v1490_v34, 0.0  ;;  %v1501_v32 = vadd.f32 %v6748_v31, %v6619_v26  ;;  %v2930_v48 = vsel %vm2418_vm7, %v1498_v20, %v2674_v49  ;;  %v2013_v50 = vadd.f32 %v6748_v31, %v6625_v30 }
 0x137   :  { %v2672_v43 = vmul.f32 0.2, %v1490_v34  ;;  %v6754_v45 = vpop.f32.mrb[43].mxu1  ;;  %4334 = vst.msk [vmem:[%s8261_s3 + $0x274] sm:$0xf] %vm4176_vm1, %v5110_v41  ;;  %v3058_v46 = vsel %vm2546_vm8, %v2010_v23, %v2802_v22  ;;  %v1493_v51 = vadd.f32 %v6748_v31, %v6627_v33  ;;  %v4987_v21 = vpack.c.bf16 %v2930_v48, %v2930_v48 }
 0x138   :  { %v5115_v55 = vpack.c.bf16 %v3058_v46, %v3058_v46  ;;  %vm2544_vm10 = vcmp.ge.f32.partialorder %v2002_v44, 0.0  ;;  %v2800_v56 = vmul.f32 0.2, %v2002_v44  ;;  %vm2419_vm11 = vcmp.ge.f32.partialorder %v1501_v32, 0.0 }
 0x139   :  { %v2928_v47 = vsel %vm2416_vm9, %v1490_v34, %v2672_v43  ;;  %v2675_v58 = vmul.f32 0.2, %v1501_v32  ;;  %4211 = vst.msk [vmem:[%s8261_s3 + $0x88] sm:$0xf] %vm4176_vm1, %v4987_v21  ;;  %vm2547_vm12 = vcmp.ge.f32.partialorder %v2013_v50, 0.0  ;;  %vm2417_vm13 = vcmp.ge.f32.partialorder %v1493_v51, 0.0 }
 0x13a   :  { %v4985_v26 = vpack.c.bf16 %v2928_v47, %v2928_v47  ;;  %4339 = vst.msk [vmem:[%s8261_s3 + $0x288] sm:$0xf] %vm4176_vm1, %v5115_v55  ;;  %v2803_v30 = vmul.f32 0.2, %v2013_v50  ;;  %v2673_v33 = vmul.f32 0.2, %v1493_v51  ;;  %v3056_v62 = vsel %vm2544_vm10, %v2002_v44, %v2800_v56 }
 0x13b   :  { %v2931_v63 = vsel %vm2419_vm11, %v1501_v32, %v2675_v58  ;;  %v2005_v60 = vadd.f32 %v6748_v31, %v6632_v38  ;;  %v1514_v4 = vadd.f32 %v6748_v31, %v6664_v53  ;;  %v6781_v5 = vpop.f32.mrb[44].mxu0  ;;  %v6783_v8 = vpop.f32.mrb[44].mxu1  ;;  %v5113_v9 = vpack.c.bf16 %v3056_v62, %v3056_v62 }
 0x13c   :  { %4209 = vst.msk [vmem:[%s8261_s3 + $0x80] sm:$0xf] %vm4176_vm1, %v4985_v26  ;;  %v4988_v10 = vpack.c.bf16 %v2931_v63, %v2931_v63  ;;  %v3059_v11 = vsel %vm2547_vm12, %v2013_v50, %v2803_v30  ;;  %v2929_v12 = vsel %vm2417_vm13, %v1493_v51, %v2673_v33  ;;  %v6785_v13 = vpop.f32.mrb[45].mxu0  ;;  %v6787_v14 = vpop.f32.mrb[45].mxu1  ;;  %v2026_v3 = vadd.f32 %v6748_v31, %v6666_v54 }
 0x13d   :  { %v5116_v15 = vpack.c.bf16 %v3059_v11, %v3059_v11  ;;  %v4986_v61 = vpack.c.bf16 %v2929_v12, %v2929_v12  ;;  %vm2545_vm14 = vcmp.ge.f32.partialorder %v2005_v60, 0.0  ;;  %v2801_v2 = vmul.f32 0.2, %v2005_v60  ;;  %v6789_v38 = vpop.f32.mrb[46].mxu0  ;;  %v6791_v16 = vpop.f32.mrb[46].mxu1 }
 0x13e   :  { %4337 = vst.msk [vmem:[%s8261_s3 + $0x280] sm:$0xf] %vm4176_vm1, %v5113_v9  ;;  %4212 = vst.msk [vmem:[%s8261_s3 + $0x8c] sm:$0xf] %vm4176_vm1, %v4988_v10  ;;  %vm2422_vm15 = vcmp.ge.f32.partialorder %v1514_v4, 0.0  ;;  %v1506_v59 = vadd.f32 %v6748_v31, %v6668_v52  ;;  %v6805_v19 = vpop.f32.mrb[47].mxu0  ;;  %v2018_v54 = vadd.f32 %v6748_v31, %v6670_v57  ;;  %v1517_v52 = vadd.f32 %v6748_v31, %v6672_v0 }
 0x13f   :  { %v2678_v53 = vmul.f32 0.2, %v1514_v4  ;;  %v6807_v20 = vpop.f32.mrb[47].mxu1  ;;  %4340 = vst.msk [vmem:[%s8261_s3 + $0x28c] sm:$0xf] %vm4176_vm1, %v5116_v15  ;;  %v3057_v23 = vsel %vm2545_vm14, %v2005_v60, %v2801_v2  ;;  %v2029_v27 = vadd.f32 %v6748_v31, %v6674_v1  ;;  %vm2550_vm2 = vcmp.ge.f32.partialorder %v2026_v3, 0.0 }
 0x140   :  { %4210 = vst.msk [vmem:[%s8261_s3 + $0x84] sm:$0xf] %vm4176_vm1, %v4986_v61  ;;  %v5114_v28 = vpack.c.bf16 %v3057_v23, %v3057_v23  ;;  %v2806_v34 = vmul.f32 0.2, %v2026_v3  ;;  %vm2420_vm3 = vcmp.ge.f32.partialorder %v1506_v59, 0.0  ;;  %vm2548_vm4 = vcmp.ge.f32.partialorder %v2018_v54, 0.0 }
 0x141   :  { %v2934_v29 = vsel %vm2422_vm15, %v1514_v4, %v2678_v53  ;;  %v2676_v39 = vmul.f32 0.2, %v1506_v59  ;;  %v2804_v17 = vmul.f32 0.2, %v2018_v54  ;;  %vm2423_vm0 = vcmp.ge.f32.partialorder %v1517_v52, 0.0  ;;  %v6827_v41 = vpop.f32.mrb[48].mxu0 }
 0x142   :  { %v4991_v37 = vpack.c.bf16 %v2934_v29, %v2934_v29  ;;  %4338 = vst.msk [vmem:[%s8261_s3 + $0x284] sm:$0xf] %vm4176_vm1, %v5114_v28  ;;  %v3062_v57 = vsel %vm2550_vm2, %v2026_v3, %v2806_v34  ;;  %v2679_v0 = vmul.f32 0.2, %v1517_v52  ;;  %vm2551_vm5 = vcmp.ge.f32.partialorder %v2029_v27, 0.0  ;;  %v6833_v43 = vpop.f32.mrb[48].mxu1 }
 0x143   :  { %v5119_v1 = vpack.c.bf16 %v3062_v57, %v3062_v57  ;;  %v2932_v49 = vsel %vm2420_vm3, %v1506_v59, %v2676_v39  ;;  %v2807_v22 = vmul.f32 0.2, %v2029_v27  ;;  %v6835_v44 = vpop.f32.mrb[49].mxu0  ;;  %v3060_v48 = vsel %vm2548_vm4, %v2018_v54, %v2804_v17  ;;  %v6839_v51 = vpop.f32.mrb[49].mxu1 }
 0x144   :  { %4215 = vst.msk [vmem:[%s8261_s3 + $0x98] sm:$0xf] %vm4176_vm1, %v4991_v37  ;;  %v4989_v32 = vpack.c.bf16 %v2932_v49, %v2932_v49  ;;  %v2935_v46 = vsel %vm2423_vm0, %v1517_v52, %v2679_v0  ;;  %v1509_v50 = vadd.f32 %v6748_v31, %v6680_v6  ;;  %v6841_v21 = vpop.f32.mrb[50].mxu0  ;;  %v5117_v55 = vpack.c.bf16 %v3060_v48, %v3060_v48  ;;  %v6849_v58 = vpop.f32.mrb[50].mxu1 }
 0x145   :  { %4343 = vst.msk [vmem:[%s8261_s3 + $0x298] sm:$0xf] %vm4176_vm1, %v5119_v1  ;;  %v4992_v47 = vpack.c.bf16 %v2935_v46, %v2935_v46  ;;  %v3063_v26 = vsel %vm2551_vm5, %v2029_v27, %v2807_v22  ;;  %v2021_v56 = vadd.f32 %v6748_v31, %v6682_v7  ;;  %v6851_v30 = vpop.f32.mrb[51].mxu0  ;;  %v1530_v62 = vadd.f32 %v6748_v31, %v6716_v24  ;;  %v6859_v63 = vpop.f32.mrb[51].mxu1 }
 0x146   :  { %4213 = vst.msk [vmem:[%s8261_s3 + $0x90] sm:$0xf] %vm4176_vm1, %v4989_v32  ;;  %v5120_v6 = vpack.c.bf16 %v3063_v26, %v3063_v26  ;;  %vm2421_vm6 = vcmp.ge.f32.partialorder %v1509_v50, 0.0  ;;  %v2677_v33 = vmul.f32 0.2, %v1509_v50  ;;  %v2042_v60 = vadd.f32 %v6748_v31, %v6718_v25 }
 0x147   :  { %4341 = vst.msk [vmem:[%s8261_s3 + $0x290] sm:$0xf] %vm4176_vm1, %v5117_v55  ;;  %4216 = vst.msk [vmem:[%s8261_s3 + $0x9c] sm:$0xf] %vm4176_vm1, %v4992_v47  ;;  %vm2549_vm7 = vcmp.ge.f32.partialorder %v2021_v56, 0.0  ;;  %v1522_v24 = vadd.f32 %v6748_v31, %v6722_v35  ;;  %vm2426_vm8 = vcmp.ge.f32.partialorder %v1530_v62, 0.0  ;;  %v2034_v10 = vadd.f32 %v6748_v31, %v6724_v36 }
 0x148   :  { %v2805_v7 = vmul.f32 0.2, %v2021_v56  ;;  %4344 = vst.msk [vmem:[%s8261_s3 + $0x29c] sm:$0xf] %vm4176_vm1, %v5120_v6  ;;  %v2933_v4 = vsel %vm2421_vm6, %v1509_v50, %v2677_v33  ;;  %v2682_v9 = vmul.f32 0.2, %v1530_v62  ;;  %v1533_v28 = vadd.f32 %v6748_v31, %v6727_v18 }
 0x149   :  { %v4990_v11 = vpack.c.bf16 %v2933_v4, %v2933_v4  ;;  %vm2554_vm9 = vcmp.ge.f32.partialorder %v2042_v60, 0.0  ;;  %v2810_v15 = vmul.f32 0.2, %v2042_v60  ;;  %vm2424_vm10 = vcmp.ge.f32.partialorder %v1522_v24, 0.0  ;;  %v6879_v35 = vpop.f32.mrb[52].mxu0  ;;  %v6881_v53 = vpop.f32.mrb[52].mxu1 }
 0x14a   :  { %v3061_v12 = vsel %vm2549_vm7, %v2021_v56, %v2805_v7  ;;  %v2938_v25 = vsel %vm2426_vm8, %v1530_v62, %v2682_v9  ;;  %v2680_v2 = vmul.f32 0.2, %v1522_v24  ;;  %vm2552_vm11 = vcmp.ge.f32.partialorder %v2034_v10, 0.0  ;;  %v6887_v23 = vpop.f32.mrb[53].mxu0  ;;  %v6889_v54 = vpop.f32.mrb[53].mxu1 }
 0x14b   :  { %v5118_v61 = vpack.c.bf16 %v3061_v12, %v3061_v12  ;;  %4214 = vst.msk [vmem:[%s8261_s3 + $0x94] sm:$0xf] %vm4176_vm1, %v4990_v11  ;;  %v4995_v3 = vpack.c.bf16 %v2938_v25, %v2938_v25  ;;  %v3066_v59 = vsel %vm2554_vm9, %v2042_v60, %v2810_v15  ;;  %v2808_v36 = vmul.f32 0.2, %v2034_v10  ;;  %v6899_v34 = vpop.f32.mrb[54].mxu0  ;;  %v6901_v37 = vpop.f32.mrb[54].mxu1 }
 0x14c   :  { %v5123_v52 = vpack.c.bf16 %v3066_v59, %v3066_v59  ;;  %v2936_v27 = vsel %vm2424_vm10, %v1522_v24, %v2680_v2  ;;  %v2045_v29 = vadd.f32 %v6748_v31, %v6729_v40  ;;  %v1525_v17 = vadd.f32 %v6748_v31, %v6735_v42  ;;  %v6911_v0 = vpop.f32.mrb[55].mxu0  ;;  %v6913_v40 = vpop.f32.mrb[55].mxu1 }
 0x14d   :  { %4342 = vst.msk [vmem:[%s8261_s3 + $0x294] sm:$0xf] %vm4176_vm1, %v5118_v61  ;;  %4219 = vst.msk [vmem:[%s8261_s3 + $0xa8] sm:$0xf] %vm4176_vm1, %v4995_v3  ;;  %v4993_v39 = vpack.c.bf16 %v2936_v27, %v2936_v27  ;;  %v3064_v57 = vsel %vm2552_vm11, %v2034_v10, %v2808_v36  ;;  %v2037_v18 = vadd.f32 %v6748_v31, %v6754_v45  ;;  %vm2427_vm12 = vcmp.ge.f32.partialorder %v1533_v28, 0.0 }
 0x14e   :  { %4347 = vst.msk [vmem:[%s8261_s3 + $0x2a8] sm:$0xf] %vm4176_vm1, %v5123_v52  ;;  %v5121_v1 = vpack.c.bf16 %v3064_v57, %v3064_v57  ;;  %v2683_v49 = vmul.f32 0.2, %v1533_v28  ;;  %vm2555_vm13 = vcmp.ge.f32.partialorder %v2045_v29, 0.0  ;;  %vm2425_vm14 = vcmp.ge.f32.partialorder %v1525_v17, 0.0 }
 0x14f   :  { %4217 = vst.msk [vmem:[%s8261_s3 + $0xa0] sm:$0xf] %vm4176_vm1, %v4993_v39  ;;  %v2811_v42 = vmul.f32 0.2, %v2045_v29  ;;  %v2681_v45 = vmul.f32 0.2, %v1525_v17  ;;  %v1546_v48 = vadd.f32 %v6748_v31, %v6781_v5  ;;  %v2058_v46 = vadd.f32 %v6748_v31, %v6783_v8 }
 0x150   :  { %vm2553_vm15 = vcmp.ge.f32.partialorder %v2037_v18, 0.0  ;;  %4345 = vst.msk [vmem:[%s8261_s3 + $0x2a0] sm:$0xf] %vm4176_vm1, %v5121_v1  ;;  %v2939_v22 = vsel %vm2427_vm12, %v1533_v28, %v2683_v49  ;;  %v2809_v32 = vmul.f32 0.2, %v2037_v18  ;;  %v1538_v26 = vadd.f32 %v6748_v31, %v6785_v13 }
 0x151   :  { %v4996_v50 = vpack.c.bf16 %v2939_v22, %v2939_v22  ;;  %v3067_v55 = vsel %vm2555_vm13, %v2045_v29, %v2811_v42  ;;  %v2937_v47 = vsel %vm2425_vm14, %v1525_v17, %v2681_v45  ;;  %vm2430_vm2 = vcmp.ge.f32.partialorder %v1546_v48, 0.0  ;;  %v6933_v62 = vpop.f32.mrb[56].mxu0  ;;  %v6935_v7 = vpop.f32.mrb[56].mxu1 }
 0x152   :  { %v5124_v56 = vpack.c.bf16 %v3067_v55, %v3067_v55  ;;  %v4994_v6 = vpack.c.bf16 %v2937_v47, %v2937_v47  ;;  %v3065_v33 = vsel %vm2553_vm15, %v2037_v18, %v2809_v32  ;;  %v2686_v8 = vmul.f32 0.2, %v1546_v48  ;;  %v6941_v24 = vpop.f32.mrb[57].mxu0  ;;  %v6955_v10 = vpop.f32.mrb[57].mxu1 }
 0x153   :  { %4220 = vst.msk [vmem:[%s8261_s3 + $0xac] sm:$0xf] %vm4176_vm1, %v4996_v50  ;;  %v5122_v5 = vpack.c.bf16 %v3065_v33, %v3065_v33  ;;  %vm2558_vm3 = vcmp.ge.f32.partialorder %v2058_v46, 0.0  ;;  %v2814_v60 = vmul.f32 0.2, %v2058_v46  ;;  %vm2428_vm4 = vcmp.ge.f32.partialorder %v1538_v26, 0.0 }
 0x154   :  { %4348 = vst.msk [vmem:[%s8261_s3 + $0x2ac] sm:$0xf] %vm4176_vm1, %v5124_v56  ;;  %4218 = vst.msk [vmem:[%s8261_s3 + $0xa4] sm:$0xf] %vm4176_vm1, %v4994_v6  ;;  %v2684_v13 = vmul.f32 0.2, %v1538_v26  ;;  %v2050_v4 = vadd.f32 %v6748_v31, %v6787_v14  ;;  %v1549_v9 = vadd.f32 %v6748_v31, %v6789_v38  ;;  %v2942_v12 = vsel %vm2430_vm2, %v1546_v48, %v2686_v8 }
 0x155   :  { %v6957_v11 = vpop.f32.mrb[58].mxu0  ;;  %4346 = vst.msk [vmem:[%s8261_s3 + $0x2a4] sm:$0xf] %vm4176_vm1, %v5122_v5  ;;  %v3070_v15 = vsel %vm2558_vm3, %v2058_v46, %v2814_v60  ;;  %v2061_v61 = vadd.f32 %v6748_v31, %v6791_v16  ;;  %v1541_v14 = vadd.f32 %v6748_v31, %v6805_v19  ;;  %v6968_v25 = vpop.f32.mrb[58].mxu1  ;;  %v4999_v2 = vpack.c.bf16 %v2942_v12, %v2942_v12 }
 0x156   :  { %v6970_v38 = vpop.f32.mrb[59].mxu0  ;;  %v5127_v3 = vpack.c.bf16 %v3070_v15, %v3070_v15  ;;  %v2940_v59 = vsel %vm2428_vm4, %v1538_v26, %v2684_v13  ;;  %vm2556_vm0 = vcmp.ge.f32.partialorder %v2050_v4, 0.0  ;;  %v6972_v36 = vpop.f32.mrb[59].mxu1  ;;  %v2812_v27 = vmul.f32 0.2, %v2050_v4 }
 0x157   :  { %v4997_v52 = vpack.c.bf16 %v2940_v59, %v2940_v59  ;;  %vm2431_vm5 = vcmp.ge.f32.partialorder %v1549_v9, 0.0  ;;  %v2687_v28 = vmul.f32 0.2, %v1549_v9  ;;  %4223 = vst.msk [vmem:[%s8261_s3 + $0xb8] sm:$0xf] %vm4176_vm1, %v4999_v2  ;;  %vm2559_vm6 = vcmp.ge.f32.partialorder %v2061_v61, 0.0 }
 0x158   :  { %4351 = vst.msk [vmem:[%s8261_s3 + $0x2b8] sm:$0xf] %vm4176_vm1, %v5127_v3  ;;  %v2815_v16 = vmul.f32 0.2, %v2061_v61  ;;  %vm2429_vm7 = vcmp.ge.f32.partialorder %v1541_v14, 0.0  ;;  %v3068_v29 = vsel %vm2556_vm0, %v2050_v4, %v2812_v27  ;;  %v2053_v57 = vadd.f32 %v6748_v31, %v6807_v20 }
 0x159   :  { %v2685_v19 = vmul.f32 0.2, %v1541_v14  ;;  %4221 = vst.msk [vmem:[%s8261_s3 + $0xb0] sm:$0xf] %vm4176_vm1, %v4997_v52  ;;  %v2943_v39 = vsel %vm2431_vm5, %v1549_v9, %v2687_v28  ;;  %v1562_v17 = vadd.f32 %v6748_v31, %v6827_v41  ;;  %v5125_v18 = vpack.c.bf16 %v3068_v29, %v3068_v29  ;;  %v6990_v45 = vpop.f32.mrb[60].mxu0  ;;  %v6992_v22 = vpop.f32.mrb[60].mxu1 }
 0x15a   :  { %v5000_v1 = vpack.c.bf16 %v2943_v39, %v2943_v39  ;;  %v3071_v49 = vsel %vm2559_vm6, %v2061_v61, %v2815_v16  ;;  %vm2557_vm8 = vcmp.ge.f32.partialorder %v2053_v57, 0.0  ;;  %v2813_v46 = vmul.f32 0.2, %v2053_v57  ;;  %v6994_v50 = vpop.f32.mrb[61].mxu0  ;;  %v6996_v55 = vpop.f32.mrb[61].mxu1 }
 0x15b   :  { %v2941_v42 = vsel %vm2429_vm7, %v1541_v14, %v2685_v19  ;;  %v5128_v32 = vpack.c.bf16 %v3071_v49, %v3071_v49  ;;  %4349 = vst.msk [vmem:[%s8261_s3 + $0x2b0] sm:$0xf] %vm4176_vm1, %v5125_v18  ;;  %vm2434_vm9 = vcmp.ge.f32.partialorder %v1562_v17, 0.0  ;;  %v2690_v20 = vmul.f32 0.2, %v1562_v17  ;;  %v7010_v26 = vpop.f32.mrb[62].mxu0 }
 0x15c   :  { %v4998_v48 = vpack.c.bf16 %v2941_v42, %v2941_v42  ;;  %4224 = vst.msk [vmem:[%s8261_s3 + $0xbc] sm:$0xf] %vm4176_vm1, %v5000_v1  ;;  %v2074_v41 = vadd.f32 %v6748_v31, %v6833_v43  ;;  %v1554_v47 = vadd.f32 %v6748_v31, %v6835_v44  ;;  %v7012_v56 = vpop.f32.mrb[62].mxu1  ;;  %v3069_v6 = vsel %vm2557_vm8, %v2053_v57, %v2813_v46  ;;  %v7028_v5 = vpop.f32.mrb[63].mxu0 }
 0x15d   :  { %4352 = vst.msk [vmem:[%s8261_s3 + $0x2bc] sm:$0xf] %vm4176_vm1, %v5128_v32  ;;  %v2066_v43 = vadd.f32 %v6748_v31, %v6839_v51  ;;  %v1565_v44 = vadd.f32 %v6748_v31, %v6841_v21  ;;  %v2077_v33 = vadd.f32 %v6748_v31, %v6849_v58  ;;  %v7030_v8 = vpop.f32.mrb[63].mxu1  ;;  %v5126_v60 = vpack.c.bf16 %v3069_v6, %v3069_v6 }
 0x15e   :  { %4222 = vst.msk [vmem:[%s8261_s3 + $0xb4] sm:$0xf] %vm4176_vm1, %v4998_v48  ;;  %v2946_v13 = vsel %vm2434_vm9, %v1562_v17, %v2690_v20  ;;  %vm2562_vm10 = vcmp.ge.f32.partialorder %v2074_v41, 0.0  ;;  %v2818_v4 = vmul.f32 0.2, %v2074_v41  ;;  %vm2432_vm11 = vcmp.ge.f32.partialorder %v1554_v47, 0.0 }
 0x15f   :  { %v5003_v9 = vpack.c.bf16 %v2946_v13, %v2946_v13  ;;  %v2688_v12 = vmul.f32 0.2, %v1554_v47  ;;  %vm2560_vm12 = vcmp.ge.f32.partialorder %v2066_v43, 0.0  ;;  %4350 = vst.msk [vmem:[%s8261_s3 + $0x2b4] sm:$0xf] %vm4176_vm1, %v5126_v60  ;;  %vm2435_vm13 = vcmp.ge.f32.partialorder %v1565_v44, 0.0 }
 0x160   :  { %v3074_v51 = vsel %vm2562_vm10, %v2074_v41, %v2818_v4  ;;  %v2816_v21 = vmul.f32 0.2, %v2066_v43  ;;  %v2691_v58 = vmul.f32 0.2, %v1565_v44  ;;  %vm2563_vm14 = vcmp.ge.f32.partialorder %v2077_v33, 0.0 }
 0x161   :  { %4227 = vst.msk [vmem:[%s8261_s3 + $0xc8] sm:$0xf] %vm4176_vm1, %v5003_v9  ;;  %v5131_v15 = vpack.c.bf16 %v3074_v51, %v3074_v51  ;;  %v2944_v61 = vsel %vm2432_vm11, %v1554_v47, %v2688_v12  ;;  %v2819_v14 = vmul.f32 0.2, %v2077_v33  ;;  %v1557_v52 = vadd.f32 %v6748_v31, %v6851_v30  ;;  %v7042_v27 = vpop.f32.mrb[64].mxu0  ;;  %v7044_v28 = vpop.f32.mrb[64].mxu1 }
 0x162   :  { %v5001_v2 = vpack.c.bf16 %v2944_v61, %v2944_v61  ;;  %v3072_v3 = vsel %vm2560_vm12, %v2066_v43, %v2816_v21  ;;  %v2947_v59 = vsel %vm2435_vm13, %v1565_v44, %v2691_v58  ;;  %v2069_v39 = vadd.f32 %v6748_v31, %v6859_v63  ;;  %v7052_v57 = vpop.f32.mrb[65].mxu0  ;;  %v7054_v17 = vpop.f32.mrb[65].mxu1 }
 0x163   :  { %4355 = vst.msk [vmem:[%s8261_s3 + $0x2c8] sm:$0xf] %vm4176_vm1, %v5131_v15  ;;  %v5129_v16 = vpack.c.bf16 %v3072_v3, %v3072_v3  ;;  %v5004_v19 = vpack.c.bf16 %v2947_v59, %v2947_v59  ;;  %v3075_v29 = vsel %vm2563_vm14, %v2077_v33, %v2819_v14  ;;  %vm2433_vm15 = vcmp.ge.f32.partialorder %v1557_v52, 0.0  ;;  %v7062_v49 = vpop.f32.mrb[66].mxu0  ;;  %v7064_v42 = vpop.f32.mrb[66].mxu1 }
 0x164   :  { %4225 = vst.msk [vmem:[%s8261_s3 + $0xc0] sm:$0xf] %vm4176_vm1, %v5001_v2  ;;  %v5132_v30 = vpack.c.bf16 %v3075_v29, %v3075_v29  ;;  %v2689_v18 = vmul.f32 0.2, %v1557_v52  ;;  %v1578_v1 = vadd.f32 %v6748_v31, %v6879_v35  ;;  %vm2561_vm2 = vcmp.ge.f32.partialorder %v2069_v39, 0.0  ;;  %v7078_v48 = vpop.f32.mrb[67].mxu0 }
 0x165   :  { %4353 = vst.msk [vmem:[%s8261_s3 + $0x2c0] sm:$0xf] %vm4176_vm1, %v5129_v16  ;;  %4228 = vst.msk [vmem:[%s8261_s3 + $0xcc] sm:$0xf] %vm4176_vm1, %v5004_v19  ;;  %v2817_v63 = vmul.f32 0.2, %v2069_v39  ;;  %v2090_v32 = vadd.f32 %v6748_v31, %v6881_v53  ;;  %v1570_v35 = vadd.f32 %v6748_v31, %v6887_v23  ;;  %v2082_v47 = vadd.f32 %v6748_v31, %v6889_v54 }
 0x166   :  { %v7080_v46 = vpop.f32.mrb[67].mxu1  ;;  %4356 = vst.msk [vmem:[%s8261_s3 + $0x2cc] sm:$0xf] %vm4176_vm1, %v5132_v30  ;;  %v2945_v20 = vsel %vm2433_vm15, %v1557_v52, %v2689_v18  ;;  %vm2438_vm3 = vcmp.ge.f32.partialorder %v1578_v1, 0.0  ;;  %v2694_v41 = vmul.f32 0.2, %v1578_v1  ;;  %v1581_v12 = vadd.f32 %v6748_v31, %v6899_v34 }
 0x167   :  { %v5002_v6 = vpack.c.bf16 %v2945_v20, %v2945_v20  ;;  %v3073_v53 = vsel %vm2561_vm2, %v2069_v39, %v2817_v63  ;;  %vm2566_vm4 = vcmp.ge.f32.partialorder %v2090_v32, 0.0  ;;  %v2822_v43 = vmul.f32 0.2, %v2090_v32 }
 0x168   :  { %v5130_v23 = vpack.c.bf16 %v3073_v53, %v3073_v53  ;;  %v2950_v44 = vsel %vm2438_vm3, %v1578_v1, %v2694_v41  ;;  %vm2436_vm0 = vcmp.ge.f32.partialorder %v1570_v35, 0.0  ;;  %v2692_v33 = vmul.f32 0.2, %v1570_v35 }
 0x169   :  { %4226 = vst.msk [vmem:[%s8261_s3 + $0xc4] sm:$0xf] %vm4176_vm1, %v5002_v6  ;;  %v5007_v60 = vpack.c.bf16 %v2950_v44, %v2950_v44  ;;  %v3078_v13 = vsel %vm2566_vm4, %v2090_v32, %v2822_v43  ;;  %vm2564_vm5 = vcmp.ge.f32.partialorder %v2082_v47, 0.0  ;;  %v2820_v4 = vmul.f32 0.2, %v2082_v47  ;;  %v7100_v21 = vpop.f32.mrb[68].mxu0 }
 0x16a   :  { %4354 = vst.msk [vmem:[%s8261_s3 + $0x2c4] sm:$0xf] %vm4176_vm1, %v5130_v23  ;;  %v5135_v54 = vpack.c.bf16 %v3078_v13, %v3078_v13  ;;  %v2948_v9 = vsel %vm2436_vm0, %v1570_v35, %v2692_v33  ;;  %v2093_v51 = vadd.f32 %v6748_v31, %v6901_v37  ;;  %v7102_v58 = vpop.f32.mrb[68].mxu1  ;;  %v1573_v14 = vadd.f32 %v6748_v31, %v6911_v0  ;;  %v7112_v2 = vpop.f32.mrb[69].mxu0 }
 0x16b   :  { %4231 = vst.msk [vmem:[%s8261_s3 + $0xd8] sm:$0xf] %vm4176_vm1, %v5007_v60  ;;  %v5005_v15 = vpack.c.bf16 %v2948_v9, %v2948_v9  ;;  %v3076_v61 = vsel %vm2564_vm5, %v2082_v47, %v2820_v4  ;;  %v2085_v34 = vadd.f32 %v6748_v31, %v6913_v40  ;;  %v7114_v37 = vpop.f32.mrb[69].mxu1  ;;  %vm2439_vm6 = vcmp.ge.f32.partialorder %v1581_v12, 0.0  ;;  %v7120_v52 = vpop.f32.mrb[70].mxu0 }
 0x16c   :  { %4359 = vst.msk [vmem:[%s8261_s3 + $0x2d8] sm:$0xf] %vm4176_vm1, %v5135_v54  ;;  %v5133_v3 = vpack.c.bf16 %v3076_v61, %v3076_v61  ;;  %v2695_v59 = vmul.f32 0.2, %v1581_v12  ;;  %vm2567_vm7 = vcmp.ge.f32.partialorder %v2093_v51, 0.0  ;;  %v7122_v16 = vpop.f32.mrb[70].mxu1  ;;  %v1594_v39 = vadd.f32 %v6748_v31, %v6933_v62 }
 0x16d   :  { %4229 = vst.msk [vmem:[%s8261_s3 + $0xd0] sm:$0xf] %vm4176_vm1, %v5005_v15  ;;  %v2823_v0 = vmul.f32 0.2, %v2093_v51  ;;  %vm2437_vm8 = vcmp.ge.f32.partialorder %v1573_v14, 0.0  ;;  %vm2565_vm9 = vcmp.ge.f32.partialorder %v2085_v34, 0.0  ;;  %v2106_v30 = vadd.f32 %v6748_v31, %v6935_v7 }
 0x16e   :  { %v2693_v40 = vmul.f32 0.2, %v1573_v14  ;;  %4357 = vst.msk [vmem:[%s8261_s3 + $0x2d0] sm:$0xf] %vm4176_vm1, %v5133_v3  ;;  %v2951_v19 = vsel %vm2439_vm6, %v1581_v12, %v2695_v59  ;;  %v2821_v29 = vmul.f32 0.2, %v2085_v34  ;;  %v1586_v20 = vadd.f32 %v6748_v31, %v6941_v24 }
 0x16f   :  { %v7136_v18 = vpop.f32.mrb[71].mxu0  ;;  %v7138_v1 = vpop.f32.mrb[71].mxu1  ;;  %v5008_v63 = vpack.c.bf16 %v2951_v19, %v2951_v19  ;;  %v3079_v32 = vsel %vm2567_vm7, %v2093_v51, %v2823_v0  ;;  %vm2442_vm10 = vcmp.ge.f32.partialorder %v1594_v39, 0.0  ;;  %v2698_v7 = vmul.f32 0.2, %v1594_v39 }
 0x170   :  { %v2949_v35 = vsel %vm2437_vm8, %v1573_v14, %v2693_v40  ;;  %v5136_v41 = vpack.c.bf16 %v3079_v32, %v3079_v32  ;;  %v3077_v6 = vsel %vm2565_vm9, %v2085_v34, %v2821_v29  ;;  %vm2570_vm11 = vcmp.ge.f32.partialorder %v2106_v30, 0.0 }
 0x171   :  { %v5006_v47 = vpack.c.bf16 %v2949_v35, %v2949_v35  ;;  %4232 = vst.msk [vmem:[%s8261_s3 + $0xdc] sm:$0xf] %vm4176_vm1, %v5008_v63  ;;  %v5134_v62 = vpack.c.bf16 %v3077_v6, %v3077_v6  ;;  %v2826_v53 = vmul.f32 0.2, %v2106_v30  ;;  %vm2440_vm12 = vcmp.ge.f32.partialorder %v1586_v20, 0.0  ;;  %v7159_v44 = vpop.f32.mrb[72].mxu0 }
 0x172   :  { %4360 = vst.msk [vmem:[%s8261_s3 + $0x2dc] sm:$0xf] %vm4176_vm1, %v5136_v41  ;;  %v2696_v24 = vmul.f32 0.2, %v1586_v20  ;;  %v2098_v43 = vadd.f32 %v6748_v31, %v6955_v10  ;;  %v1597_v23 = vadd.f32 %v6748_v31, %v6957_v11  ;;  %v7161_v33 = vpop.f32.mrb[72].mxu1  ;;  %v2954_v60 = vsel %vm2442_vm10, %v1594_v39, %v2698_v7  ;;  %v7171_v54 = vpop.f32.mrb[73].mxu0 }
 0x173   :  { %4230 = vst.msk [vmem:[%s8261_s3 + $0xd4] sm:$0xf] %vm4176_vm1, %v5006_v47  ;;  %4358 = vst.msk [vmem:[%s8261_s3 + $0x2d4] sm:$0xf] %vm4176_vm1, %v5134_v62  ;;  %v3082_v13 = vsel %vm2570_vm11, %v2106_v30, %v2826_v53  ;;  %v2109_v4 = vadd.f32 %v6748_v31, %v6968_v25  ;;  %v1589_v10 = vadd.f32 %v6748_v31, %v6970_v38  ;;  %v7173_v11 = vpop.f32.mrb[73].mxu1  ;;  %v7175_v15 = vpop.f32.mrb[74].mxu0 }
 0x174   :  { %v5011_v9 = vpack.c.bf16 %v2954_v60, %v2954_v60  ;;  %v5139_v12 = vpack.c.bf16 %v3082_v13, %v3082_v13  ;;  %v2952_v51 = vsel %vm2440_vm12, %v1586_v20, %v2696_v24  ;;  %vm2568_vm13 = vcmp.ge.f32.partialorder %v2098_v43, 0.0  ;;  %v7177_v61 = vpop.f32.mrb[74].mxu1  ;;  %v7179_v25 = vpop.f32.mrb[75].mxu0 }
 0x175   :  { %v5009_v14 = vpack.c.bf16 %v2952_v51, %v2952_v51  ;;  %v2824_v34 = vmul.f32 0.2, %v2098_v43  ;;  %vm2443_vm14 = vcmp.ge.f32.partialorder %v1597_v23, 0.0  ;;  %v2699_v3 = vmul.f32 0.2, %v1597_v23  ;;  %v7197_v39 = vpop.f32.mrb[75].mxu1 }
 0x176   :  { %4235 = vst.msk [vmem:[%s8261_s3 + $0xe8] sm:$0xf] %vm4176_vm1, %v5011_v9  ;;  %4363 = vst.msk [vmem:[%s8261_s3 + $0x2e8] sm:$0xf] %vm4176_vm1, %v5139_v12  ;;  %vm2571_vm15 = vcmp.ge.f32.partialorder %v2109_v4, 0.0  ;;  %vm2441_vm2 = vcmp.ge.f32.partialorder %v1589_v10, 0.0  ;;  %v2101_v19 = vadd.f32 %v6748_v31, %v6972_v36  ;;  %v1610_v29 = vadd.f32 %v6748_v31, %v6990_v45 }
 0x177   :  { %v2827_v38 = vmul.f32 0.2, %v2109_v4  ;;  %v2697_v59 = vmul.f32 0.2, %v1589_v10  ;;  %4233 = vst.msk [vmem:[%s8261_s3 + $0xe0] sm:$0xf] %vm4176_vm1, %v5009_v14  ;;  %v3080_v0 = vsel %vm2568_vm13, %v2098_v43, %v2824_v34  ;;  %v2955_v40 = vsel %vm2443_vm14, %v1597_v23, %v2699_v3 }
 0x178   :  { %v5137_v30 = vpack.c.bf16 %v3080_v0, %v3080_v0  ;;  %v5012_v63 = vpack.c.bf16 %v2955_v40, %v2955_v40  ;;  %vm2569_vm3 = vcmp.ge.f32.partialorder %v2101_v19, 0.0  ;;  %v2825_v47 = vmul.f32 0.2, %v2101_v19 }
 0x179   :  { %v3083_v32 = vsel %vm2571_vm15, %v2109_v4, %v2827_v38  ;;  %v2953_v35 = vsel %vm2441_vm2, %v1589_v10, %v2697_v59  ;;  %vm2446_vm4 = vcmp.ge.f32.partialorder %v1610_v29, 0.0  ;;  %v2702_v36 = vmul.f32 0.2, %v1610_v29  ;;  %v7211_v62 = vpop.f32.mrb[76].mxu0  ;;  %v7213_v7 = vpop.f32.mrb[76].mxu1 }
 0x17a   :  { %v5140_v20 = vpack.c.bf16 %v3083_v32, %v3083_v32  ;;  %v5010_v41 = vpack.c.bf16 %v2953_v35, %v2953_v35  ;;  %4361 = vst.msk [vmem:[%s8261_s3 + $0x2e0] sm:$0xf] %vm4176_vm1, %v5137_v30  ;;  %4236 = vst.msk [vmem:[%s8261_s3 + $0xec] sm:$0xf] %vm4176_vm1, %v5012_v63  ;;  %v2122_v45 = vadd.f32 %v6748_v31, %v6992_v22  ;;  %v7229_v43 = vpop.f32.mrb[77].mxu0  ;;  %v7231_v23 = vpop.f32.mrb[77].mxu1 }
 0x17b   :  { %v1602_v6 = vadd.f32 %v6748_v31, %v6994_v50  ;;  %v3081_v53 = vsel %vm2569_vm3, %v2101_v19, %v2825_v47  ;;  %v2114_v22 = vadd.f32 %v6748_v31, %v6996_v55  ;;  %v1613_v50 = vadd.f32 %v6748_v31, %v7010_v26  ;;  %v7233_v10 = vpop.f32.mrb[78].mxu0  ;;  %v7235_v9 = vpop.f32.mrb[78].mxu1 }
 0x17c   :  { %4364 = vst.msk [vmem:[%s8261_s3 + $0x2ec] sm:$0xf] %vm4176_vm1, %v5140_v20  ;;  %4234 = vst.msk [vmem:[%s8261_s3 + $0xe4] sm:$0xf] %vm4176_vm1, %v5010_v41  ;;  %v2125_v24 = vadd.f32 %v6748_v31, %v7012_v56  ;;  %v5138_v60 = vpack.c.bf16 %v3081_v53, %v3081_v53  ;;  %v2958_v13 = vsel %vm2446_vm4, %v1610_v29, %v2702_v36  ;;  %vm2574_vm0 = vcmp.ge.f32.partialorder %v2122_v45, 0.0  ;;  %v7237_v26 = vpop.f32.mrb[79].mxu0 }
 0x17d   :  { %v2830_v4 = vmul.f32 0.2, %v2122_v45  ;;  %v5015_v12 = vpack.c.bf16 %v2958_v13, %v2958_v13  ;;  %vm2444_vm5 = vcmp.ge.f32.partialorder %v1602_v6, 0.0  ;;  %v2700_v55 = vmul.f32 0.2, %v1602_v6  ;;  %v7239_v51 = vpop.f32.mrb[79].mxu1 }
 0x17e   :  { %vm2572_vm6 = vcmp.ge.f32.partialorder %v2114_v22, 0.0  ;;  %4362 = vst.msk [vmem:[%s8261_s3 + $0x2e4] sm:$0xf] %vm4176_vm1, %v5138_v60  ;;  %v2828_v14 = vmul.f32 0.2, %v2114_v22  ;;  %vm2447_vm7 = vcmp.ge.f32.partialorder %v1613_v50, 0.0  ;;  %v1605_v29 = vadd.f32 %v6748_v31, %v7028_v5 }
 0x17f   :  { %v3086_v56 = vsel %vm2574_vm0, %v2122_v45, %v2830_v4  ;;  %v2703_v34 = vmul.f32 0.2, %v1613_v50  ;;  %4239 = vst.msk [vmem:[%s8261_s3 + $0xf8] sm:$0xf] %vm4176_vm1, %v5015_v12  ;;  %v2956_v38 = vsel %vm2444_vm5, %v1602_v6, %v2700_v55  ;;  %vm2575_vm8 = vcmp.ge.f32.partialorder %v2125_v24, 0.0 }
 0x180   :  { %v5143_v3 = vpack.c.bf16 %v3086_v56, %v3086_v56  ;;  %v2831_v59 = vmul.f32 0.2, %v2125_v24  ;;  %v5013_v0 = vpack.c.bf16 %v2956_v38, %v2956_v38  ;;  %v3084_v40 = vsel %vm2572_vm6, %v2114_v22, %v2828_v14 }
 0x181   :  { %v2959_v19 = vsel %vm2447_vm7, %v1613_v50, %v2703_v34  ;;  %v5141_v30 = vpack.c.bf16 %v3084_v40, %v3084_v40  ;;  %v2117_v35 = vadd.f32 %v6748_v31, %v7030_v8  ;;  %vm2445_vm9 = vcmp.ge.f32.partialorder %v1605_v29, 0.0  ;;  %v7263_v47 = vpop.f32.mrb[80].mxu0  ;;  %v7265_v36 = vpop.f32.mrb[80].mxu1 }
 0x182   :  { %4367 = vst.msk [vmem:[%s8261_s3 + $0x2f8] sm:$0xf] %vm4176_vm1, %v5143_v3  ;;  %v5016_v63 = vpack.c.bf16 %v2959_v19, %v2959_v19  ;;  %v3087_v32 = vsel %vm2575_vm8, %v2125_v24, %v2831_v59  ;;  %4237 = vst.msk [vmem:[%s8261_s3 + $0xf0] sm:$0xf] %vm4176_vm1, %v5013_v0  ;;  %v2701_v41 = vmul.f32 0.2, %v1605_v29  ;;  %v1626_v5 = vadd.f32 %v6748_v31, %v7042_v27 }
 0x183   :  { %v5144_v20 = vpack.c.bf16 %v3087_v32, %v3087_v32  ;;  %4365 = vst.msk [vmem:[%s8261_s3 + $0x2f0] sm:$0xf] %vm4176_vm1, %v5141_v30  ;;  %vm2573_vm10 = vcmp.ge.f32.partialorder %v2117_v35, 0.0  ;;  %v2829_v8 = vmul.f32 0.2, %v2117_v35  ;;  %v2138_v45 = vadd.f32 %v6748_v31, %v7044_v28  ;;  %v7279_v6 = vpop.f32.mrb[81].mxu0 }
 0x184   :  { %4240 = vst.msk [vmem:[%s8261_s3 + $0xfc] sm:$0xf] %vm4176_vm1, %v5016_v63  ;;  %v1618_v27 = vadd.f32 %v6748_v31, %v7052_v57  ;;  %v7281_v53 = vpop.f32.mrb[81].mxu1  ;;  %v2957_v22 = vsel %vm2445_vm9, %v1605_v29, %v2701_v41  ;;  %vm2450_vm11 = vcmp.ge.f32.partialorder %v1626_v5, 0.0  ;;  %v2706_v50 = vmul.f32 0.2, %v1626_v5 }
 0x185   :  { %4368 = vst.msk [vmem:[%s8261_s3 + $0x2fc] sm:$0xf] %vm4176_vm1, %v5144_v20  ;;  %v2130_v24 = vadd.f32 %v6748_v31, %v7054_v17  ;;  %v7289_v60 = vpop.f32.mrb[82].mxu0  ;;  %v7291_v28 = vpop.f32.mrb[82].mxu1  ;;  %v5014_v57 = vpack.c.bf16 %v2957_v22, %v2957_v22  ;;  %v3085_v13 = vsel %vm2573_vm10, %v2117_v35, %v2829_v8  ;;  %vm2578_vm12 = vcmp.ge.f32.partialorder %v2138_v45, 0.0 }
 0x186   :  { %v2834_v4 = vmul.f32 0.2, %v2138_v45  ;;  %v7293_v12 = vpop.f32.mrb[83].mxu0  ;;  %v7295_v55 = vpop.f32.mrb[83].mxu1  ;;  %v5142_v56 = vpack.c.bf16 %v3085_v13, %v3085_v13  ;;  %v2962_v14 = vsel %vm2450_vm11, %v1626_v5, %v2706_v50  ;;  %vm2448_vm13 = vcmp.ge.f32.partialorder %v1618_v27, 0.0 }
 0x187   :  { %v2704_v34 = vmul.f32 0.2, %v1618_v27  ;;  %4238 = vst.msk [vmem:[%s8261_s3 + $0xf4] sm:$0xf] %vm4176_vm1, %v5014_v57  ;;  %v5019_v17 = vpack.c.bf16 %v2962_v14, %v2962_v14  ;;  %vm2576_vm14 = vcmp.ge.f32.partialorder %v2130_v24, 0.0  ;;  %v1629_v40 = vadd.f32 %v6748_v31, %v7062_v49 }
 0x188   :  { %v3090_v3 = vsel %vm2578_vm12, %v2138_v45, %v2834_v4  ;;  %v2832_v38 = vmul.f32 0.2, %v2130_v24  ;;  %4366 = vst.msk [vmem:[%s8261_s3 + $0x2f4] sm:$0xf] %vm4176_vm1, %v5142_v56  ;;  %v2141_v19 = vadd.f32 %v6748_v31, %v7064_v42  ;;  %v1621_v63 = vadd.f32 %v6748_v31, %v7078_v48 }
 0x189   :  { %v5147_v59 = vpack.c.bf16 %v3090_v3, %v3090_v3  ;;  %v2960_v0 = vsel %vm2448_vm13, %v1618_v27, %v2704_v34  ;;  %4243 = vst.msk [vmem:[%s8261_s3 + $0x108] sm:$0xf] %vm4176_vm1, %v5019_v17  ;;  %v2133_v32 = vadd.f32 %v6748_v31, %v7080_v46  ;;  %vm2451_vm15 = vcmp.ge.f32.partialorder %v1629_v40, 0.0  ;;  %v7321_v35 = vpop.f32.mrb[84].mxu0  ;;  %v7323_v20 = vpop.f32.mrb[84].mxu1 }
 0x18a   :  { %v5017_v29 = vpack.c.bf16 %v2960_v0, %v2960_v0  ;;  %v3088_v30 = vsel %vm2576_vm14, %v2130_v24, %v2832_v38  ;;  %v2707_v42 = vmul.f32 0.2, %v1629_v40  ;;  %vm2579_vm2 = vcmp.ge.f32.partialorder %v2141_v19, 0.0  ;;  %v7337_v27 = vpop.f32.mrb[85].mxu0  ;;  %v7339_v22 = vpop.f32.mrb[85].mxu1 }
 0x18b   :  { %4371 = vst.msk [vmem:[%s8261_s3 + $0x308] sm:$0xf] %vm4176_vm1, %v5147_v59  ;;  %v5145_v49 = vpack.c.bf16 %v3088_v30, %v3088_v30  ;;  %v2835_v48 = vmul.f32 0.2, %v2141_v19  ;;  %vm2449_vm3 = vcmp.ge.f32.partialorder %v1621_v63, 0.0  ;;  %vm2577_vm4 = vcmp.ge.f32.partialorder %v2133_v32, 0.0 }
 0x18c   :  { %4241 = vst.msk [vmem:[%s8261_s3 + $0x100] sm:$0xf] %vm4176_vm1, %v5017_v29  ;;  %v2705_v46 = vmul.f32 0.2, %v1621_v63  ;;  %v2963_v41 = vsel %vm2451_vm15, %v1629_v40, %v2707_v42  ;;  %v2833_v5 = vmul.f32 0.2, %v2133_v32  ;;  %v1642_v8 = vadd.f32 %v6748_v31, %v7100_v21 }
 0x18d   :  { %4369 = vst.msk [vmem:[%s8261_s3 + $0x300] sm:$0xf] %vm4176_vm1, %v5145_v49  ;;  %v2154_v45 = vadd.f32 %v6748_v31, %v7102_v58  ;;  %v5020_v50 = vpack.c.bf16 %v2963_v41, %v2963_v41  ;;  %v3091_v24 = vsel %vm2579_vm2, %v2141_v19, %v2835_v48  ;;  %v1634_v13 = vadd.f32 %v6748_v31, %v7112_v2  ;;  %v7344_v4 = vpop.f32.mrb[86].mxu0  ;;  %v7346_v56 = vpop.f32.mrb[86].mxu1  ;;  %v7368_v59 = vld [vmem:[%s8260_s2] ss:$0 sm:$0xff] }
 0x18e   :  { %v2961_v57 = vsel %vm2449_vm3, %v1621_v63, %v2705_v46  ;;  %v5148_v14 = vpack.c.bf16 %v3091_v24, %v3091_v24  ;;  %v3089_v34 = vsel %vm2577_vm4, %v2133_v32, %v2833_v5  ;;  %vm2454_vm0 = vcmp.ge.f32.partialorder %v1642_v8, 0.0  ;;  %v7349_v58 = vpop.f32.mrb[87].mxu0  ;;  %v7351_v17 = vpop.f32.mrb[87].mxu1 }
 0x18f   :  { %v5018_v21 = vpack.c.bf16 %v2961_v57, %v2961_v57  ;;  %4244 = vst.msk [vmem:[%s8261_s3 + $0x10c] sm:$0xf] %vm4176_vm1, %v5020_v50  ;;  %v5146_v3 = vpack.c.bf16 %v3089_v34, %v3089_v34  ;;  %v2710_v31 = vmul.f32 0.2, %v1642_v8  ;;  %vm2582_vm5 = vcmp.ge.f32.partialorder %v2154_v45, 0.0 }
 0x190   :  { %v2838_v2 = vmul.f32 0.2, %v2154_v45  ;;  %4372 = vst.msk [vmem:[%s8261_s3 + $0x30c] sm:$0xf] %vm4176_vm1, %v5148_v14  ;;  %vm2452_vm6 = vcmp.ge.f32.partialorder %v1634_v13, 0.0  ;;  %v2146_v0 = vadd.f32 %v7368_v59, %v7114_v37  ;;  %v1645_v40 = vadd.f32 %v7368_v59, %v7120_v52 }
 0x191   :  { %4242 = vst.msk [vmem:[%s8261_s3 + $0x104] sm:$0xf] %vm4176_vm1, %v5018_v21  ;;  %v2708_v38 = vmul.f32 0.2, %v1634_v13  ;;  %4370 = vst.msk [vmem:[%s8261_s3 + $0x304] sm:$0xf] %vm4176_vm1, %v5146_v3  ;;  %v2966_v19 = vsel %vm2454_vm0, %v1642_v8, %v2710_v31  ;;  %v2157_v30 = vadd.f32 %v7368_v59, %v7122_v16  ;;  %v1637_v63 = vadd.f32 %v7368_v59, %v7136_v18 }
 0x192   :  { %v3094_v29 = vsel %vm2582_vm5, %v2154_v45, %v2838_v2  ;;  %v5023_v32 = vpack.c.bf16 %v2966_v19, %v2966_v19  ;;  %vm2580_vm7 = vcmp.ge.f32.partialorder %v2146_v0, 0.0  ;;  %v7383_v42 = vpop.f32.mrb[88].mxu0  ;;  %v7385_v52 = vpop.f32.mrb[88].mxu1  ;;  %v2836_v46 = vmul.f32 0.2, %v2146_v0 }
 0x193   :  { %v5151_v49 = vpack.c.bf16 %v3094_v29, %v3094_v29  ;;  %v2964_v37 = vsel %vm2452_vm6, %v1634_v13, %v2708_v38  ;;  %vm2455_vm8 = vcmp.ge.f32.partialorder %v1645_v40, 0.0  ;;  %v2711_v41 = vmul.f32 0.2, %v1645_v40  ;;  %v7387_v5 = vpop.f32.mrb[89].mxu0  ;;  %v7405_v57 = vpop.f32.mrb[89].mxu1 }
 0x194   :  { %v5021_v48 = vpack.c.bf16 %v2964_v37, %v2964_v37  ;;  %4247 = vst.msk [vmem:[%s8261_s3 + $0x118] sm:$0xf] %vm4176_vm1, %v5023_v32  ;;  %vm2583_vm9 = vcmp.ge.f32.partialorder %v2157_v30, 0.0  ;;  %v2839_v16 = vmul.f32 0.2, %v2157_v30  ;;  %vm2453_vm10 = vcmp.ge.f32.partialorder %v1637_v63, 0.0 }
 0x195   :  { %4375 = vst.msk [vmem:[%s8261_s3 + $0x318] sm:$0xf] %vm4176_vm1, %v5151_v49  ;;  %v2709_v18 = vmul.f32 0.2, %v1637_v63  ;;  %v3092_v8 = vsel %vm2580_vm7, %v2146_v0, %v2836_v46  ;;  %v2967_v45 = vsel %vm2455_vm8, %v1645_v40, %v2711_v41  ;;  %v2149_v50 = vadd.f32 %v7368_v59, %v7138_v1  ;;  %v7407_v13 = vpop.f32.mrb[90].mxu0  ;;  %v7409_v31 = vpop.f32.mrb[90].mxu1 }
 0x196   :  { %4245 = vst.msk [vmem:[%s8261_s3 + $0x110] sm:$0xf] %vm4176_vm1, %v5021_v48  ;;  %v1658_v24 = vadd.f32 %v7368_v59, %v7159_v44  ;;  %v5149_v14 = vpack.c.bf16 %v3092_v8, %v3092_v8  ;;  %v5024_v21 = vpack.c.bf16 %v2967_v45, %v2967_v45  ;;  %v3095_v34 = vsel %vm2583_vm9, %v2157_v30, %v2839_v16  ;;  %v7411_v2 = vpop.f32.mrb[91].mxu0  ;;  %v7413_v1 = vpop.f32.mrb[91].mxu1 }
 0x197   :  { %v2965_v3 = vsel %vm2453_vm10, %v1637_v63, %v2709_v18  ;;  %v5152_v38 = vpack.c.bf16 %v3095_v34, %v3095_v34  ;;  %vm2581_vm11 = vcmp.ge.f32.partialorder %v2149_v50, 0.0  ;;  %v2837_v40 = vmul.f32 0.2, %v2149_v50 }
 0x198   :  { %v5022_v0 = vpack.c.bf16 %v2965_v3, %v2965_v3  ;;  %4373 = vst.msk [vmem:[%s8261_s3 + $0x310] sm:$0xf] %vm4176_vm1, %v5149_v14  ;;  %4248 = vst.msk [vmem:[%s8261_s3 + $0x11c] sm:$0xf] %vm4176_vm1, %v5024_v21  ;;  %vm2458_vm12 = vcmp.ge.f32.partialorder %v1658_v24, 0.0  ;;  %v2170_v19 = vadd.f32 %v7368_v59, %v7161_v33  ;;  %v1650_v29 = vadd.f32 %v7368_v59, %v7171_v54 }
 0x199   :  { %v2714_v44 = vmul.f32 0.2, %v1658_v24  ;;  %4376 = vst.msk [vmem:[%s8261_s3 + $0x31c] sm:$0xf] %vm4176_vm1, %v5152_v38  ;;  %v3093_v30 = vsel %vm2581_vm11, %v2149_v50, %v2837_v40  ;;  %v2162_v63 = vadd.f32 %v7368_v59, %v7173_v11  ;;  %v1661_v33 = vadd.f32 %v7368_v59, %v7175_v15  ;;  %v7441_v48 = vpop.f32.mrb[92].mxu0  ;;  %v7443_v46 = vpop.f32.mrb[92].mxu1 }
 0x19a   :  { %4246 = vst.msk [vmem:[%s8261_s3 + $0x114] sm:$0xf] %vm4176_vm1, %v5022_v0  ;;  %v2173_v54 = vadd.f32 %v7368_v59, %v7177_v61  ;;  %v5150_v32 = vpack.c.bf16 %v3093_v30, %v3093_v30  ;;  %vm2586_vm13 = vcmp.ge.f32.partialorder %v2170_v19, 0.0  ;;  %v2842_v37 = vmul.f32 0.2, %v2170_v19  ;;  %v7445_v18 = vpop.f32.mrb[93].mxu0 }
 0x19b   :  { %v2970_v49 = vsel %vm2458_vm12, %v1658_v24, %v2714_v44  ;;  %vm2456_vm14 = vcmp.ge.f32.partialorder %v1650_v29, 0.0  ;;  %v2712_v16 = vmul.f32 0.2, %v1650_v29  ;;  %vm2584_vm15 = vcmp.ge.f32.partialorder %v2162_v63, 0.0  ;;  %v7447_v11 = vpop.f32.mrb[93].mxu1  ;;  %v7453_v45 = vpop.f32.mrb[94].mxu0 }
 0x19c   :  { %v5027_v41 = vpack.c.bf16 %v2970_v49, %v2970_v49  ;;  %4374 = vst.msk [vmem:[%s8261_s3 + $0x314] sm:$0xf] %vm4176_vm1, %v5150_v32  ;;  %v3098_v15 = vsel %vm2586_vm13, %v2170_v19, %v2842_v37  ;;  %v2840_v61 = vmul.f32 0.2, %v2162_v63  ;;  %vm2459_vm2 = vcmp.ge.f32.partialorder %v1661_v33, 0.0  ;;  %v7459_v21 = vpop.f32.mrb[94].mxu1 }
 0x19d   :  { %v2715_v8 = vmul.f32 0.2, %v1661_v33  ;;  %v5155_v50 = vpack.c.bf16 %v3098_v15, %v3098_v15  ;;  %v2968_v24 = vsel %vm2456_vm14, %v1650_v29, %v2712_v16  ;;  %vm2587_vm3 = vcmp.ge.f32.partialorder %v2173_v54, 0.0  ;;  %v7461_v34 = vpop.f32.mrb[95].mxu0  ;;  %v7466_v44 = vpop.f32.mrb[95].mxu1 }
 0x19e   :  { %4251 = vst.msk [vmem:[%s8261_s3 + $0x128] sm:$0xf] %vm4176_vm1, %v5027_v41  ;;  %v2843_v14 = vmul.f32 0.2, %v2173_v54  ;;  %v5025_v3 = vpack.c.bf16 %v2968_v24, %v2968_v24  ;;  %v3096_v38 = vsel %vm2584_vm15, %v2162_v63, %v2840_v61  ;;  %v1653_v40 = vadd.f32 %v7368_v59, %v7179_v25 }
 0x19f   :  { %v2971_v0 = vsel %vm2459_vm2, %v1661_v33, %v2715_v8  ;;  %4379 = vst.msk [vmem:[%s8261_s3 + $0x328] sm:$0xf] %vm4176_vm1, %v5155_v50  ;;  %v5153_v19 = vpack.c.bf16 %v3096_v38, %v3096_v38  ;;  %v2165_v32 = vadd.f32 %v7368_v59, %v7197_v39  ;;  %v1674_v33 = vadd.f32 %v7368_v59, %v7211_v62 }
 0x1a0   :  { %v5028_v29 = vpack.c.bf16 %v2971_v0, %v2971_v0  ;;  %v3099_v30 = vsel %vm2587_vm3, %v2173_v54, %v2843_v14  ;;  %4249 = vst.msk [vmem:[%s8261_s3 + $0x120] sm:$0xf] %vm4176_vm1, %v5025_v3  ;;  %vm2457_vm4 = vcmp.ge.f32.partialorder %v1653_v40, 0.0  ;;  %v2713_v25 = vmul.f32 0.2, %v1653_v40 }
 0x1a1   :  { %v5156_v63 = vpack.c.bf16 %v3099_v30, %v3099_v30  ;;  %4377 = vst.msk [vmem:[%s8261_s3 + $0x320] sm:$0xf] %vm4176_vm1, %v5153_v19  ;;  %vm2585_vm0 = vcmp.ge.f32.partialorder %v2165_v32, 0.0  ;;  %v2841_v39 = vmul.f32 0.2, %v2165_v32  ;;  %v2186_v54 = vadd.f32 %v7368_v59, %v7213_v7  ;;  %v7498_v16 = vpop.f32.mrb[96].mxu0 }
 0x1a2   :  { %4252 = vst.msk [vmem:[%s8261_s3 + $0x12c] sm:$0xf] %vm4176_vm1, %v5028_v29  ;;  %v1666_v49 = vadd.f32 %v7368_v59, %v7229_v43  ;;  %v2969_v62 = vsel %vm2457_vm4, %v1653_v40, %v2713_v25  ;;  %vm2462_vm5 = vcmp.ge.f32.partialorder %v1674_v33, 0.0  ;;  %v2718_v37 = vmul.f32 0.2, %v1674_v33  ;;  %v7500_v15 = vpop.f32.mrb[96].mxu1 }
 0x1a3   :  { %4380 = vst.msk [vmem:[%s8261_s3 + $0x32c] sm:$0xf] %vm4176_vm1, %v5156_v63  ;;  %v2178_v41 = vadd.f32 %v7368_v59, %v7231_v23  ;;  %v5026_v61 = vpack.c.bf16 %v2969_v62, %v2969_v62  ;;  %v3097_v7 = vsel %vm2585_vm0, %v2165_v32, %v2841_v39  ;;  %vm2590_vm6 = vcmp.ge.f32.partialorder %v2186_v54, 0.0  ;;  %v7502_v43 = vpop.f32.mrb[97].mxu0  ;;  %v7504_v50 = vpop.f32.mrb[97].mxu1 }
 0x1a4   :  { %v2846_v8 = vmul.f32 0.2, %v2186_v54  ;;  %v5154_v24 = vpack.c.bf16 %v3097_v7, %v3097_v7  ;;  %v2974_v14 = vsel %vm2462_vm5, %v1674_v33, %v2718_v37  ;;  %vm2460_vm7 = vcmp.ge.f32.partialorder %v1666_v49, 0.0  ;;  %v7506_v38 = vpop.f32.mrb[98].mxu0  ;;  %v7508_v0 = vpop.f32.mrb[98].mxu1 }
 0x1a5   :  { %v2716_v3 = vmul.f32 0.2, %v1666_v49  ;;  %4250 = vst.msk [vmem:[%s8261_s3 + $0x124] sm:$0xf] %vm4176_vm1, %v5026_v61  ;;  %v5031_v23 = vpack.c.bf16 %v2974_v14, %v2974_v14  ;;  %vm2588_vm8 = vcmp.ge.f32.partialorder %v2178_v41, 0.0  ;;  %v7514_v29 = vpop.f32.mrb[99].mxu0  ;;  %v1677_v25 = vadd.f32 %v7368_v59, %v7233_v10 }
 0x1a6   :  { %v3102_v40 = vsel %vm2590_vm6, %v2186_v54, %v2846_v8  ;;  %v2844_v19 = vmul.f32 0.2, %v2178_v41  ;;  %v7516_v30 = vpop.f32.mrb[99].mxu1  ;;  %4378 = vst.msk [vmem:[%s8261_s3 + $0x324] sm:$0xf] %vm4176_vm1, %v5154_v24  ;;  %v2189_v33 = vadd.f32 %v7368_v59, %v7235_v9  ;;  %v1669_v62 = vadd.f32 %v7368_v59, %v7237_v26 }
 0x1a7   :  { %v5159_v32 = vpack.c.bf16 %v3102_v40, %v3102_v40  ;;  %v2972_v63 = vsel %vm2460_vm7, %v1666_v49, %v2716_v3  ;;  %4255 = vst.msk [vmem:[%s8261_s3 + $0x138] sm:$0xf] %vm4176_vm1, %v5031_v23  ;;  %v2181_v37 = vadd.f32 %v7368_v59, %v7239_v51  ;;  %vm2463_vm9 = vcmp.ge.f32.partialorder %v1677_v25, 0.0 }
 0x1a8   :  { %v5029_v39 = vpack.c.bf16 %v2972_v63, %v2972_v63  ;;  %v3100_v54 = vsel %vm2588_vm8, %v2178_v41, %v2844_v19  ;;  %v2719_v9 = vmul.f32 0.2, %v1677_v25  ;;  %vm2591_vm10 = vcmp.ge.f32.partialorder %v2189_v33, 0.0 }
 0x1a9   :  { %4383 = vst.msk [vmem:[%s8261_s3 + $0x338] sm:$0xf] %vm4176_vm1, %v5159_v32  ;;  %v5157_v10 = vpack.c.bf16 %v3100_v54, %v3100_v54  ;;  %v2847_v49 = vmul.f32 0.2, %v2189_v33  ;;  %vm2461_vm11 = vcmp.ge.f32.partialorder %v1669_v62, 0.0  ;;  %vm2589_vm12 = vcmp.ge.f32.partialorder %v2181_v37, 0.0 }
 0x1aa   :  { %4253 = vst.msk [vmem:[%s8261_s3 + $0x130] sm:$0xf] %vm4176_vm1, %v5029_v39  ;;  %v2717_v26 = vmul.f32 0.2, %v1669_v62  ;;  %v2975_v51 = vsel %vm2463_vm9, %v1677_v25, %v2719_v9  ;;  %v2845_v41 = vmul.f32 0.2, %v2181_v37  ;;  %v1690_v61 = vadd.f32 %v7368_v59, %v7263_v47 }
 0x1ab   :  { %4381 = vst.msk [vmem:[%s8261_s3 + $0x330] sm:$0xf] %vm4176_vm1, %v5157_v10  ;;  %v2202_v7 = vadd.f32 %v7368_v59, %v7265_v36  ;;  %v7550_v8 = vpop.f32.mrb[100].mxu0  ;;  %v7552_v24 = vpop.f32.mrb[100].mxu1  ;;  %v5032_v14 = vpack.c.bf16 %v2975_v51, %v2975_v51  ;;  %v3103_v3 = vsel %vm2591_vm10, %v2189_v33, %v2847_v49  ;;  %v1682_v40 = vadd.f32 %v7368_v59, %v7279_v6 }
 0x1ac   :  { %v2973_v23 = vsel %vm2461_vm11, %v1669_v62, %v2717_v26  ;;  %v7556_v19 = vpop.f32.mrb[101].mxu0  ;;  %v7558_v32 = vpop.f32.mrb[101].mxu1  ;;  %v5160_v63 = vpack.c.bf16 %v3103_v3, %v3103_v3  ;;  %v3101_v47 = vsel %vm2589_vm12, %v2181_v37, %v2845_v41  ;;  %vm2466_vm13 = vcmp.ge.f32.partialorder %v1690_v61, 0.0 }
 0x1ad   :  { %v5030_v25 = vpack.c.bf16 %v2973_v23, %v2973_v23  ;;  %v7561_v36 = vpop.f32.mrb[102].mxu0  ;;  %v7563_v39 = vpop.f32.mrb[102].mxu1  ;;  %4256 = vst.msk [vmem:[%s8261_s3 + $0x13c] sm:$0xf] %vm4176_vm1, %v5032_v14  ;;  %v5158_v33 = vpack.c.bf16 %v3101_v47, %v3101_v47  ;;  %v2722_v6 = vmul.f32 0.2, %v1690_v61  ;;  %v2194_v10 = vadd.f32 %v7368_v59, %v7281_v53 }
 0x1ae   :  { %vm2594_vm14 = vcmp.ge.f32.partialorder %v2202_v7, 0.0  ;;  %v2850_v54 = vmul.f32 0.2, %v2202_v7  ;;  %v7569_v62 = vpop.f32.mrb[103].mxu0  ;;  %4384 = vst.msk [vmem:[%s8261_s3 + $0x33c] sm:$0xf] %vm4176_vm1, %v5160_v63  ;;  %v1693_v9 = vadd.f32 %v7368_v59, %v7289_v60  ;;  %v2205_v41 = vadd.f32 %v7368_v59, %v7291_v28 }
 0x1af   :  { %4254 = vst.msk [vmem:[%s8261_s3 + $0x134] sm:$0xf] %vm4176_vm1, %v5030_v25  ;;  %vm2464_vm15 = vcmp.ge.f32.partialorder %v1682_v40, 0.0  ;;  %v2720_v37 = vmul.f32 0.2, %v1682_v40  ;;  %v7583_v49 = vpop.f32.mrb[103].mxu1  ;;  %v2978_v26 = vsel %vm2466_vm13, %v1690_v61, %v2722_v6  ;;  %v1685_v14 = vadd.f32 %v7368_v59, %v7293_v12 }
 0x1b0   :  { %4382 = vst.msk [vmem:[%s8261_s3 + $0x334] sm:$0xf] %vm4176_vm1, %v5158_v33  ;;  %v3106_v51 = vsel %vm2594_vm14, %v2202_v7, %v2850_v54  ;;  %v5035_v53 = vpack.c.bf16 %v2978_v26, %v2978_v26  ;;  %vm2592_vm2 = vcmp.ge.f32.partialorder %v2194_v10, 0.0  ;;  %v2848_v63 = vmul.f32 0.2, %v2194_v10 }
 0x1b1   :  { %v5163_v3 = vpack.c.bf16 %v3106_v51, %v3106_v51  ;;  %v2976_v23 = vsel %vm2464_vm15, %v1682_v40, %v2720_v37  ;;  %vm2467_vm3 = vcmp.ge.f32.partialorder %v1693_v9, 0.0  ;;  %v2723_v25 = vmul.f32 0.2, %v1693_v9  ;;  %v7610_v33 = vpop.f32.mrb[104].mxu0  ;;  %v7612_v6 = vpop.f32.mrb[104].mxu1 }
 0x1b2   :  { %v5033_v60 = vpack.c.bf16 %v2976_v23, %v2976_v23  ;;  %4259 = vst.msk [vmem:[%s8261_s3 + $0x148] sm:$0xf] %vm4176_vm1, %v5035_v53  ;;  %vm2595_vm4 = vcmp.ge.f32.partialorder %v2205_v41, 0.0  ;;  %v2851_v28 = vmul.f32 0.2, %v2205_v41  ;;  %vm2465_vm0 = vcmp.ge.f32.partialorder %v1685_v14, 0.0 }
 0x1b3   :  { %4387 = vst.msk [vmem:[%s8261_s3 + $0x348] sm:$0xf] %vm4176_vm1, %v5163_v3  ;;  %v2721_v12 = vmul.f32 0.2, %v1685_v14  ;;  %v3104_v61 = vsel %vm2592_vm2, %v2194_v10, %v2848_v63  ;;  %v2979_v7 = vsel %vm2467_vm3, %v1693_v9, %v2723_v25  ;;  %v2197_v40 = vadd.f32 %v7368_v59, %v7295_v55  ;;  %v7614_v53 = vpop.f32.mrb[105].mxu0  ;;  %v7616_v3 = vpop.f32.mrb[105].mxu1 }
 0x1b4   :  { %4257 = vst.msk [vmem:[%s8261_s3 + $0x140] sm:$0xf] %vm4176_vm1, %v5033_v60  ;;  %v1706_v47 = vadd.f32 %v7368_v59, %v7321_v35  ;;  %v5161_v54 = vpack.c.bf16 %v3104_v61, %v3104_v61  ;;  %v5036_v37 = vpack.c.bf16 %v2979_v7, %v2979_v7  ;;  %v3107_v26 = vsel %vm2595_vm4, %v2205_v41, %v2851_v28  ;;  %v7618_v55 = vpop.f32.mrb[106].mxu0  ;;  %v7620_v60 = vpop.f32.mrb[106].mxu1 }
 0x1b5   :  { %v2977_v51 = vsel %vm2465_vm0, %v1685_v14, %v2721_v12  ;;  %v5164_v10 = vpack.c.bf16 %v3107_v26, %v3107_v26  ;;  %vm2593_vm5 = vcmp.ge.f32.partialorder %v2197_v40, 0.0  ;;  %v2849_v23 = vmul.f32 0.2, %v2197_v40  ;;  %v7634_v63 = vpop.f32.mrb[107].mxu0  ;;  %v7636_v25 = vpop.f32.mrb[107].mxu1 }
 0x1b6   :  { %v5034_v9 = vpack.c.bf16 %v2977_v51, %v2977_v51  ;;  %4385 = vst.msk [vmem:[%s8261_s3 + $0x340] sm:$0xf] %vm4176_vm1, %v5161_v54  ;;  %4260 = vst.msk [vmem:[%s8261_s3 + $0x14c] sm:$0xf] %vm4176_vm1, %v5036_v37  ;;  %vm2470_vm6 = vcmp.ge.f32.partialorder %v1706_v47, 0.0  ;;  %v2218_v41 = vadd.f32 %v7368_v59, %v7323_v20  ;;  %v1698_v14 = vadd.f32 %v7368_v59, %v7337_v27 }
 0x1b7   :  { %v2726_v35 = vmul.f32 0.2, %v1706_v47  ;;  %4388 = vst.msk [vmem:[%s8261_s3 + $0x34c] sm:$0xf] %vm4176_vm1, %v5164_v10  ;;  %v3105_v28 = vsel %vm2593_vm5, %v2197_v40, %v2849_v23  ;;  %v2210_v20 = vadd.f32 %v7368_v59, %v7339_v22  ;;  %v1709_v27 = vadd.f32 %v7368_v59, %v7344_v4 }
 0x1b8   :  { %4258 = vst.msk [vmem:[%s8261_s3 + $0x144] sm:$0xf] %vm4176_vm1, %v5034_v9  ;;  %v2221_v12 = vadd.f32 %v7368_v59, %v7346_v56  ;;  %v5162_v61 = vpack.c.bf16 %v3105_v28, %v3105_v28  ;;  %vm2598_vm7 = vcmp.ge.f32.partialorder %v2218_v41, 0.0  ;;  %v2854_v54 = vmul.f32 0.2, %v2218_v41 }
 0x1b9   :  { %v2982_v7 = vsel %vm2470_vm6, %v1706_v47, %v2726_v35  ;;  %vm2468_vm8 = vcmp.ge.f32.partialorder %v1698_v14, 0.0  ;;  %v2724_v26 = vmul.f32 0.2, %v1698_v14  ;;  %vm2596_vm9 = vcmp.ge.f32.partialorder %v2210_v20, 0.0  ;;  %v7656_v51 = vpop.f32.mrb[108].mxu0 }
 0x1ba   :  { %v5039_v37 = vpack.c.bf16 %v2982_v7, %v2982_v7  ;;  %4386 = vst.msk [vmem:[%s8261_s3 + $0x344] sm:$0xf] %vm4176_vm1, %v5162_v61  ;;  %v3110_v22 = vsel %vm2598_vm7, %v2218_v41, %v2854_v54  ;;  %v2852_v40 = vmul.f32 0.2, %v2210_v20  ;;  %vm2471_vm10 = vcmp.ge.f32.partialorder %v1709_v27, 0.0  ;;  %v7662_v9 = vpop.f32.mrb[108].mxu1 }
 0x1bb   :  { %v2727_v4 = vmul.f32 0.2, %v1709_v27  ;;  %v5167_v56 = vpack.c.bf16 %v3110_v22, %v3110_v22  ;;  %v2980_v47 = vsel %vm2468_vm8, %v1698_v14, %v2724_v26  ;;  %vm2599_vm11 = vcmp.ge.f32.partialorder %v2221_v12, 0.0  ;;  %v7664_v23 = vpop.f32.mrb[109].mxu0  ;;  %v7668_v7 = vpop.f32.mrb[109].mxu1 }
 0x1bc   :  { %4263 = vst.msk [vmem:[%s8261_s3 + $0x158] sm:$0xf] %vm4176_vm1, %v5039_v37  ;;  %v2855_v10 = vmul.f32 0.2, %v2221_v12  ;;  %v5037_v35 = vpack.c.bf16 %v2980_v47, %v2980_v47  ;;  %v3108_v41 = vsel %vm2596_vm9, %v2210_v20, %v2852_v40  ;;  %v1701_v61 = vadd.f32 %v7368_v59, %v7349_v58  ;;  %v7670_v54 = vpop.f32.mrb[110].mxu0  ;;  %v7678_v20 = vpop.f32.mrb[110].mxu1 }
 0x1bd   :  { %v2983_v28 = vsel %vm2471_vm10, %v1709_v27, %v2727_v4  ;;  %4391 = vst.msk [vmem:[%s8261_s3 + $0x358] sm:$0xf] %vm4176_vm1, %v5167_v56  ;;  %v5165_v14 = vpack.c.bf16 %v3108_v41, %v3108_v41  ;;  %v2213_v22 = vadd.f32 %v7368_v59, %v7351_v17  ;;  %v7680_v27 = vpop.f32.mrb[111].mxu0  ;;  %v1722_v4 = vadd.f32 %v7368_v59, %v7383_v42  ;;  %v7688_v56 = vpop.f32.mrb[111].mxu1 }
 0x1be   :  { %v5040_v37 = vpack.c.bf16 %v2983_v28, %v2983_v28  ;;  %v3111_v26 = vsel %vm2599_vm11, %v2221_v12, %v2855_v10  ;;  %4261 = vst.msk [vmem:[%s8261_s3 + $0x150] sm:$0xf] %vm4176_vm1, %v5037_v35  ;;  %vm2469_vm12 = vcmp.ge.f32.partialorder %v1701_v61, 0.0  ;;  %v2725_v40 = vmul.f32 0.2, %v1701_v61 }
 0x1bf   :  { %v5168_v58 = vpack.c.bf16 %v3111_v26, %v3111_v26  ;;  %4389 = vst.msk [vmem:[%s8261_s3 + $0x350] sm:$0xf] %vm4176_vm1, %v5165_v14  ;;  %vm2597_vm13 = vcmp.ge.f32.partialorder %v2213_v22, 0.0  ;;  %v2853_v17 = vmul.f32 0.2, %v2213_v22  ;;  %v2234_v12 = vadd.f32 %v7368_v59, %v7385_v52 }
 0x1c0   :  { %4264 = vst.msk [vmem:[%s8261_s3 + $0x15c] sm:$0xf] %vm4176_vm1, %v5040_v37  ;;  %v1714_v42 = vadd.f32 %v7368_v59, %v7387_v5  ;;  %v2981_v47 = vsel %vm2469_vm12, %v1701_v61, %v2725_v40  ;;  %vm2474_vm14 = vcmp.ge.f32.partialorder %v1722_v4, 0.0  ;;  %v2730_v10 = vmul.f32 0.2, %v1722_v4 }
 0x1c1   :  { %4392 = vst.msk [vmem:[%s8261_s3 + $0x35c] sm:$0xf] %vm4176_vm1, %v5168_v58  ;;  %v2226_v35 = vadd.f32 %v7368_v59, %v7405_v57  ;;  %v5038_v41 = vpack.c.bf16 %v2981_v47, %v2981_v47  ;;  %v3109_v28 = vsel %vm2597_vm13, %v2213_v22, %v2853_v17  ;;  %vm2602_vm15 = vcmp.ge.f32.partialorder %v2234_v12, 0.0  ;;  %v7708_v5 = vpop.f32.mrb[112].mxu0 }
 0x1c2   :  { %v2858_v14 = vmul.f32 0.2, %v2234_v12  ;;  %v5166_v37 = vpack.c.bf16 %v3109_v28, %v3109_v28  ;;  %v2986_v52 = vsel %vm2474_vm14, %v1722_v4, %v2730_v10  ;;  %vm2472_vm2 = vcmp.ge.f32.partialorder %v1714_v42, 0.0  ;;  %v7716_v22 = vpop.f32.mrb[113].mxu0 }
 0x1c3   :  { %v2728_v26 = vmul.f32 0.2, %v1714_v42  ;;  %4262 = vst.msk [vmem:[%s8261_s3 + $0x154] sm:$0xf] %vm4176_vm1, %v5038_v41  ;;  %v5043_v61 = vpack.c.bf16 %v2986_v52, %v2986_v52  ;;  %vm2600_vm3 = vcmp.ge.f32.partialorder %v2226_v35, 0.0  ;;  %v7714_v57 = vpop.f32.mrb[112].mxu1  ;;  %v1725_v47 = vadd.f32 %v7368_v59, %v7407_v13 }
 0x1c4   :  { %v3114_v58 = vsel %vm2602_vm15, %v2234_v12, %v2858_v14  ;;  %v2856_v40 = vmul.f32 0.2, %v2226_v35  ;;  %4390 = vst.msk [vmem:[%s8261_s3 + $0x354] sm:$0xf] %vm4176_vm1, %v5166_v37  ;;  %v2237_v10 = vadd.f32 %v7368_v59, %v7409_v31  ;;  %v7726_v12 = vpop.f32.mrb[113].mxu1  ;;  %v7728_v41 = vpop.f32.mrb[114].mxu0  ;;  %v2229_v13 = vadd.f32 %v7368_v59, %v7413_v1 }
 0x1c5   :  { %v5171_v4 = vpack.c.bf16 %v3114_v58, %v3114_v58  ;;  %v2984_v17 = vsel %vm2472_vm2, %v1714_v42, %v2728_v26  ;;  %8262 = vst [vmem:[#allocation2_spill] sm:$0xff] %v7726_v12  ;;  %8263 = vst [vmem:[#allocation3_spill] sm:$0xff] %v7728_v41  ;;  %v1717_v42 = vadd.f32 %v7368_v59, %v7411_v2  ;;  %v7738_v37 = vpop.f32.mrb[114].mxu1  ;;  %v7740_v31 = vpop.f32.mrb[115].mxu0  ;;  %vm2475_vm4 = vcmp.ge.f32.partialorder %v1725_v47, 0.0 }
 0x1c6   :  { %4267 = vst.msk [vmem:[%s8261_s3 + $0x168] sm:$0xf] %vm4176_vm1, %v5043_v61  ;;  %v5041_v28 = vpack.c.bf16 %v2984_v17, %v2984_v17  ;;  %v3112_v14 = vsel %vm2600_vm3, %v2226_v35, %v2856_v40  ;;  %8264 = vst [vmem:[#allocation4_spill] sm:$0xff] %v7738_v37  ;;  %v2731_v26 = vmul.f32 0.2, %v1725_v47  ;;  %vm2603_vm0 = vcmp.ge.f32.partialorder %v2237_v10, 0.0 }
 0x1c7   :  { %8265 = vst [vmem:[#allocation5_spill] sm:$0xff] %v7740_v31  ;;  %4395 = vst.msk [vmem:[%s8261_s3 + $0x368] sm:$0xf] %vm4176_vm1, %v5171_v4  ;;  %v5169_v52 = vpack.c.bf16 %v3112_v14, %v3112_v14  ;;  %v7746_v35 = vpop.f32.mrb[115].mxu1  ;;  %v2859_v2 = vmul.f32 0.2, %v2237_v10  ;;  %v1738_v40 = vadd.f32 %v7368_v59, %v7441_v48  ;;  %v2250_v4 = vadd.f32 %v7368_v59, %v7443_v46 }
 0x1c8   :  { %8266 = vst [vmem:[#allocation6_spill] sm:$0xff] %v7746_v35  ;;  %4265 = vst.msk [vmem:[%s8261_s3 + $0x160] sm:$0xf] %vm4176_vm1, %v5041_v28  ;;  %vm2473_vm5 = vcmp.ge.f32.partialorder %v1717_v42, 0.0  ;;  %v2729_v1 = vmul.f32 0.2, %v1717_v42  ;;  %v2987_v61 = vsel %vm2475_vm4, %v1725_v47, %v2731_v26  ;;  %v1730_v35 = vadd.f32 %v7368_v59, %v7445_v18 }
 0x1c9   :  { %vm2601_vm6 = vcmp.ge.f32.partialorder %v2229_v13, 0.0  ;;  %4393 = vst.msk [vmem:[%s8261_s3 + $0x360] sm:$0xf] %vm4176_vm1, %v5169_v52  ;;  %v2857_v58 = vmul.f32 0.2, %v2229_v13  ;;  %v5044_v17 = vpack.c.bf16 %v2987_v61, %v2987_v61  ;;  %v3115_v14 = vsel %vm2603_vm0, %v2237_v10, %v2859_v2  ;;  %v7762_v12 = vpop.f32.mrb[116].mxu0 }
 0x1ca   :  { %v2985_v28 = vsel %vm2473_vm5, %v1717_v42, %v2729_v1  ;;  %v5172_v31 = vpack.c.bf16 %v3115_v14, %v3115_v14  ;;  %vm2478_vm7 = vcmp.ge.f32.partialorder %v1738_v40, 0.0  ;;  %v2734_v47 = vmul.f32 0.2, %v1738_v40 }
 0x1cb   :  { %v5042_v37 = vpack.c.bf16 %v2985_v28, %v2985_v28  ;;  %v3113_v41 = vsel %vm2601_vm6, %v2229_v13, %v2857_v58  ;;  %4268 = vst.msk [vmem:[%s8261_s3 + $0x16c] sm:$0xf] %vm4176_vm1, %v5044_v17  ;;  %vm2606_vm8 = vcmp.ge.f32.partialorder %v2250_v4, 0.0  ;;  %v2862_v46 = vmul.f32 0.2, %v2250_v4  ;;  %v7768_v10 = vpop.f32.mrb[116].mxu1 }
 0x1cc   :  { %v5170_v48 = vpack.c.bf16 %v3113_v41, %v3113_v41  ;;  %4396 = vst.msk [vmem:[%s8261_s3 + $0x36c] sm:$0xf] %vm4176_vm1, %v5172_v31  ;;  %vm2476_vm9 = vcmp.ge.f32.partialorder %v1730_v35, 0.0  ;;  %v2732_v18 = vmul.f32 0.2, %v1730_v35  ;;  %v2242_v41 = vadd.f32 %v7368_v59, %v7447_v11  ;;  %v7782_v13 = vpop.f32.mrb[117].mxu0 }
 0x1cd   :  { %4266 = vst.msk [vmem:[%s8261_s3 + $0x164] sm:$0xf] %vm4176_vm1, %v5042_v37  ;;  %v1741_v42 = vadd.f32 %v7368_v59, %v7453_v45  ;;  %v7784_v52 = vpop.f32.mrb[117].mxu1  ;;  %v2990_v31 = vsel %vm2478_vm7, %v1738_v40, %v2734_v47  ;;  %v3118_v37 = vsel %vm2606_vm8, %v2250_v4, %v2862_v46  ;;  %v2253_v26 = vadd.f32 %v7368_v59, %v7459_v21  ;;  %v7795_v2 = vpop.f32.mrb[118].mxu0 }
 0x1ce   :  { %4394 = vst.msk [vmem:[%s8261_s3 + $0x364] sm:$0xf] %vm4176_vm1, %v5170_v48  ;;  %v1733_v11 = vadd.f32 %v7368_v59, %v7461_v34  ;;  %v7797_v45 = vpop.f32.mrb[118].mxu1  ;;  %v5047_v1 = vpack.c.bf16 %v2990_v31, %v2990_v31  ;;  %v5175_v61 = vpack.c.bf16 %v3118_v37, %v3118_v37  ;;  %v2988_v58 = vsel %vm2476_vm9, %v1730_v35, %v2732_v18  ;;  %v7799_v17 = vpop.f32.mrb[119].mxu0 }
 0x1cf   :  { %8267 = vst [vmem:[#allocation7_spill] sm:$0xff] %v7797_v45  ;;  %vm2604_vm10 = vcmp.ge.f32.partialorder %v2242_v41, 0.0  ;;  %8268 = vst [vmem:[#allocation8_spill] sm:$0xff] %v7799_v17  ;;  %v7801_v14 = vpop.f32.mrb[119].mxu1  ;;  %v5045_v40 = vpack.c.bf16 %v2988_v58, %v2988_v58  ;;  %v2860_v4 = vmul.f32 0.2, %v2242_v41  ;;  %v2245_v47 = vadd.f32 %v7368_v59, %v7466_v44 }
 0x1d0   :  { %8269 = vst [vmem:[#allocation9_spill] sm:$0xff] %v7801_v14  ;;  %vm2479_vm11 = vcmp.ge.f32.partialorder %v1741_v42, 0.0  ;;  %v2735_v28 = vmul.f32 0.2, %v1741_v42  ;;  %4271 = vst.msk [vmem:[%s8261_s3 + $0x178] sm:$0xf] %vm4176_vm1, %v5047_v1  ;;  %v1754_v46 = vadd.f32 %v7368_v59, %v7498_v16  ;;  %v2266_v16 = vadd.f32 %v7368_v59, %v7500_v15 }
 0x1d1   :  { %4399 = vst.msk [vmem:[%s8261_s3 + $0x378] sm:$0xf] %vm4176_vm1, %v5175_v61  ;;  %vm2607_vm12 = vcmp.ge.f32.partialorder %v2253_v26, 0.0  ;;  %v2863_v21 = vmul.f32 0.2, %v2253_v26  ;;  %vm2477_vm13 = vcmp.ge.f32.partialorder %v1733_v11, 0.0  ;;  %v3116_v35 = vsel %vm2604_vm10, %v2242_v41, %v2860_v4 }
 0x1d2   :  { %v2733_v34 = vmul.f32 0.2, %v1733_v11  ;;  %4269 = vst.msk [vmem:[%s8261_s3 + $0x170] sm:$0xf] %vm4176_vm1, %v5045_v40  ;;  %v2991_v48 = vsel %vm2479_vm11, %v1741_v42, %v2735_v28  ;;  %v5173_v18 = vpack.c.bf16 %v3116_v35, %v3116_v35  ;;  %v7819_v61 = vpop.f32.mrb[120].mxu0  ;;  %vm2605_vm14 = vcmp.ge.f32.partialorder %v2245_v47, 0.0 }
 0x1d3   :  { %v5048_v31 = vpack.c.bf16 %v2991_v48, %v2991_v48  ;;  %v3119_v37 = vsel %vm2607_vm12, %v2253_v26, %v2863_v21  ;;  %v2861_v17 = vmul.f32 0.2, %v2245_v47  ;;  %v7821_v45 = vpop.f32.mrb[120].mxu1  ;;  %v7823_v41 = vpop.f32.mrb[121].mxu0  ;;  %vm2482_vm15 = vcmp.ge.f32.partialorder %v1754_v46, 0.0 }
 0x1d4   :  { %v2989_v1 = vsel %vm2477_vm13, %v1733_v11, %v2733_v34  ;;  %v5176_v58 = vpack.c.bf16 %v3119_v37, %v3119_v37  ;;  %4397 = vst.msk [vmem:[%s8261_s3 + $0x370] sm:$0xf] %vm4176_vm1, %v5173_v18  ;;  %v2738_v44 = vmul.f32 0.2, %v1754_v46  ;;  %v1746_v42 = vadd.f32 %v7368_v59, %v7502_v43  ;;  %v7837_v26 = vpop.f32.mrb[121].mxu1  ;;  %v7839_v11 = vpop.f32.mrb[122].mxu0 }
 0x1d5   :  { %v5046_v14 = vpack.c.bf16 %v2989_v1, %v2989_v1  ;;  %4272 = vst.msk [vmem:[%s8261_s3 + $0x17c] sm:$0xf] %vm4176_vm1, %v5048_v31  ;;  %v3117_v40 = vsel %vm2605_vm14, %v2245_v47, %v2861_v17  ;;  %v2258_v15 = vadd.f32 %v7368_v59, %v7504_v50  ;;  %v1757_v43 = vadd.f32 %v7368_v59, %v7506_v38  ;;  %v7855_v28 = vpop.f32.mrb[122].mxu1  ;;  %v7857_v21 = vpop.f32.mrb[123].mxu0 }
 0x1d6   :  { %4400 = vst.msk [vmem:[%s8261_s3 + $0x37c] sm:$0xf] %vm4176_vm1, %v5176_v58  ;;  %v2269_v4 = vadd.f32 %v7368_v59, %v7508_v0  ;;  %v5174_v34 = vpack.c.bf16 %v3117_v40, %v3117_v40  ;;  %v2994_v35 = vsel %vm2482_vm15, %v1754_v46, %v2738_v44  ;;  %vm2610_vm2 = vcmp.ge.f32.partialorder %v2266_v16, 0.0  ;;  %v7859_v18 = vpop.f32.mrb[123].mxu1 }
 0x1d7   :  { %4270 = vst.msk [vmem:[%s8261_s3 + $0x174] sm:$0xf] %vm4176_vm1, %v5046_v14  ;;  %v2866_v48 = vmul.f32 0.2, %v2266_v16  ;;  %v5051_v17 = vpack.c.bf16 %v2994_v35, %v2994_v35  ;;  %vm2480_vm3 = vcmp.ge.f32.partialorder %v1746_v42, 0.0  ;;  %vm2608_vm4 = vcmp.ge.f32.partialorder %v2258_v15, 0.0 }
 0x1d8   :  { %v2736_v14 = vmul.f32 0.2, %v1746_v42  ;;  %4398 = vst.msk [vmem:[%s8261_s3 + $0x374] sm:$0xf] %vm4176_vm1, %v5174_v34  ;;  %v2864_v38 = vmul.f32 0.2, %v2258_v15  ;;  %v1749_v44 = vadd.f32 %v7368_v59, %v7514_v29 }
 0x1d9   :  { %v3122_v50 = vsel %vm2610_vm2, %v2266_v16, %v2866_v48  ;;  %vm2483_vm0 = vcmp.ge.f32.partialorder %v1757_v43, 0.0  ;;  %v2739_v0 = vmul.f32 0.2, %v1757_v43  ;;  %4275 = vst.msk [vmem:[%s8261_s3 + $0x188] sm:$0xf] %vm4176_vm1, %v5051_v17  ;;  %vm2611_vm5 = vcmp.ge.f32.partialorder %v2269_v4, 0.0 }
 0x1da   :  { %v5179_v47 = vpack.c.bf16 %v3122_v50, %v3122_v50  ;;  %v2992_v46 = vsel %vm2480_vm3, %v1746_v42, %v2736_v14  ;;  %v2867_v31 = vmul.f32 0.2, %v2269_v4  ;;  %v3120_v1 = vsel %vm2608_vm4, %v2258_v15, %v2864_v38  ;;  %v7871_v40 = vpop.f32.mrb[124].mxu0 }
 0x1db   :  { %v5049_v37 = vpack.c.bf16 %v2992_v46, %v2992_v46  ;;  %v2995_v58 = vsel %vm2483_vm0, %v1757_v43, %v2739_v0  ;;  %v5177_v16 = vpack.c.bf16 %v3120_v1, %v3120_v1  ;;  %v2261_v42 = vadd.f32 %v7368_v59, %v7516_v30  ;;  %v7879_v48 = vpop.f32.mrb[124].mxu1  ;;  %v7881_v15 = vpop.f32.mrb[125].mxu0 }
 0x1dc   :  { %4403 = vst.msk [vmem:[%s8261_s3 + $0x388] sm:$0xf] %vm4176_vm1, %v5179_v47  ;;  %v5052_v34 = vpack.c.bf16 %v2995_v58, %v2995_v58  ;;  %v3123_v35 = vsel %vm2611_vm5, %v2269_v4, %v2867_v31  ;;  %vm2481_vm6 = vcmp.ge.f32.partialorder %v1749_v44, 0.0  ;;  %v2737_v43 = vmul.f32 0.2, %v1749_v44  ;;  %v7889_v14 = vpop.f32.mrb[125].mxu1 }
 0x1dd   :  { %4273 = vst.msk [vmem:[%s8261_s3 + $0x180] sm:$0xf] %vm4176_vm1, %v5049_v37  ;;  %v5180_v29 = vpack.c.bf16 %v3123_v35, %v3123_v35  ;;  %v1770_v17 = vadd.f32 %v7368_v59, %v7550_v8  ;;  %v7891_v4 = vpop.f32.mrb[126].mxu0  ;;  %4401 = vst.msk [vmem:[%s8261_s3 + $0x380] sm:$0xf] %vm4176_vm1, %v5177_v16  ;;  %vm2609_vm7 = vcmp.ge.f32.partialorder %v2261_v42, 0.0  ;;  %v2282_v50 = vadd.f32 %v7368_v59, %v7552_v24 }
 0x1de   :  { %4276 = vst.msk [vmem:[%s8261_s3 + $0x18c] sm:$0xf] %vm4176_vm1, %v5052_v34  ;;  %v2865_v30 = vmul.f32 0.2, %v2261_v42  ;;  %v1762_v8 = vadd.f32 %v7368_v59, %v7556_v19  ;;  %v7905_v38 = vpop.f32.mrb[126].mxu1  ;;  %v7907_v0 = vpop.f32.mrb[127].mxu0  ;;  %v2993_v47 = vsel %vm2481_vm6, %v1749_v44, %v2737_v43  ;;  %v2274_v31 = vadd.f32 %v7368_v59, %v7558_v32 }
 0x1df   :  { %4404 = vst.msk [vmem:[%s8261_s3 + $0x38c] sm:$0xf] %vm4176_vm1, %v5180_v29  ;;  %vm2486_vm8 = vcmp.ge.f32.partialorder %v1770_v17, 0.0  ;;  %v2742_v46 = vmul.f32 0.2, %v1770_v17  ;;  %v7915_v37 = vpop.f32.mrb[127].mxu1  ;;  %v5050_v24 = vpack.c.bf16 %v2993_v47, %v2993_v47  ;;  %v1773_v43 = vadd.f32 %v7368_v59, %v7561_v36 }
 0x1e0   :  { %v3121_v1 = vsel %vm2609_vm7, %v2261_v42, %v2865_v30  ;;  %vm2614_vm9 = vcmp.ge.f32.partialorder %v2282_v50, 0.0  ;;  %v2870_v19 = vmul.f32 0.2, %v2282_v50  ;;  %vm2484_vm10 = vcmp.ge.f32.partialorder %v1762_v8, 0.0 }
 0x1e1   :  { %v5178_v58 = vpack.c.bf16 %v3121_v1, %v3121_v1  ;;  %v2998_v16 = vsel %vm2486_vm8, %v1770_v17, %v2742_v46  ;;  %v2740_v34 = vmul.f32 0.2, %v1762_v8  ;;  %4274 = vst.msk [vmem:[%s8261_s3 + $0x184] sm:$0xf] %vm4176_vm1, %v5050_v24  ;;  %vm2612_vm11 = vcmp.ge.f32.partialorder %v2274_v31, 0.0 }
 0x1e2   :  { %v5055_v44 = vpack.c.bf16 %v2998_v16, %v2998_v16  ;;  %v3126_v35 = vsel %vm2614_vm9, %v2282_v50, %v2870_v19  ;;  %v2868_v29 = vmul.f32 0.2, %v2274_v31  ;;  %v2285_v17 = vadd.f32 %v7368_v59, %v7563_v39 }
 0x1e3   :  { %4402 = vst.msk [vmem:[%s8261_s3 + $0x384] sm:$0xf] %vm4176_vm1, %v5178_v58  ;;  %v5183_v32 = vpack.c.bf16 %v3126_v35, %v3126_v35  ;;  %v2996_v42 = vsel %vm2484_vm10, %v1762_v8, %v2740_v34  ;;  %v1765_v47 = vadd.f32 %v7368_v59, %v7569_v62  ;;  %v2277_v46 = vadd.f32 %v7368_v59, %v7583_v49 }
 0x1e4   :  { %4279 = vst.msk [vmem:[%s8261_s3 + $0x198] sm:$0xf] %vm4176_vm1, %v5055_v44  ;;  %v5053_v30 = vpack.c.bf16 %v2996_v42, %v2996_v42  ;;  %v3124_v50 = vsel %vm2612_vm11, %v2274_v31, %v2868_v29  ;;  %vm2487_vm12 = vcmp.ge.f32.partialorder %v1773_v43, 0.0  ;;  %v2743_v39 = vmul.f32 0.2, %v1773_v43 }
 0x1e5   :  { %4407 = vst.msk [vmem:[%s8261_s3 + $0x398] sm:$0xf] %vm4176_vm1, %v5183_v32  ;;  %v5181_v36 = vpack.c.bf16 %v3124_v50, %v3124_v50  ;;  %vm2615_vm13 = vcmp.ge.f32.partialorder %v2285_v17, 0.0  ;;  %v2871_v8 = vmul.f32 0.2, %v2285_v17  ;;  %vm2485_vm14 = vcmp.ge.f32.partialorder %v1765_v47, 0.0 }
 0x1e6   :  { %4277 = vst.msk [vmem:[%s8261_s3 + $0x190] sm:$0xf] %vm4176_vm1, %v5053_v30  ;;  %v2741_v62 = vmul.f32 0.2, %v1765_v47  ;;  %vm2613_vm15 = vcmp.ge.f32.partialorder %v2277_v46, 0.0  ;;  %v2999_v49 = vsel %vm2487_vm12, %v1773_v43, %v2743_v39  ;;  %v1786_v24 = vadd.f32 %v7368_v59, %v7610_v33 }
 0x1e7   :  { %4405 = vst.msk [vmem:[%s8261_s3 + $0x390] sm:$0xf] %vm4176_vm1, %v5181_v36  ;;  %v2869_v31 = vmul.f32 0.2, %v2277_v46  ;;  %v2298_v1 = vadd.f32 %v7368_v59, %v7612_v6  ;;  %v5056_v19 = vpack.c.bf16 %v2999_v49, %v2999_v49  ;;  %v3127_v58 = vsel %vm2615_vm13, %v2285_v17, %v2871_v8  ;;  %v7970_v6 = vld [vmem:[%s8260_s2] ss:$0 sm:$0xff] }
 0x1e8   :  { %v2997_v16 = vsel %vm2485_vm14, %v1765_v47, %v2741_v62  ;;  %v1778_v34 = vadd.f32 %v7368_v59, %v7614_v53  ;;  %v5184_v44 = vpack.c.bf16 %v3127_v58, %v3127_v58  ;;  %vm2490_vm2 = vcmp.ge.f32.partialorder %v1786_v24, 0.0 }
 0x1e9   :  { %v5054_v35 = vpack.c.bf16 %v2997_v16, %v2997_v16  ;;  %v3125_v29 = vsel %vm2613_vm15, %v2277_v46, %v2869_v31  ;;  %4280 = vst.msk [vmem:[%s8261_s3 + $0x19c] sm:$0xf] %vm4176_vm1, %v5056_v19  ;;  %v2746_v33 = vmul.f32 0.2, %v1786_v24  ;;  %vm2618_vm3 = vcmp.ge.f32.partialorder %v2298_v1, 0.0 }
 0x1ea   :  { %v5182_v32 = vpack.c.bf16 %v3125_v29, %v3125_v29  ;;  %v2874_v42 = vmul.f32 0.2, %v2298_v1  ;;  %4408 = vst.msk [vmem:[%s8261_s3 + $0x39c] sm:$0xf] %vm4176_vm1, %v5184_v44  ;;  %vm2488_vm4 = vcmp.ge.f32.partialorder %v1778_v34, 0.0  ;;  %v2290_v53 = vadd.f32 %v7970_v6, %v7616_v3 }
 0x1eb   :  { %4278 = vst.msk [vmem:[%s8261_s3 + $0x194] sm:$0xf] %vm4176_vm1, %v5054_v35  ;;  %v2744_v59 = vmul.f32 0.2, %v1778_v34  ;;  %v1789_v43 = vadd.f32 %v7970_v6, %v7618_v55  ;;  %v3002_v17 = vsel %vm2490_vm2, %v1786_v24, %v2746_v33  ;;  %v2301_v50 = vadd.f32 %v7970_v6, %v7620_v60 }
 0x1ec   :  { %4406 = vst.msk [vmem:[%s8261_s3 + $0x394] sm:$0xf] %vm4176_vm1, %v5182_v32  ;;  %v3130_v30 = vsel %vm2618_vm3, %v2298_v1, %v2874_v42  ;;  %v1781_v47 = vadd.f32 %v7970_v6, %v7634_v63  ;;  %v5059_v46 = vpack.c.bf16 %v3002_v17, %v3002_v17  ;;  %vm2616_vm0 = vcmp.ge.f32.partialorder %v2290_v53, 0.0 }
 0x1ed   :  { %v5187_v36 = vpack.c.bf16 %v3130_v30, %v3130_v30  ;;  %v3000_v39 = vsel %vm2488_vm4, %v1778_v34, %v2744_v59  ;;  %v2872_v8 = vmul.f32 0.2, %v2290_v53  ;;  %vm2491_vm5 = vcmp.ge.f32.partialorder %v1789_v43, 0.0 }
 0x1ee   :  { %v5057_v3 = vpack.c.bf16 %v3000_v39, %v3000_v39  ;;  %v2747_v55 = vmul.f32 0.2, %v1789_v43  ;;  %4283 = vst.msk [vmem:[%s8261_s3 + $0x1a8] sm:$0xf] %vm4176_vm1, %v5059_v46  ;;  %vm2619_vm6 = vcmp.ge.f32.partialorder %v2301_v50, 0.0  ;;  %vm2489_vm7 = vcmp.ge.f32.partialorder %v1781_v47, 0.0 }
 0x1ef   :  { %4411 = vst.msk [vmem:[%s8261_s3 + $0x3a8] sm:$0xf] %vm4176_vm1, %v5187_v36  ;;  %v2875_v60 = vmul.f32 0.2, %v2301_v50  ;;  %v2745_v63 = vmul.f32 0.2, %v1781_v47  ;;  %v3128_v62 = vsel %vm2616_vm0, %v2290_v53, %v2872_v8  ;;  %v2293_v31 = vadd.f32 %v7970_v6, %v7636_v25 }
 0x1f0   :  { %4281 = vst.msk [vmem:[%s8261_s3 + $0x1a0] sm:$0xf] %vm4176_vm1, %v5057_v3  ;;  %v3003_v49 = vsel %vm2491_vm5, %v1789_v43, %v2747_v55  ;;  %v1802_v24 = vadd.f32 %v7970_v6, %v7656_v51  ;;  %v5185_v1 = vpack.c.bf16 %v3128_v62, %v3128_v62  ;;  %v2314_v51 = vadd.f32 %v7970_v6, %v7662_v9 }
 0x1f1   :  { %v5060_v19 = vpack.c.bf16 %v3003_v49, %v3003_v49  ;;  %v3131_v58 = vsel %vm2619_vm6, %v2301_v50, %v2875_v60  ;;  %v3001_v16 = vsel %vm2489_vm7, %v1781_v47, %v2745_v63  ;;  %vm2617_vm8 = vcmp.ge.f32.partialorder %v2293_v31, 0.0 }
 0x1f2   :  { %v5188_v34 = vpack.c.bf16 %v3131_v58, %v3131_v58  ;;  %v5058_v44 = vpack.c.bf16 %v3001_v16, %v3001_v16  ;;  %v2873_v35 = vmul.f32 0.2, %v2293_v31  ;;  %4409 = vst.msk [vmem:[%s8261_s3 + $0x3a0] sm:$0xf] %vm4176_vm1, %v5185_v1  ;;  %vm2494_vm9 = vcmp.ge.f32.partialorder %v1802_v24, 0.0 }
 0x1f3   :  { %4284 = vst.msk [vmem:[%s8261_s3 + $0x1ac] sm:$0xf] %vm4176_vm1, %v5060_v19  ;;  %v2750_v25 = vmul.f32 0.2, %v1802_v24  ;;  %v1794_v29 = vadd.f32 %v7970_v6, %v7664_v23  ;;  %v2306_v33 = vadd.f32 %v7970_v6, %v7668_v7  ;;  %v1805_v9 = vadd.f32 %v7970_v6, %v7670_v54  ;;  %v8270_v19 = vld [vmem:[#allocation2_spill] sm:$0xff] }
 0x1f4   :  { %4412 = vst.msk [vmem:[%s8261_s3 + $0x3ac] sm:$0xf] %vm4176_vm1, %v5188_v34  ;;  %4282 = vst.msk [vmem:[%s8261_s3 + $0x1a4] sm:$0xf] %vm4176_vm1, %v5058_v44  ;;  %v3129_v32 = vsel %vm2617_vm8, %v2293_v31, %v2873_v35  ;;  %v2317_v23 = vadd.f32 %v7970_v6, %v7678_v20  ;;  %vm2622_vm10 = vcmp.ge.f32.partialorder %v2314_v51, 0.0  ;;  %v1797_v3 = vadd.f32 %v7970_v6, %v7680_v27 }
 0x1f5   :  { %v5186_v42 = vpack.c.bf16 %v3129_v32, %v3129_v32  ;;  %v3006_v59 = vsel %vm2494_vm9, %v1802_v24, %v2750_v25  ;;  %v2878_v53 = vmul.f32 0.2, %v2314_v51  ;;  %vm2492_vm11 = vcmp.ge.f32.partialorder %v1794_v29, 0.0 }
 0x1f6   :  { %v5063_v43 = vpack.c.bf16 %v3006_v59, %v3006_v59  ;;  %v2748_v17 = vmul.f32 0.2, %v1794_v29  ;;  %vm2620_vm12 = vcmp.ge.f32.partialorder %v2306_v33, 0.0  ;;  %v2876_v30 = vmul.f32 0.2, %v2306_v33 }
 0x1f7   :  { %4410 = vst.msk [vmem:[%s8261_s3 + $0x3a4] sm:$0xf] %vm4176_vm1, %v5186_v42  ;;  %v3134_v7 = vsel %vm2622_vm10, %v2314_v51, %v2878_v53  ;;  %vm2495_vm13 = vcmp.ge.f32.partialorder %v1805_v9, 0.0  ;;  %v2751_v54 = vmul.f32 0.2, %v1805_v9  ;;  %vm2623_vm14 = vcmp.ge.f32.partialorder %v2317_v23, 0.0 }
 0x1f8   :  { %4287 = vst.msk [vmem:[%s8261_s3 + $0x1b8] sm:$0xf] %vm4176_vm1, %v5063_v43  ;;  %v5191_v20 = vpack.c.bf16 %v3134_v7, %v3134_v7  ;;  %v3004_v50 = vsel %vm2492_vm11, %v1794_v29, %v2748_v17  ;;  %v2879_v47 = vmul.f32 0.2, %v2317_v23  ;;  %v3132_v36 = vsel %vm2620_vm12, %v2306_v33, %v2876_v30  ;;  %v8272_v42 = vld [vmem:[#allocation4_spill] sm:$0xff]  ;;  %v8273_v17 = vld [vmem:[#allocation5_spill] sm:$0xff] }
 0x1f9   :  { %v5061_v46 = vpack.c.bf16 %v3004_v50, %v3004_v50  ;;  %v3007_v39 = vsel %vm2495_vm13, %v1805_v9, %v2751_v54  ;;  %v5189_v8 = vpack.c.bf16 %v3132_v36, %v3132_v36  ;;  %v2309_v63 = vadd.f32 %v7970_v6, %v7688_v56  ;;  %v8271_v9 = vld [vmem:[#allocation3_spill] sm:$0xff]  ;;  %v8274_v30 = vld [vmem:[#allocation6_spill] sm:$0xff] }
 0x1fa   :  { %4415 = vst.msk [vmem:[%s8261_s3 + $0x3b8] sm:$0xf] %vm4176_vm1, %v5191_v20  ;;  %v5064_v55 = vpack.c.bf16 %v3007_v39, %v3007_v39  ;;  %v3135_v60 = vsel %vm2623_vm14, %v2317_v23, %v2879_v47  ;;  %vm2493_vm15 = vcmp.ge.f32.partialorder %v1797_v3, 0.0  ;;  %v2749_v49 = vmul.f32 0.2, %v1797_v3 }
 0x1fb   :  { %4285 = vst.msk [vmem:[%s8261_s3 + $0x1b0] sm:$0xf] %vm4176_vm1, %v5061_v46  ;;  %v5192_v62 = vpack.c.bf16 %v3135_v60, %v3135_v60  ;;  %v1818_v27 = vadd.f32 %v7970_v6, %v7708_v5  ;;  %4413 = vst.msk [vmem:[%s8261_s3 + $0x3b0] sm:$0xf] %vm4176_vm1, %v5189_v8  ;;  %vm2621_vm2 = vcmp.ge.f32.partialorder %v2309_v63, 0.0  ;;  %v2330_v31 = vadd.f32 %v7970_v6, %v7714_v57 }
 0x1fc   :  { %4288 = vst.msk [vmem:[%s8261_s3 + $0x1bc] sm:$0xf] %vm4176_vm1, %v5064_v55  ;;  %v2877_v56 = vmul.f32 0.2, %v2309_v63  ;;  %v1810_v24 = vadd.f32 %v7970_v6, %v7716_v22  ;;  %v3005_v5 = vsel %vm2493_vm15, %v1797_v3, %v2749_v49  ;;  %v2322_v58 = vadd.f32 %v7970_v6, %v8270_v19 }
 0x1fd   :  { %4416 = vst.msk [vmem:[%s8261_s3 + $0x3bc] sm:$0xf] %vm4176_vm1, %v5192_v62  ;;  %vm2498_vm3 = vcmp.ge.f32.partialorder %v1818_v27, 0.0  ;;  %v2754_v1 = vmul.f32 0.2, %v1818_v27  ;;  %v5062_v16 = vpack.c.bf16 %v3005_v5, %v3005_v5  ;;  %vm2626_vm4 = vcmp.ge.f32.partialorder %v2330_v31, 0.0 }
 0x1fe   :  { %v3133_v34 = vsel %vm2621_vm2, %v2309_v63, %v2877_v56  ;;  %v2882_v44 = vmul.f32 0.2, %v2330_v31  ;;  %vm2496_vm0 = vcmp.ge.f32.partialorder %v1810_v24, 0.0  ;;  %v2752_v25 = vmul.f32 0.2, %v1810_v24 }
 0x1ff   :  { %v5190_v35 = vpack.c.bf16 %v3133_v34, %v3133_v34  ;;  %v3010_v57 = vsel %vm2498_vm3, %v1818_v27, %v2754_v1  ;;  %4286 = vst.msk [vmem:[%s8261_s3 + $0x1b4] sm:$0xf] %vm4176_vm1, %v5062_v16  ;;  %vm2624_vm5 = vcmp.ge.f32.partialorder %v2322_v58, 0.0  ;;  %v2880_v29 = vmul.f32 0.2, %v2322_v58  ;;  %v8276_v34 = vld [vmem:[#allocation8_spill] sm:$0xff] }
 0x200   :  { %v5067_v22 = vpack.c.bf16 %v3010_v57, %v3010_v57  ;;  %v3138_v51 = vsel %vm2626_vm4, %v2330_v31, %v2882_v44  ;;  %v3008_v33 = vsel %vm2496_vm0, %v1810_v24, %v2752_v25  ;;  %v1821_v23 = vadd.f32 %v7970_v6, %v8271_v9  ;;  %v8277_v9 = vld [vmem:[#allocation9_spill] sm:$0xff] }
 0x201   :  { %4414 = vst.msk [vmem:[%s8261_s3 + $0x3b4] sm:$0xf] %vm4176_vm1, %v5190_v35  ;;  %v5195_v32 = vpack.c.bf16 %v3138_v51, %v3138_v51  ;;  %v2333_v59 = vadd.f32 %v7970_v6, %v8272_v42  ;;  %v5065_v53 = vpack.c.bf16 %v3008_v33, %v3008_v33  ;;  %v3136_v43 = vsel %vm2624_vm5, %v2322_v58, %v2880_v29  ;;  %v8275_v58 = vld [vmem:[#allocation7_spill] sm:$0xff] }
 0x202   :  { %4291 = vst.msk [vmem:[%s8261_s3 + $0x1c8] sm:$0xf] %vm4176_vm1, %v5067_v22  ;;  %v1813_v7 = vadd.f32 %v7970_v6, %v8273_v17  ;;  %v2325_v54 = vadd.f32 %v7970_v6, %v8274_v30  ;;  %v5193_v20 = vpack.c.bf16 %v3136_v43, %v3136_v43  ;;  %vm2499_vm6 = vcmp.ge.f32.partialorder %v1821_v23, 0.0 }
 0x203   :  { %4419 = vst.msk [vmem:[%s8261_s3 + $0x3c8] sm:$0xf] %vm4176_vm1, %v5195_v32  ;;  %v2755_v50 = vmul.f32 0.2, %v1821_v23  ;;  %vm2627_vm7 = vcmp.ge.f32.partialorder %v2333_v59, 0.0  ;;  %v1834_v3 = vadd.f32 %v7970_v6, %v7762_v12  ;;  %v2346_v8 = vadd.f32 %v7970_v6, %v7768_v10 }
 0x204   :  { %4289 = vst.msk [vmem:[%s8261_s3 + $0x1c0] sm:$0xf] %vm4176_vm1, %v5065_v53  ;;  %v2883_v47 = vmul.f32 0.2, %v2333_v59  ;;  %vm2497_vm8 = vcmp.ge.f32.partialorder %v1813_v7, 0.0  ;;  %vm2625_vm9 = vcmp.ge.f32.partialorder %v2325_v54, 0.0  ;;  %v1826_v62 = vadd.f32 %v7970_v6, %v7782_v13 }
 0x205   :  { %v2753_v46 = vmul.f32 0.2, %v1813_v7  ;;  %4417 = vst.msk [vmem:[%s8261_s3 + $0x3c0] sm:$0xf] %vm4176_vm1, %v5193_v20  ;;  %v3011_v36 = vsel %vm2499_vm6, %v1821_v23, %v2755_v50  ;;  %v2881_v39 = vmul.f32 0.2, %v2325_v54  ;;  %v2338_v13 = vadd.f32 %v7970_v6, %v7784_v52 }
 0x206   :  { %v5068_v55 = vpack.c.bf16 %v3011_v36, %v3011_v36  ;;  %v3139_v60 = vsel %vm2627_vm7, %v2333_v59, %v2883_v47  ;;  %vm2502_vm10 = vcmp.ge.f32.partialorder %v1834_v3, 0.0  ;;  %v2758_v12 = vmul.f32 0.2, %v1834_v3 }
 0x207   :  { %v3009_v63 = vsel %vm2497_vm8, %v1813_v7, %v2753_v46  ;;  %v5196_v49 = vpack.c.bf16 %v3139_v60, %v3139_v60  ;;  %v3137_v56 = vsel %vm2625_vm9, %v2325_v54, %v2881_v39  ;;  %vm2630_vm11 = vcmp.ge.f32.partialorder %v2346_v8, 0.0 }
 0x208   :  { %v5066_v27 = vpack.c.bf16 %v3009_v63, %v3009_v63  ;;  %4292 = vst.msk [vmem:[%s8261_s3 + $0x1cc] sm:$0xf] %vm4176_vm1, %v5068_v55  ;;  %v5194_v31 = vpack.c.bf16 %v3137_v56, %v3137_v56  ;;  %v2886_v24 = vmul.f32 0.2, %v2346_v8  ;;  %vm2500_vm12 = vcmp.ge.f32.partialorder %v1826_v62, 0.0 }
 0x209   :  { %4420 = vst.msk [vmem:[%s8261_s3 + $0x3cc] sm:$0xf] %vm4176_vm1, %v5196_v49  ;;  %v2756_v10 = vmul.f32 0.2, %v1826_v62  ;;  %v1837_v5 = vadd.f32 %v7970_v6, %v7795_v2  ;;  %v3014_v1 = vsel %vm2502_vm10, %v1834_v3, %v2758_v12  ;;  %v2349_v16 = vadd.f32 %v7970_v6, %v8275_v58 }
 0x20a   :  { %4290 = vst.msk [vmem:[%s8261_s3 + $0x1c4] sm:$0xf] %vm4176_vm1, %v5066_v27  ;;  %4418 = vst.msk [vmem:[%s8261_s3 + $0x3c4] sm:$0xf] %vm4176_vm1, %v5194_v31  ;;  %v3142_v19 = vsel %vm2630_vm11, %v2346_v8, %v2886_v24  ;;  %v1829_v44 = vadd.f32 %v7970_v6, %v8276_v34  ;;  %v5071_v35 = vpack.c.bf16 %v3014_v1, %v3014_v1  ;;  %vm2628_vm13 = vcmp.ge.f32.partialorder %v2338_v13, 0.0 }
 0x20b   :  { %v5199_v57 = vpack.c.bf16 %v3142_v19, %v3142_v19  ;;  %v3012_v25 = vsel %vm2500_vm12, %v1826_v62, %v2756_v10  ;;  %v2884_v22 = vmul.f32 0.2, %v2338_v13  ;;  %vm2503_vm14 = vcmp.ge.f32.partialorder %v1837_v5, 0.0 }
 0x20c   :  { %v5069_v52 = vpack.c.bf16 %v3012_v25, %v3012_v25  ;;  %v2759_v2 = vmul.f32 0.2, %v1837_v5  ;;  %4295 = vst.msk [vmem:[%s8261_s3 + $0x1d8] sm:$0xf] %vm4176_vm1, %v5071_v35  ;;  %vm2631_vm15 = vcmp.ge.f32.partialorder %v2349_v16, 0.0  ;;  %vm2501_vm2 = vcmp.ge.f32.partialorder %v1829_v44, 0.0 }
 0x20d   :  { %4423 = vst.msk [vmem:[%s8261_s3 + $0x3d8] sm:$0xf] %vm4176_vm1, %v5199_v57  ;;  %v2887_v51 = vmul.f32 0.2, %v2349_v16  ;;  %v2757_v29 = vmul.f32 0.2, %v1829_v44  ;;  %v3140_v32 = vsel %vm2628_vm13, %v2338_v13, %v2884_v22  ;;  %v2341_v23 = vadd.f32 %v7970_v6, %v8277_v9 }
 0x20e   :  { %4293 = vst.msk [vmem:[%s8261_s3 + $0x1d0] sm:$0xf] %vm4176_vm1, %v5069_v52  ;;  %v3015_v33 = vsel %vm2503_vm14, %v1837_v5, %v2759_v2  ;;  %v1850_v42 = vadd.f32 %v7970_v6, %v7819_v61  ;;  %v5197_v59 = vpack.c.bf16 %v3140_v32, %v3140_v32  ;;  %v2362_v20 = vadd.f32 %v7970_v6, %v7821_v45 }
 0x20f   :  { %v5072_v53 = vpack.c.bf16 %v3015_v33, %v3015_v33  ;;  %v3143_v43 = vsel %vm2631_vm15, %v2349_v16, %v2887_v51  ;;  %v3013_v17 = vsel %vm2501_vm2, %v1829_v44, %v2757_v29  ;;  %vm2629_vm3 = vcmp.ge.f32.partialorder %v2341_v23, 0.0 }
 0x210   :  { %v5200_v7 = vpack.c.bf16 %v3143_v43, %v3143_v43  ;;  %v5070_v30 = vpack.c.bf16 %v3013_v17, %v3013_v17  ;;  %v2885_v54 = vmul.f32 0.2, %v2341_v23  ;;  %4421 = vst.msk [vmem:[%s8261_s3 + $0x3d0] sm:$0xf] %vm4176_vm1, %v5197_v59  ;;  %vm2506_vm4 = vcmp.ge.f32.partialorder %v1850_v42, 0.0 }
 0x211   :  { %4296 = vst.msk [vmem:[%s8261_s3 + $0x1dc] sm:$0xf] %vm4176_vm1, %v5072_v53  ;;  %v2762_v61 = vmul.f32 0.2, %v1850_v42  ;;  %v1842_v50 = vadd.f32 %v7970_v6, %v7823_v41  ;;  %v2354_v46 = vadd.f32 %v7970_v6, %v7837_v26  ;;  %v1853_v45 = vadd.f32 %v7970_v6, %v7839_v11 }
 0x212   :  { %4424 = vst.msk [vmem:[%s8261_s3 + $0x3dc] sm:$0xf] %vm4176_vm1, %v5200_v7  ;;  %4294 = vst.msk [vmem:[%s8261_s3 + $0x1d4] sm:$0xf] %vm4176_vm1, %v5070_v30  ;;  %v3141_v47 = vsel %vm2629_vm3, %v2341_v23, %v2885_v54  ;;  %v2365_v41 = vadd.f32 %v7970_v6, %v7855_v28  ;;  %vm2634_vm0 = vcmp.ge.f32.partialorder %v2362_v20, 0.0  ;;  %v1845_v31 = vadd.f32 %v7970_v6, %v7857_v21 }
 0x213   :  { %v5198_v36 = vpack.c.bf16 %v3141_v47, %v3141_v47  ;;  %v3018_v39 = vsel %vm2506_vm4, %v1850_v42, %v2762_v61  ;;  %v2890_v3 = vmul.f32 0.2, %v2362_v20  ;;  %vm2504_vm5 = vcmp.ge.f32.partialorder %v1842_v50, 0.0 }
 0x214   :  { %v5075_v8 = vpack.c.bf16 %v3018_v39, %v3018_v39  ;;  %v2760_v55 = vmul.f32 0.2, %v1842_v50  ;;  %vm2632_vm6 = vcmp.ge.f32.partialorder %v2354_v46, 0.0  ;;  %v2888_v60 = vmul.f32 0.2, %v2354_v46 }
 0x215   :  { %4422 = vst.msk [vmem:[%s8261_s3 + $0x3d4] sm:$0xf] %vm4176_vm1, %v5198_v36  ;;  %v3146_v26 = vsel %vm2634_vm0, %v2362_v20, %v2890_v3  ;;  %vm2507_vm7 = vcmp.ge.f32.partialorder %v1853_v45, 0.0  ;;  %v2763_v11 = vmul.f32 0.2, %v1853_v45  ;;  %vm2635_vm8 = vcmp.ge.f32.partialorder %v2365_v41, 0.0 }
 0x216   :  { %4299 = vst.msk [vmem:[%s8261_s3 + $0x1e8] sm:$0xf] %vm4176_vm1, %v5075_v8  ;;  %v5203_v28 = vpack.c.bf16 %v3146_v26, %v3146_v26  ;;  %v3016_v63 = vsel %vm2504_vm5, %v1842_v50, %v2760_v55  ;;  %v2891_v62 = vmul.f32 0.2, %v2365_v41  ;;  %v3144_v27 = vsel %vm2632_vm6, %v2354_v46, %v2888_v60 }
 0x217   :  { %v5073_v49 = vpack.c.bf16 %v3016_v63, %v3016_v63  ;;  %v3019_v56 = vsel %vm2507_vm7, %v1853_v45, %v2763_v11  ;;  %v5201_v12 = vpack.c.bf16 %v3144_v27, %v3144_v27  ;;  %v2357_v13 = vadd.f32 %v7970_v6, %v7859_v18 }
 0x218   :  { %4427 = vst.msk [vmem:[%s8261_s3 + $0x3e8] sm:$0xf] %vm4176_vm1, %v5203_v28  ;;  %v5076_v24 = vpack.c.bf16 %v3019_v56, %v3019_v56  ;;  %v3147_v10 = vsel %vm2635_vm8, %v2365_v41, %v2891_v62  ;;  %vm2505_vm9 = vcmp.ge.f32.partialorder %v1845_v31, 0.0  ;;  %v2761_v1 = vmul.f32 0.2, %v1845_v31 }
 0x219   :  { %4297 = vst.msk [vmem:[%s8261_s3 + $0x1e0] sm:$0xf] %vm4176_vm1, %v5073_v49  ;;  %v5204_v5 = vpack.c.bf16 %v3147_v10, %v3147_v10  ;;  %v1866_v21 = vadd.f32 %v7970_v6, %v7871_v40  ;;  %4425 = vst.msk [vmem:[%s8261_s3 + $0x3e0] sm:$0xf] %vm4176_vm1, %v5201_v12  ;;  %vm2633_vm10 = vcmp.ge.f32.partialorder %v2357_v13, 0.0  ;;  %v2378_v19 = vadd.f32 %v7970_v6, %v7879_v48 }
 0x21a   :  { %4300 = vst.msk [vmem:[%s8261_s3 + $0x1ec] sm:$0xf] %vm4176_vm1, %v5076_v24  ;;  %v2889_v18 = vmul.f32 0.2, %v2357_v13  ;;  %v1858_v58 = vadd.f32 %v7970_v6, %v7881_v15  ;;  %v3017_v40 = vsel %vm2505_vm9, %v1845_v31, %v2761_v1  ;;  %v2370_v34 = vadd.f32 %v7970_v6, %v7889_v14 }
 0x21b   :  { %4428 = vst.msk [vmem:[%s8261_s3 + $0x3ec] sm:$0xf] %vm4176_vm1, %v5204_v5  ;;  %vm2510_vm11 = vcmp.ge.f32.partialorder %v1866_v21, 0.0  ;;  %v2766_v16 = vmul.f32 0.2, %v1866_v21  ;;  %v5074_v44 = vpack.c.bf16 %v3017_v40, %v3017_v40  ;;  %vm2638_vm12 = vcmp.ge.f32.partialorder %v2378_v19, 0.0 }
 0x21c   :  { %v3145_v35 = vsel %vm2633_vm10, %v2357_v13, %v2889_v18  ;;  %v2894_v57 = vmul.f32 0.2, %v2378_v19  ;;  %vm2508_vm13 = vcmp.ge.f32.partialorder %v1858_v58, 0.0  ;;  %v2764_v52 = vmul.f32 0.2, %v1858_v58 }
 0x21d   :  { %v5202_v25 = vpack.c.bf16 %v3145_v35, %v3145_v35  ;;  %v3022_v48 = vsel %vm2510_vm11, %v1866_v21, %v2766_v16  ;;  %4298 = vst.msk [vmem:[%s8261_s3 + $0x1e4] sm:$0xf] %vm4176_vm1, %v5074_v44  ;;  %vm2636_vm14 = vcmp.ge.f32.partialorder %v2370_v34, 0.0  ;;  %v2892_v2 = vmul.f32 0.2, %v2370_v34 }
 0x21e   :  { %v5079_v15 = vpack.c.bf16 %v3022_v48, %v3022_v48  ;;  %v3150_v22 = vsel %vm2638_vm12, %v2378_v19, %v2894_v57  ;;  %v3020_v51 = vsel %vm2508_vm13, %v1858_v58, %v2764_v52  ;;  %v1869_v29 = vadd.f32 %v7970_v6, %v7891_v4 }
 0x21f   :  { %4426 = vst.msk [vmem:[%s8261_s3 + $0x3e4] sm:$0xf] %vm4176_vm1, %v5202_v25  ;;  %v5207_v14 = vpack.c.bf16 %v3150_v22, %v3150_v22  ;;  %v2381_v32 = vadd.f32 %v7970_v6, %v7905_v38  ;;  %v5077_v33 = vpack.c.bf16 %v3020_v51, %v3020_v51  ;;  %v3148_v9 = vsel %vm2636_vm14, %v2370_v34, %v2892_v2 }
 0x220   :  { %4303 = vst.msk [vmem:[%s8261_s3 + $0x1f8] sm:$0xf] %vm4176_vm1, %v5079_v15  ;;  %v1861_v23 = vadd.f32 %v7970_v6, %v7907_v0  ;;  %v2373_v42 = vadd.f32 %v7970_v6, %v7915_v37  ;;  %v5205_v4 = vpack.c.bf16 %v3148_v9, %v3148_v9  ;;  %vm2511_vm15 = vcmp.ge.f32.partialorder %v1869_v29, 0.0 }
 0x221   :  { %4431 = vst.msk [vmem:[%s8261_s3 + $0x3f8] sm:$0xf] %vm4176_vm1, %v5207_v14  ;;  %v2767_v38 = vmul.f32 0.2, %v1869_v29  ;;  %vm2639_vm2 = vcmp.ge.f32.partialorder %v2381_v32, 0.0 }
 0x222   :  { %4301 = vst.msk [vmem:[%s8261_s3 + $0x1f0] sm:$0xf] %vm4176_vm1, %v5077_v33  ;;  %v2895_v59 = vmul.f32 0.2, %v2381_v32  ;;  %vm2509_vm3 = vcmp.ge.f32.partialorder %v1861_v23, 0.0  ;;  %vm2637_vm4 = vcmp.ge.f32.partialorder %v2373_v42, 0.0 }
 0x223   :  { %v2765_v0 = vmul.f32 0.2, %v1861_v23  ;;  %4429 = vst.msk [vmem:[%s8261_s3 + $0x3f0] sm:$0xf] %vm4176_vm1, %v5205_v4  ;;  %v3023_v37 = vsel %vm2511_vm15, %v1869_v29, %v2767_v38  ;;  %v2893_v6 = vmul.f32 0.2, %v2373_v42 }
 0x224   :  { %v5080_v53 = vpack.c.bf16 %v3023_v37, %v3023_v37  ;;  %v3151_v43 = vsel %vm2639_vm2, %v2381_v32, %v2895_v59 }
 0x225   :  { %v3021_v17 = vsel %vm2509_vm3, %v1861_v23, %v2765_v0  ;;  %v5208_v7 = vpack.c.bf16 %v3151_v43, %v3151_v43  ;;  %v3149_v54 = vsel %vm2637_vm4, %v2373_v42, %v2893_v6 }
 0x226   :  { %v5078_v30 = vpack.c.bf16 %v3021_v17, %v3021_v17  ;;  %4304 = vst.msk [vmem:[%s8261_s3 + $0x1fc] sm:$0xf] %vm4176_vm1, %v5080_v53  ;;  %v5206_v61 = vpack.c.bf16 %v3149_v54, %v3149_v54 }
 0x227   :  { %4432 = vst.msk [vmem:[%s8261_s3 + $0x3fc] sm:$0xf] %vm4176_vm1, %v5208_v7 }
 0x228   :  { %4302 = vst.msk [vmem:[%s8261_s3 + $0x1f4] sm:$0xf] %vm4176_vm1, %v5078_v30  ;;  %4430 = vst.msk [vmem:[%s8261_s3 + $0x3f4] sm:$0xf] %vm4176_vm1, %v5206_v61 }

// kernel: discriminator2_mul2_forward.7
= control target key start
LH: loop header
LB: loop body
LE: loop exit
PB: predicated region body
PF: predicated region fallthrough
CT: control target
= control target key end

     0   :  { %vm455_vm2 = vcmask 257024   ;;  %s862_s1 = inlined_call_operand.vmem [shape: bf16[256,32], index: 1, kind: input, shape index: {}]   ;;  %s863_s0 = inlined_call_operand.vmem [shape: bf16[128,256], index: 0, kind: input, shape index: {}]   ;;  %s864_s2 = inlined_call_operand.vmem [shape: f32[1,32], index: 2, kind: input, shape index: {}]   ;;  %s865_s3 = inlined_call_operand.vmem [shape: bf16[128,32], index: 3, kind: output, shape index: {}]  }
   0x1   :  { %v621_v0 = vld [vmem:[%s862_s1 + $0x40] sm:$0xff]   ;;  %v623_v2 = vld [vmem:[%s862_s1 + $0x48] sm:$0xff]   ;;  %v625_v4 = vld [vmem:[%s862_s1 + $0x50] sm:$0xff]  }
   0x2   :  { %v622_v1 = vld [vmem:[%s862_s1] sm:$0xff]   ;;  %541 = vmatprep.subr.bf16.mxu0 %v621_v0  ;;  %605 = vmatprep.subr.bf16.mxu1 %v621_v0  ;;  %v624_v3 = vld [vmem:[%s862_s1 + $0x8] sm:$0xff]   ;;  %v626_v5 = vld [vmem:[%s862_s1 + $0x10] sm:$0xff]  }
   0x3   :  { %542 = vmatpush3.bf16.msra.mxu0 %v622_v1  ;;  %613 = vmatpush3.bf16.msra.mxu1 %v622_v1  ;;  %v627_v6 = vld [vmem:[%s862_s1 + $0x58] sm:$0xff]   ;;  %v629_v8 = vld [vmem:[%s862_s1 + $0x60] sm:$0xff]   ;;  %v631_v10 = vld [vmem:[%s862_s1 + $0x68] sm:$0xff]  }
   0x4   :  { %543 = vmatprep.subr.bf16.mxu0 %v623_v2  ;;  %606 = vmatprep.subr.bf16.mxu1 %v623_v2  ;;  %v628_v7 = vld [vmem:[%s862_s1 + $0x18] sm:$0xff]   ;;  %v630_v9 = vld [vmem:[%s862_s1 + $0x20] sm:$0xff]   ;;  %v632_v13 = vld [vmem:[%s862_s1 + $0x28] sm:$0xff]  }
   0x5   :  { %v639_v11 = vld [vmem:[%s863_s0 + $0x4] ss:$8 sps:$4 sm:$0xff]   ;;  %v633_v14 = vld [vmem:[%s862_s1 + $0x70] sm:$0xff]   ;;  %v635_v16 = vld [vmem:[%s862_s1 + $0x78] sm:$0xff]  }
   0x6   :  { %v642_v12 = vld [vmem:[%s863_s0 + $0x44] ss:$8 sps:$4 sm:$0xff]   ;;  %278 = vmatprep.mubr.bf16.mxu0 %v639_v11  ;;  %v634_v15 = vld [vmem:[%s862_s1 + $0x30] sm:$0xff]   ;;  %v636_v17 = vld [vmem:[%s862_s1 + $0x38] sm:$0xff]  }
   0x7   :  { %544 = vmatpush3.bf16.msra.mxu0 %v624_v3  ;;  %614 = vmatpush3.bf16.msra.mxu1 %v624_v3  ;;  %v637_v18 = vld [vmem:[%s863_s0] ss:$8 sps:$4 sm:$0xff]   ;;  %v643_v20 = vld [vmem:[%s863_s0 + $0x14] ss:$8 sps:$4 sm:$0xff]   ;;  %v647_v22 = vld [vmem:[%s863_s0 + $0x10] ss:$8 sps:$4 sm:$0xff]  }
   0x8   :  { %545 = vmatprep.subr.bf16.mxu0 %v625_v4  ;;  %607 = vmatprep.subr.bf16.mxu1 %v625_v4  ;;  %v640_v19 = vld [vmem:[%s863_s0 + $0x40] ss:$8 sps:$4 sm:$0xff]   ;;  %v645_v21 = vld [vmem:[%s863_s0 + $0x54] ss:$8 sps:$4 sm:$0xff]   ;;  %v648_v23 = vld [vmem:[%s863_s0 + $0x50] ss:$8 sps:$4 sm:$0xff]  }
   0x9   :  { %310 = vmatprep.mubr.bf16.mxu1 %v642_v12  ;;  %v649_v24 = vld [vmem:[%s863_s0 + $0x24] ss:$8 sps:$4 sm:$0xff]   ;;  %v653_v26 = vld [vmem:[%s863_s0 + $0x20] ss:$8 sps:$4 sm:$0xff]   ;;  %v655_v28 = vld [vmem:[%s863_s0 + $0x34] ss:$8 sps:$4 sm:$0xff]  }
   0xa   :  { %v651_v25 = vld [vmem:[%s863_s0 + $0x64] ss:$8 sps:$4 sm:$0xff]   ;;  %v654_v27 = vld [vmem:[%s863_s0 + $0x60] ss:$8 sps:$4 sm:$0xff]   ;;  %v657_v29 = vld [vmem:[%s863_s0 + $0x74] ss:$8 sps:$4 sm:$0xff]  }
   0xb   :  { %546 = vmatpush3.bf16.msra.mxu0 %v626_v5  ;;  %615 = vmatpush3.bf16.msra.mxu1 %v626_v5  ;;  %v659_v30 = vld [vmem:[%s863_s0 + $0x30] ss:$8 sps:$4 sm:$0xff]   ;;  %v780_v34 = vld [vmem:[%s864_s2] ss:$0 sm:$0xff] }
   0xc   :  { %547 = vmatprep.subr.bf16.mxu0 %v627_v6  ;;  %608 = vmatprep.subr.bf16.mxu1 %v627_v6  ;;  %v660_v31 = vld [vmem:[%s863_s0 + $0x70] ss:$8 sps:$4 sm:$0xff]  }
   0xf   :  { %548 = vmatpush3.bf16.msra.mxu0 %v628_v7  ;;  %616 = vmatpush3.bf16.msra.mxu1 %v628_v7 }
  0x10   :  { %549 = vmatprep.subr.bf16.mxu0 %v629_v8  ;;  %609 = vmatprep.subr.bf16.mxu1 %v629_v8 }
  0x13   :  { %550 = vmatpush3.bf16.msra.mxu0 %v630_v9  ;;  %617 = vmatpush3.bf16.msra.mxu1 %v630_v9 }
  0x14   :  { %551 = vmatprep.subr.bf16.mxu0 %v631_v10  ;;  %610 = vmatprep.subr.bf16.mxu1 %v631_v10 }
  0x17   :  { %552 = vmatpush3.bf16.msra.mxu0 %v632_v13  ;;  %618 = vmatpush3.bf16.msra.mxu1 %v632_v13 }
  0x18   :  { %553 = vmatprep.subr.bf16.mxu0 %v633_v14  ;;  %611 = vmatprep.subr.bf16.mxu1 %v633_v14 }
  0x1b   :  { %554 = vmatpush3.bf16.msra.mxu0 %v634_v15  ;;  %619 = vmatpush3.bf16.msra.mxu1 %v634_v15 }
  0x1c   :  { %555 = vmatprep.subr.bf16.mxu0 %v635_v16  ;;  %612 = vmatprep.subr.bf16.mxu1 %v635_v16 }
  0x1f   :  { %556 = vmatpush3.bf16.msra.mxu0 %v636_v17  ;;  %620 = vmatpush3.bf16.msra.mxu1 %v636_v17 }
  0x22   :  { %279 = vmatmul.mubr.bf16.vlgmr.msra.gmra.mrb[0].mxu0 %v637_v18  ;;  %311 = vmatmul.mubr.bf16.vlgmr.msra.gmra.mrb[0].mxu1 %v640_v19 }
  0x23   :  { %286 = vmatprep.mubr.bf16.mxu0 %v643_v20  ;;  %318 = vmatprep.mubr.bf16.mxu1 %v645_v21 }
  0x2a   :  { %287 = vmatmul.mubr.bf16.gmra.mrb[4].mxu0 %v647_v22  ;;  %319 = vmatmul.mubr.bf16.gmra.mrb[4].mxu1 %v648_v23 }
  0x2b   :  { %294 = vmatprep.mubr.bf16.mxu0 %v649_v24  ;;  %326 = vmatprep.mubr.bf16.mxu1 %v651_v25 }
  0x32   :  { %295 = vmatmul.mubr.bf16.gmra.mrb[8].mxu0 %v653_v26  ;;  %327 = vmatmul.mubr.bf16.gmra.mrb[8].mxu1 %v654_v27 }
  0x33   :  { %302 = vmatprep.mubr.bf16.mxu0 %v655_v28  ;;  %334 = vmatprep.mubr.bf16.mxu1 %v657_v29 }
  0x3a   :  { %303 = vmatmul.mubr.bf16.gmra.mrb[12].mxu0 %v659_v30  ;;  %335 = vmatmul.mubr.bf16.gmra.mrb[12].mxu1 %v660_v31 }
  0xf5   :  { %v557_v32 = vpop.f32.mrb[0].mxu0  ;;  %v581_v33 = vpop.f32.mrb[0].mxu1 }
  0xf6   :  { %v558_v35 = vpop.f32.mrb[1].mxu0  ;;  %v582_v36 = vpop.f32.mrb[1].mxu1 }
  0xf7   :  { %v559_v37 = vadd.f32 %v558_v35, %v557_v32  ;;  %v583_v38 = vadd.f32 %v582_v36, %v581_v33  ;;  %v560_v39 = vpop.f32.mrb[2].mxu0  ;;  %v584_v40 = vpop.f32.mrb[2].mxu1 }
  0xf8   :  { %v561_v41 = vpop.f32.mrb[3].mxu0  ;;  %v585_v42 = vpop.f32.mrb[3].mxu1 }
  0xf9   :  { %v281_v43 = vadd.f32 %v559_v37, %v780_v34  ;;  %v313_v44 = vadd.f32 %v583_v38, %v780_v34  ;;  %v562_v45 = vadd.f32 %v561_v41, %v560_v39  ;;  %v586_v46 = vadd.f32 %v585_v42, %v584_v40 }
  0xfb   :  { %vm343_vm0 = vcmp.ge.f32.partialorder %v281_v43, 0.0  ;;  %v359_v47 = vmul.f32 0.2, %v281_v43  ;;  %vm351_vm1 = vcmp.ge.f32.partialorder %v313_v44, 0.0  ;;  %v367_v48 = vmul.f32 0.2, %v313_v44 }
  0xfc   :  { %v284_v49 = vadd.f32 %v562_v45, %v780_v34  ;;  %v316_v50 = vadd.f32 %v586_v46, %v780_v34 }
  0xfd   :  { %v375_v51 = vsel %vm343_vm0, %v281_v43, %v359_v47  ;;  %v383_v52 = vsel %vm351_vm1, %v313_v44, %v367_v48  ;;  %v563_v53 = vpop.f32.mrb[4].mxu0  ;;  %v587_v54 = vpop.f32.mrb[4].mxu1 }
  0xfe   :  { %v525_v55 = vpack.c.bf16 %v375_v51, %v375_v51  ;;  %v533_v56 = vpack.c.bf16 %v383_v52, %v383_v52  ;;  %vm344_vm3 = vcmp.ge.f32.partialorder %v284_v49, 0.0  ;;  %v360_v57 = vmul.f32 0.2, %v284_v49  ;;  %v564_v58 = vpop.f32.mrb[5].mxu0  ;;  %v588_v59 = vpop.f32.mrb[5].mxu1 }
  0xff   :  { %vm352_vm4 = vcmp.ge.f32.partialorder %v316_v50, 0.0  ;;  %v368_v60 = vmul.f32 0.2, %v316_v50  ;;  %v565_v61 = vadd.f32 %v564_v58, %v563_v53  ;;  %v589_v62 = vadd.f32 %v588_v59, %v587_v54  ;;  %v566_v63 = vpop.f32.mrb[6].mxu0  ;;  %v590_v0 = vpop.f32.mrb[6].mxu1 }
 0x100   :  { %456 = vst.msk [vmem:[%s865_s3] sm:$0xf] %vm455_vm2, %v525_v55  ;;  %464 = vst.msk [vmem:[%s865_s3 + $0x20] sm:$0xf] %vm455_vm2, %v533_v56  ;;  %v376_v1 = vsel %vm344_vm3, %v284_v49, %v360_v57  ;;  %v567_v2 = vpop.f32.mrb[7].mxu0  ;;  %v591_v3 = vpop.f32.mrb[7].mxu1 }
 0x101   :  { %v526_v4 = vpack.c.bf16 %v376_v1, %v376_v1  ;;  %v384_v5 = vsel %vm352_vm4, %v316_v50, %v368_v60  ;;  %v289_v6 = vadd.f32 %v565_v61, %v780_v34  ;;  %v321_v7 = vadd.f32 %v589_v62, %v780_v34 }
 0x102   :  { %v534_v8 = vpack.c.bf16 %v384_v5, %v384_v5  ;;  %v568_v9 = vadd.f32 %v567_v2, %v566_v63  ;;  %v592_v10 = vadd.f32 %v591_v3, %v590_v0 }
 0x103   :  { %457 = vst.msk [vmem:[%s865_s3 + $0x4] sm:$0xf] %vm455_vm2, %v526_v4  ;;  %vm345_vm5 = vcmp.ge.f32.partialorder %v289_v6, 0.0  ;;  %v361_v11 = vmul.f32 0.2, %v289_v6  ;;  %vm353_vm6 = vcmp.ge.f32.partialorder %v321_v7, 0.0 }
 0x104   :  { %v369_v12 = vmul.f32 0.2, %v321_v7  ;;  %465 = vst.msk [vmem:[%s865_s3 + $0x24] sm:$0xf] %vm455_vm2, %v534_v8  ;;  %v292_v13 = vadd.f32 %v568_v9, %v780_v34  ;;  %v324_v14 = vadd.f32 %v592_v10, %v780_v34 }
 0x105   :  { %v377_v15 = vsel %vm345_vm5, %v289_v6, %v361_v11  ;;  %v569_v17 = vpop.f32.mrb[8].mxu0  ;;  %v593_v18 = vpop.f32.mrb[8].mxu1 }
 0x106   :  { %v385_v16 = vsel %vm353_vm6, %v321_v7, %v369_v12  ;;  %v527_v19 = vpack.c.bf16 %v377_v15, %v377_v15  ;;  %vm346_vm7 = vcmp.ge.f32.partialorder %v292_v13, 0.0  ;;  %v362_v21 = vmul.f32 0.2, %v292_v13  ;;  %v570_v22 = vpop.f32.mrb[9].mxu0  ;;  %v594_v23 = vpop.f32.mrb[9].mxu1 }
 0x107   :  { %v535_v20 = vpack.c.bf16 %v385_v16, %v385_v16  ;;  %vm354_vm8 = vcmp.ge.f32.partialorder %v324_v14, 0.0  ;;  %v370_v24 = vmul.f32 0.2, %v324_v14  ;;  %v571_v25 = vadd.f32 %v570_v22, %v569_v17  ;;  %v572_v27 = vpop.f32.mrb[10].mxu0  ;;  %v596_v28 = vpop.f32.mrb[10].mxu1 }
 0x108   :  { %v595_v26 = vadd.f32 %v594_v23, %v593_v18  ;;  %458 = vst.msk [vmem:[%s865_s3 + $0x8] sm:$0xf] %vm455_vm2, %v527_v19  ;;  %v378_v29 = vsel %vm346_vm7, %v292_v13, %v362_v21  ;;  %v573_v30 = vpop.f32.mrb[11].mxu0  ;;  %v597_v31 = vpop.f32.mrb[11].mxu1 }
 0x109   :  { %466 = vst.msk [vmem:[%s865_s3 + $0x28] sm:$0xf] %vm455_vm2, %v535_v20  ;;  %v528_v32 = vpack.c.bf16 %v378_v29, %v378_v29  ;;  %v386_v33 = vsel %vm354_vm8, %v324_v14, %v370_v24  ;;  %v297_v35 = vadd.f32 %v571_v25, %v780_v34  ;;  %v574_v38 = vadd.f32 %v573_v30, %v572_v27 }
 0x10a   :  { %v329_v36 = vadd.f32 %v595_v26, %v780_v34  ;;  %v536_v37 = vpack.c.bf16 %v386_v33, %v386_v33  ;;  %v598_v39 = vadd.f32 %v597_v31, %v596_v28 }
 0x10b   :  { %459 = vst.msk [vmem:[%s865_s3 + $0xc] sm:$0xf] %vm455_vm2, %v528_v32  ;;  %vm347_vm9 = vcmp.ge.f32.partialorder %v297_v35, 0.0  ;;  %v363_v40 = vmul.f32 0.2, %v297_v35  ;;  %v300_v42 = vadd.f32 %v574_v38, %v780_v34 }
 0x10c   :  { %vm355_vm10 = vcmp.ge.f32.partialorder %v329_v36, 0.0  ;;  %v371_v41 = vmul.f32 0.2, %v329_v36  ;;  %467 = vst.msk [vmem:[%s865_s3 + $0x2c] sm:$0xf] %vm455_vm2, %v536_v37  ;;  %v332_v43 = vadd.f32 %v598_v39, %v780_v34 }
 0x10d   :  { %v379_v44 = vsel %vm347_vm9, %v297_v35, %v363_v40  ;;  %v575_v46 = vpop.f32.mrb[12].mxu0  ;;  %v599_v47 = vpop.f32.mrb[12].mxu1  ;;  %vm348_vm11 = vcmp.ge.f32.partialorder %v300_v42, 0.0  ;;  %v364_v50 = vmul.f32 0.2, %v300_v42 }
 0x10e   :  { %v387_v45 = vsel %vm355_vm10, %v329_v36, %v371_v41  ;;  %v529_v48 = vpack.c.bf16 %v379_v44, %v379_v44  ;;  %v576_v51 = vpop.f32.mrb[13].mxu0  ;;  %v600_v52 = vpop.f32.mrb[13].mxu1  ;;  %vm356_vm12 = vcmp.ge.f32.partialorder %v332_v43, 0.0  ;;  %v372_v53 = vmul.f32 0.2, %v332_v43 }
 0x10f   :  { %v537_v49 = vpack.c.bf16 %v387_v45, %v387_v45  ;;  %v577_v54 = vadd.f32 %v576_v51, %v575_v46  ;;  %v601_v55 = vadd.f32 %v600_v52, %v599_v47  ;;  %v578_v56 = vpop.f32.mrb[14].mxu0  ;;  %v602_v57 = vpop.f32.mrb[14].mxu1  ;;  %v380_v58 = vsel %vm348_vm11, %v300_v42, %v364_v50 }
 0x110   :  { %460 = vst.msk [vmem:[%s865_s3 + $0x10] sm:$0xf] %vm455_vm2, %v529_v48  ;;  %v579_v59 = vpop.f32.mrb[15].mxu0  ;;  %v603_v60 = vpop.f32.mrb[15].mxu1  ;;  %v530_v61 = vpack.c.bf16 %v380_v58, %v380_v58  ;;  %v388_v62 = vsel %vm356_vm12, %v332_v43, %v372_v53 }
 0x111   :  { %468 = vst.msk [vmem:[%s865_s3 + $0x30] sm:$0xf] %vm455_vm2, %v537_v49  ;;  %v305_v63 = vadd.f32 %v577_v54, %v780_v34  ;;  %v337_v0 = vadd.f32 %v601_v55, %v780_v34  ;;  %v538_v1 = vpack.c.bf16 %v388_v62, %v388_v62  ;;  %v580_v2 = vadd.f32 %v579_v59, %v578_v56 }
 0x112   :  { %v604_v3 = vadd.f32 %v603_v60, %v602_v57  ;;  %461 = vst.msk [vmem:[%s865_s3 + $0x14] sm:$0xf] %vm455_vm2, %v530_v61 }
 0x113   :  { %vm349_vm13 = vcmp.ge.f32.partialorder %v305_v63, 0.0  ;;  %v365_v4 = vmul.f32 0.2, %v305_v63  ;;  %vm357_vm14 = vcmp.ge.f32.partialorder %v337_v0, 0.0  ;;  %v373_v5 = vmul.f32 0.2, %v337_v0 }
 0x114   :  { %469 = vst.msk [vmem:[%s865_s3 + $0x34] sm:$0xf] %vm455_vm2, %v538_v1  ;;  %v308_v6 = vadd.f32 %v580_v2, %v780_v34  ;;  %v340_v7 = vadd.f32 %v604_v3, %v780_v34 }
 0x115   :  { %v381_v8 = vsel %vm349_vm13, %v305_v63, %v365_v4  ;;  %v389_v9 = vsel %vm357_vm14, %v337_v0, %v373_v5 }
 0x116   :  { %v531_v10 = vpack.c.bf16 %v381_v8, %v381_v8  ;;  %v539_v11 = vpack.c.bf16 %v389_v9, %v389_v9  ;;  %vm350_vm15 = vcmp.ge.f32.partialorder %v308_v6, 0.0  ;;  %v366_v12 = vmul.f32 0.2, %v308_v6 }
 0x117   :  { %vm358_vm0 = vcmp.ge.f32.partialorder %v340_v7, 0.0  ;;  %v374_v13 = vmul.f32 0.2, %v340_v7 }
 0x118   :  { %462 = vst.msk [vmem:[%s865_s3 + $0x18] sm:$0xf] %vm455_vm2, %v531_v10  ;;  %470 = vst.msk [vmem:[%s865_s3 + $0x38] sm:$0xf] %vm455_vm2, %v539_v11  ;;  %v382_v14 = vsel %vm350_vm15, %v308_v6, %v366_v12 }
 0x119   :  { %v532_v34 = vpack.c.bf16 %v382_v14, %v382_v14  ;;  %v390_v15 = vsel %vm358_vm0, %v340_v7, %v374_v13 }
 0x11a   :  { %v540_v16 = vpack.c.bf16 %v390_v15, %v390_v15 }
 0x11b   :  { %463 = vst.msk [vmem:[%s865_s3 + $0x1c] sm:$0xf] %vm455_vm2, %v532_v34 }
 0x11c   :  { %471 = vst.msk [vmem:[%s865_s3 + $0x3c] sm:$0xf] %vm455_vm2, %v540_v16 }

// kernel: discriminator2_mul2_forward.8
= control target key start
LH: loop header
LB: loop body
LE: loop exit
PB: predicated region body
PF: predicated region fallthrough
CT: control target
= control target key end

     0   :  { %vm452_vm1 = vcmask 519168   ;;  %s769_s1 = inlined_call_operand.vmem [shape: bf16[512,64], index: 1, kind: input, shape index: {}]   ;;  %s770_s0 = inlined_call_operand.vmem [shape: bf16[32,512], index: 0, kind: input, shape index: {}]   ;;  %s771_s2 = inlined_call_operand.vmem [shape: f32[1,64], index: 2, kind: input, shape index: {}]   ;;  %s772_s3 = inlined_call_operand.vmem [shape: bf16[32,64], index: 3, kind: output, shape index: {}]  }
   0x1   :  { %v566_v0 = vld [vmem:[%s769_s1 + $0x40] sm:$0xff]   ;;  %v570_v4 = vld [vmem:[%s769_s1 + $0x48] sm:$0xff]   ;;  %v574_v8 = vld [vmem:[%s769_s1 + $0x50] sm:$0xff]  }
   0x2   :  { %v567_v1 = vld [vmem:[%s769_s1 + $0xc0] sm:$0xff]   ;;  %510 = vmatprep.subr.bf16.mxu0 %v566_v0  ;;  %v571_v5 = vld [vmem:[%s769_s1 + $0xc8] sm:$0xff]   ;;  %v575_v9 = vld [vmem:[%s769_s1 + $0xd0] sm:$0xff]  }
   0x3   :  { %v568_v2 = vld [vmem:[%s769_s1] sm:$0xff]   ;;  %538 = vmatprep.subr.bf16.mxu1 %v567_v1  ;;  %v572_v6 = vld [vmem:[%s769_s1 + $0x8] sm:$0xff]   ;;  %v576_v10 = vld [vmem:[%s769_s1 + $0x10] sm:$0xff]  }
   0x4   :  { %v569_v3 = vld [vmem:[%s769_s1 + $0x80] sm:$0xff]   ;;  %511 = vmatpush3.bf16.msra.mxu0 %v568_v2  ;;  %v573_v7 = vld [vmem:[%s769_s1 + $0x88] sm:$0xff]   ;;  %v577_v11 = vld [vmem:[%s769_s1 + $0x90] sm:$0xff]  }
   0x5   :  { %539 = vmatpush3.bf16.msra.mxu1 %v569_v3  ;;  %512 = vmatprep.subr.bf16.mxu0 %v570_v4  ;;  %v578_v12 = vld [vmem:[%s769_s1 + $0x58] sm:$0xff]   ;;  %v582_v16 = vld [vmem:[%s769_s1 + $0x60] sm:$0xff]   ;;  %v586_v20 = vld [vmem:[%s769_s1 + $0x68] sm:$0xff]  }
   0x6   :  { %540 = vmatprep.subr.bf16.mxu1 %v571_v5  ;;  %v579_v13 = vld [vmem:[%s769_s1 + $0xd8] sm:$0xff]   ;;  %v583_v17 = vld [vmem:[%s769_s1 + $0xe0] sm:$0xff]   ;;  %v587_v21 = vld [vmem:[%s769_s1 + $0xe8] sm:$0xff]  }
   0x7   :  { %v580_v14 = vld [vmem:[%s769_s1 + $0x18] sm:$0xff]   ;;  %v584_v18 = vld [vmem:[%s769_s1 + $0x20] sm:$0xff]   ;;  %v588_v22 = vld [vmem:[%s769_s1 + $0x28] sm:$0xff]  }
   0x8   :  { %513 = vmatpush3.bf16.msra.mxu0 %v572_v6  ;;  %v581_v15 = vld [vmem:[%s769_s1 + $0x98] sm:$0xff]   ;;  %v585_v19 = vld [vmem:[%s769_s1 + $0xa0] sm:$0xff]   ;;  %v589_v23 = vld [vmem:[%s769_s1 + $0xa8] sm:$0xff]  }
   0x9   :  { %541 = vmatpush3.bf16.msra.mxu1 %v573_v7  ;;  %514 = vmatprep.subr.bf16.mxu0 %v574_v8  ;;  %v590_v24 = vld [vmem:[%s769_s1 + $0x70] sm:$0xff]   ;;  %v594_v28 = vld [vmem:[%s769_s1 + $0x78] sm:$0xff]   ;;  %v461_v42 = vld [vmem:[%s771_s2] ss:$0 sm:$0xff] }
   0xa   :  { %542 = vmatprep.subr.bf16.mxu1 %v575_v9  ;;  %v591_v25 = vld [vmem:[%s769_s1 + $0xf0] sm:$0xff]   ;;  %v595_v29 = vld [vmem:[%s769_s1 + $0xf8] sm:$0xff]  }
   0xb   :  { %v592_v26 = vld [vmem:[%s769_s1 + $0x30] sm:$0xff]   ;;  %v596_v30 = vld [vmem:[%s769_s1 + $0x38] sm:$0xff]  }
   0xc   :  { %515 = vmatpush3.bf16.msra.mxu0 %v576_v10  ;;  %v593_v27 = vld [vmem:[%s769_s1 + $0xb0] sm:$0xff]   ;;  %v597_v31 = vld [vmem:[%s769_s1 + $0xb8] sm:$0xff]  }
   0xd   :  { %543 = vmatpush3.bf16.msra.mxu1 %v577_v11  ;;  %516 = vmatprep.subr.bf16.mxu0 %v578_v12  ;;  %v598_v32 = vld [vmem:[%s770_s0] ss:$16 sps:$4 sm:$0xff]   ;;  %v600_v33 = vld [vmem:[%s770_s0 + $0x4] ss:$16 sps:$4 sm:$0xff]   ;;  %v601_v34 = vld [vmem:[%s770_s0 + $0x8] ss:$16 sps:$4 sm:$0xff]  }
   0xe   :  { %544 = vmatprep.subr.bf16.mxu1 %v579_v13  ;;  %v603_v35 = vld [vmem:[%s770_s0 + $0xc] ss:$16 sps:$4 sm:$0xff]   ;;  %358 = vmatprep.mubr.bf16.mxu0 %v600_v33  ;;  %v604_v36 = vld [vmem:[%s770_s0 + $0x24] ss:$16 sps:$4 sm:$0xff]   ;;  %v608_v38 = vld [vmem:[%s770_s0 + $0x20] ss:$16 sps:$4 sm:$0xff]  }
   0xf   :  { %407 = vmatprep.mubr.bf16.mxu1 %v603_v35  ;;  %v606_v37 = vld [vmem:[%s770_s0 + $0x2c] ss:$16 sps:$4 sm:$0xff]   ;;  %v609_v39 = vld [vmem:[%s770_s0 + $0x28] ss:$16 sps:$4 sm:$0xff]  }
  0x10   :  { %517 = vmatpush3.bf16.msra.mxu0 %v580_v14 }
  0x11   :  { %545 = vmatpush3.bf16.msra.mxu1 %v581_v15  ;;  %518 = vmatprep.subr.bf16.mxu0 %v582_v16 }
  0x12   :  { %546 = vmatprep.subr.bf16.mxu1 %v583_v17 }
  0x14   :  { %519 = vmatpush3.bf16.msra.mxu0 %v584_v18 }
  0x15   :  { %547 = vmatpush3.bf16.msra.mxu1 %v585_v19  ;;  %520 = vmatprep.subr.bf16.mxu0 %v586_v20 }
  0x16   :  { %548 = vmatprep.subr.bf16.mxu1 %v587_v21 }
  0x18   :  { %521 = vmatpush3.bf16.msra.mxu0 %v588_v22 }
  0x19   :  { %549 = vmatpush3.bf16.msra.mxu1 %v589_v23  ;;  %522 = vmatprep.subr.bf16.mxu0 %v590_v24 }
  0x1a   :  { %550 = vmatprep.subr.bf16.mxu1 %v591_v25 }
  0x1c   :  { %523 = vmatpush3.bf16.msra.mxu0 %v592_v26 }
  0x1d   :  { %551 = vmatpush3.bf16.msra.mxu1 %v593_v27  ;;  %524 = vmatprep.subr.bf16.mxu0 %v594_v28 }
  0x1e   :  { %552 = vmatprep.subr.bf16.mxu1 %v595_v29 }
  0x20   :  { %525 = vmatpush3.bf16.msra.mxu0 %v596_v30 }
  0x21   :  { %553 = vmatpush3.bf16.msra.mxu1 %v597_v31 }
  0x23   :  { %359 = vmatmul.mubr.bf16.vlgmr.msra.gmra.mrb[0].mxu0 %v598_v32 }
  0x24   :  { %408 = vmatmul.mubr.bf16.vlgmr.msra.gmra.mrb[0].mxu1 %v601_v34  ;;  %366 = vmatprep.mubr.bf16.mxu0 %v604_v36 }
  0x25   :  { %415 = vmatprep.mubr.bf16.mxu1 %v606_v37 }
  0x2b   :  { %367 = vmatmul.mubr.bf16.gmra.mrb[4].mxu0 %v608_v38 }
  0x2c   :  { %416 = vmatmul.mubr.bf16.gmra.mrb[4].mxu1 %v609_v39 }
  0xf6   :  { %v526_v40 = vpop.f32.mrb[0].mxu0 }
  0xf7   :  { %v554_v41 = vpop.f32.mrb[0].mxu1  ;;  %v527_v43 = vpop.f32.mrb[1].mxu0 }
  0xf8   :  { %v528_v44 = vadd.f32 %v527_v43, %v526_v40  ;;  %v555_v45 = vpop.f32.mrb[1].mxu1  ;;  %v529_v46 = vpop.f32.mrb[2].mxu0 }
  0xf9   :  { %v556_v47 = vadd.f32 %v555_v45, %v554_v41  ;;  %v557_v48 = vpop.f32.mrb[2].mxu1  ;;  %v530_v49 = vpop.f32.mrb[3].mxu0 }
  0xfa   :  { %v361_v50 = vadd.f32 %v528_v44, %v461_v42  ;;  %v531_v51 = vadd.f32 %v530_v49, %v529_v46  ;;  %v558_v52 = vpop.f32.mrb[3].mxu1 }
  0xfb   :  { %v559_v53 = vadd.f32 %v558_v52, %v557_v48 }
  0xfc   :  { %v410_v54 = vadd.f32 %v556_v47, %v361_v50  ;;  %v364_v55 = vadd.f32 %v531_v51, %v461_v42 }
  0xfe   :  { %vm424_vm0 = vcmp.ge.f32.partialorder %v410_v54, 0.0  ;;  %v428_v56 = vmul.f32 0.2, %v410_v54  ;;  %v413_v57 = vadd.f32 %v559_v53, %v364_v55  ;;  %v532_v58 = vpop.f32.mrb[4].mxu0 }
  0xff   :  { %v560_v59 = vpop.f32.mrb[4].mxu1  ;;  %v533_v60 = vpop.f32.mrb[5].mxu0 }
 0x100   :  { %v432_v61 = vsel %vm424_vm0, %v410_v54, %v428_v56  ;;  %vm425_vm2 = vcmp.ge.f32.partialorder %v413_v57, 0.0  ;;  %v429_v62 = vmul.f32 0.2, %v413_v57  ;;  %v534_v63 = vadd.f32 %v533_v60, %v532_v58  ;;  %v561_v0 = vpop.f32.mrb[5].mxu1  ;;  %v535_v1 = vpop.f32.mrb[6].mxu0 }
 0x101   :  { %v506_v2 = vpack.c.bf16 %v432_v61, %v432_v61  ;;  %v562_v3 = vadd.f32 %v561_v0, %v560_v59  ;;  %v563_v4 = vpop.f32.mrb[6].mxu1  ;;  %v536_v5 = vpop.f32.mrb[7].mxu0 }
 0x102   :  { %v433_v6 = vsel %vm425_vm2, %v413_v57, %v429_v62  ;;  %v369_v7 = vadd.f32 %v534_v63, %v461_v42  ;;  %v537_v8 = vadd.f32 %v536_v5, %v535_v1  ;;  %v564_v9 = vpop.f32.mrb[7].mxu1 }
 0x103   :  { %453 = vst.msk [vmem:[%s772_s3] sm:$0xf] %vm452_vm1, %v506_v2  ;;  %v507_v10 = vpack.c.bf16 %v433_v6, %v433_v6  ;;  %v565_v11 = vadd.f32 %v564_v9, %v563_v4 }
 0x104   :  { %v418_v12 = vadd.f32 %v562_v3, %v369_v7  ;;  %v372_v13 = vadd.f32 %v537_v8, %v461_v42 }
 0x105   :  { %454 = vst.msk [vmem:[%s772_s3 + $0x4] sm:$0xf] %vm452_vm1, %v507_v10 }
 0x106   :  { %vm426_vm3 = vcmp.ge.f32.partialorder %v418_v12, 0.0  ;;  %v430_v14 = vmul.f32 0.2, %v418_v12  ;;  %v421_v15 = vadd.f32 %v565_v11, %v372_v13 }
 0x108   :  { %v434_v16 = vsel %vm426_vm3, %v418_v12, %v430_v14  ;;  %vm427_vm4 = vcmp.ge.f32.partialorder %v421_v15, 0.0  ;;  %v431_v17 = vmul.f32 0.2, %v421_v15 }
 0x109   :  { %v508_v18 = vpack.c.bf16 %v434_v16, %v434_v16 }
 0x10a   :  { %v435_v19 = vsel %vm427_vm4, %v421_v15, %v431_v17 }
 0x10b   :  { %455 = vst.msk [vmem:[%s772_s3 + $0x8] sm:$0xf] %vm452_vm1, %v508_v18  ;;  %v509_v20 = vpack.c.bf16 %v435_v19, %v435_v19 }
 0x10d   :  { %456 = vst.msk [vmem:[%s772_s3 + $0xc] sm:$0xf] %vm452_vm1, %v509_v20 }

// kernel: discriminator2_mul2_forward.9
= control target key start
LH: loop header
LB: loop body
LE: loop exit
PB: predicated region body
PF: predicated region fallthrough
CT: control target
= control target key end

     0   :  { %s1325_s20 = smov 0   ;;  %s1561_s0 = inlined_call_operand.vmem [shape: bf16[2,9,1024], index: 0, kind: input, shape index: {}]   ;;  %s1562_s1 = inlined_call_operand.vmem [shape: bf16[1024,64], index: 1, kind: input, shape index: {}]   ;;  %s1563_s2 = inlined_call_operand.vmem [shape: f32[1,64], index: 2, kind: input, shape index: {}]   ;;  %s1564_s3 = inlined_call_operand.vmem [shape: f32[9,64], index: 3, kind: input, shape index: {}]   ;;  %s1565_s4 = inlined_call_operand.<no memory space> [shape: f32[1,1], index: 4, kind: input, shape index: {}]   ;;  %s1566_s5 = inlined_call_operand.vmem [shape: f32[2,1,1], index: 5, kind: output, shape index: {}]  }
   0x1   :  { %v10_v0 = vstv %s1565_s4 }
   0x2   :  { %11 = vst [vmem:[#allocation2] sm:$0x1] %v10_v0 }
   0x3 LB: > { %s1036_s21 = sadd.s32 4294967295, %s1290_s20   ;;  %p1040_p0 = scmp.ge.s32.totalorder %s1290_s20, 1  ;;  %s1290_s20 = sphi %s1325_s20, %s17_s20  }
   0x4   : > { %p189_p1 = scmp.lt.s32.totalorder %s1290_s20, 3 }
   0x6   : > { %p190_p2 = pnand %p1040_p0, %p189_p1 }
   0x7   : > { %v1216_v1 = vld [vmem:[%s1562_s1 + $0x40] sm:$0xff] (!%p190_p2)   ;;  %v1220_v5 = vld [vmem:[%s1562_s1 + $0x48] sm:$0xff] (!%p190_p2)   ;;  %v1224_v9 = vld [vmem:[%s1562_s1 + $0x50] sm:$0xff] (!%p190_p2)   ;;  %p215_p3 = scmp.lt.s32.totalorder (!%p190_p2), %s1036_s21, 1  ;;  %vm965_vm2 = vcmask (!%p190_p2), 523264   ;;  %vm967_vm3 = vcmask (!%p190_p2), 516096  }
   0x8   : > { %193 = sbr.rel (%p190_p2) target bundleno = 486 (0x1e6), region = 40  ;;  %v1217_v2 = vld [vmem:[%s1562_s1 + $0xc0] sm:$0xff] (!%p190_p2)   ;;  %1120 = vmatprep.subr.bf16.mxu0 (!%p190_p2), %v1216_v1  ;;  %v1221_v6 = vld [vmem:[%s1562_s1 + $0xc8] sm:$0xff] (!%p190_p2)   ;;  %v1225_v10 = vld [vmem:[%s1562_s1 + $0xd0] sm:$0xff] (!%p190_p2)   ;;  %vm987_vm4 = vcmask (!%p190_p2), 0  }
   0x9   : > { %v1218_v3 = vld [vmem:[%s1562_s1] sm:$0xff] (!%p190_p2)   ;;  %1142 = vmatprep.subr.bf16.mxu1 (!%p190_p2), %v1217_v2  ;;  %v1222_v7 = vld [vmem:[%s1562_s1 + $0x8] sm:$0xff] (!%p190_p2)   ;;  %v1226_v11 = vld [vmem:[%s1562_s1 + $0x10] sm:$0xff] (!%p190_p2)  }
   0xa   : > { %v1219_v4 = vld [vmem:[%s1562_s1 + $0x80] sm:$0xff] (!%p190_p2)   ;;  %1121 = vmatpush3.bf16.msra.mxu0 (!%p190_p2), %v1218_v3  ;;  %v1223_v8 = vld [vmem:[%s1562_s1 + $0x88] sm:$0xff] (!%p190_p2)   ;;  %v1227_v12 = vld [vmem:[%s1562_s1 + $0x90] sm:$0xff] (!%p190_p2)  }
   0xb   : > { %1143 = vmatpush3.bf16.msra.mxu1 (!%p190_p2), %v1219_v4  ;;  %1122 = vmatprep.subr.bf16.mxu0 (!%p190_p2), %v1220_v5  ;;  %v1228_v13 = vld [vmem:[%s1562_s1 + $0x58] sm:$0xff] (!%p190_p2)   ;;  %v1232_v17 = vld [vmem:[%s1562_s1 + $0x60] sm:$0xff] (!%p190_p2)   ;;  %v1236_v21 = vld [vmem:[%s1562_s1 + $0x68] sm:$0xff] (!%p190_p2)  }
   0xc   : > { %1144 = vmatprep.subr.bf16.mxu1 (!%p190_p2), %v1221_v6  ;;  %v1229_v14 = vld [vmem:[%s1562_s1 + $0xd8] sm:$0xff] (!%p190_p2)   ;;  %v1233_v18 = vld [vmem:[%s1562_s1 + $0xe0] sm:$0xff] (!%p190_p2)   ;;  %v1237_v22 = vld [vmem:[%s1562_s1 + $0xe8] sm:$0xff] (!%p190_p2)  }
   0xd   : > { %v1230_v15 = vld [vmem:[%s1562_s1 + $0x18] sm:$0xff] (!%p190_p2)   ;;  %v1234_v19 = vld [vmem:[%s1562_s1 + $0x20] sm:$0xff] (!%p190_p2)   ;;  %v1238_v23 = vld [vmem:[%s1562_s1 + $0x28] sm:$0xff] (!%p190_p2)  }
   0xe   : > { %1123 = vmatpush3.bf16.msra.mxu0 (!%p190_p2), %v1222_v7  ;;  %v1231_v16 = vld [vmem:[%s1562_s1 + $0x98] sm:$0xff] (!%p190_p2)   ;;  %v1235_v20 = vld [vmem:[%s1562_s1 + $0xa0] sm:$0xff] (!%p190_p2)   ;;  %v1239_v24 = vld [vmem:[%s1562_s1 + $0xa8] sm:$0xff] (!%p190_p2)  }
   0xf   : > { %1145 = vmatpush3.bf16.msra.mxu1 %v1223_v8  ;;  %1124 = vmatprep.subr.bf16.mxu0 %v1224_v9  ;;  %s1568_s21 = smov (!%p215_p3, %s1036_s21), 1  ;;  %v1240_v25 = vld [vmem:[%s1562_s1 + $0x70] sm:$0xff]   ;;  %v1244_v29 = vld [vmem:[%s1562_s1 + $0x78] sm:$0xff]   ;;  %v1248_v41 = vld [vmem:[%s1562_s1 + $0x140] sm:$0xff]  }
  0x10   : > { %1146 = vmatprep.subr.bf16.mxu1 %v1225_v10  ;;  %v1241_v26 = vld [vmem:[%s1562_s1 + $0xf0] sm:$0xff]   ;;  %s1119_s27 = sshll.u32 %s1568_s21, 6  ;;  %v1245_v30 = vld [vmem:[%s1562_s1 + $0xf8] sm:$0xff]   ;;  %v1249_v42 = vld [vmem:[%s1562_s1 + $0x1c0] sm:$0xff]   ;;  %s222_s18 = scalar_lea.vmem %s1566_s5, %s1568_s21 }
  0x11   : > { %v1242_v27 = vld [vmem:[%s1562_s1 + $0x30] sm:$0xff]   ;;  %s1433_s11 = scalar_lea.vmem %s1561_s0, %s1119_s27  ;;  %v1246_v31 = vld [vmem:[%s1562_s1 + $0x38] sm:$0xff]   ;;  %v1250_v43 = vld [vmem:[%s1562_s1 + $0x100] sm:$0xff]  }
  0x12   : > { %1125 = vmatpush3.bf16.msra.mxu0 %v1226_v11  ;;  %v1243_v28 = vld [vmem:[%s1562_s1 + $0xb0] sm:$0xff]   ;;  %v1247_v32 = vld [vmem:[%s1562_s1 + $0xb8] sm:$0xff]   ;;  %v224_v33 = vld [vmem:[%s1433_s11] sm:$0xff] }
  0x13   : > { %1147 = vmatpush3.bf16.msra.mxu1 %v1227_v12  ;;  %1126 = vmatprep.subr.bf16.mxu0 %v1228_v13  ;;  %v228_v34 = vld [vmem:[%s1433_s11 + $0x20] sm:$0x11]  ;;  %v225_v35 = vld [vmem:[%s1433_s11 + $0x8] sm:$0xff]  ;;  %v1256_v49 = vld [vmem:[%s1562_s1 + $0x150] sm:$0xff]  }
  0x14   : > { %1148 = vmatprep.subr.bf16.mxu1 %v1229_v14  ;;  %v1044_v36 = vcombine.low %v224_v33, %v228_v34  ;;  %v1045_v37 = vcombine.high %v224_v33, %v228_v34  ;;  %v229_v38 = vld [vmem:[%s1433_s11 + $0x28] sm:$0x11]  ;;  %v1251_v44 = vld [vmem:[%s1562_s1 + $0x180] sm:$0xff]   ;;  %v1257_v50 = vld [vmem:[%s1562_s1 + $0x1d0] sm:$0xff]  }
  0x15   : > { %v1046_v39 = vcombine.low %v225_v35, %v229_v38  ;;  %v1047_v40 = vcombine.high %v225_v35, %v229_v38  ;;  %v1252_v45 = vld [vmem:[%s1562_s1 + $0x148] sm:$0xff]   ;;  %v1258_v51 = vld [vmem:[%s1562_s1 + $0x110] sm:$0xff]   ;;  %v1260_v53 = vld [vmem:[%s1562_s1 + $0x158] sm:$0xff]  }
  0x16   : > { %1127 = vmatpush3.bf16.msra.mxu0 %v1230_v15  ;;  %823 = vmatprep.mubr.bf16.mxu0 %v1045_v37  ;;  %v1253_v46 = vld [vmem:[%s1562_s1 + $0x1c8] sm:$0xff]   ;;  %v1259_v52 = vld [vmem:[%s1562_s1 + $0x190] sm:$0xff]   ;;  %v1261_v54 = vld [vmem:[%s1562_s1 + $0x1d8] sm:$0xff]  }
  0x17   : > { %1149 = vmatpush3.bf16.msra.mxu1 %v1231_v16  ;;  %1128 = vmatprep.subr.bf16.mxu0 %v1232_v17  ;;  %v1254_v47 = vld [vmem:[%s1562_s1 + $0x108] sm:$0xff]   ;;  %v1262_v55 = vld [vmem:[%s1562_s1 + $0x118] sm:$0xff]   ;;  %v1264_v57 = vld [vmem:[%s1562_s1 + $0x160] sm:$0xff]  }
  0x18   : > { %1150 = vmatprep.subr.bf16.mxu1 %v1233_v18  ;;  %864 = vmatprep.mubr.bf16.mxu1 %v1047_v40  ;;  %v1255_v48 = vld [vmem:[%s1562_s1 + $0x188] sm:$0xff]   ;;  %v1263_v56 = vld [vmem:[%s1562_s1 + $0x198] sm:$0xff]   ;;  %v1265_v58 = vld [vmem:[%s1562_s1 + $0x1e0] sm:$0xff]  }
  0x19   : > { %v1266_v59 = vld [vmem:[%s1562_s1 + $0x120] sm:$0xff]   ;;  %v1268_v61 = vld [vmem:[%s1562_s1 + $0x168] sm:$0xff]   ;;  %v1272_v1 = vld [vmem:[%s1562_s1 + $0x170] sm:$0xff]  }
  0x1a   : > { %1129 = vmatpush3.bf16.msra.mxu0 %v1234_v19  ;;  %v1267_v60 = vld [vmem:[%s1562_s1 + $0x1a0] sm:$0xff]   ;;  %v1269_v62 = vld [vmem:[%s1562_s1 + $0x1e8] sm:$0xff]   ;;  %v1273_v2 = vld [vmem:[%s1562_s1 + $0x1f0] sm:$0xff]  }
  0x1b   : > { %1151 = vmatpush3.bf16.msra.mxu1 %v1235_v20  ;;  %1130 = vmatprep.subr.bf16.mxu0 %v1236_v21  ;;  %v1270_v63 = vld [vmem:[%s1562_s1 + $0x128] sm:$0xff]   ;;  %v1274_v3 = vld [vmem:[%s1562_s1 + $0x130] sm:$0xff]   ;;  %v1276_v5 = vld [vmem:[%s1562_s1 + $0x178] sm:$0xff]  }
  0x1c   : > { %1152 = vmatprep.subr.bf16.mxu1 %v1237_v22  ;;  %v1271_v0 = vld [vmem:[%s1562_s1 + $0x1a8] sm:$0xff]   ;;  %v1275_v4 = vld [vmem:[%s1562_s1 + $0x1b0] sm:$0xff]   ;;  %v1277_v6 = vld [vmem:[%s1562_s1 + $0x1f8] sm:$0xff]  }
  0x1d   : > { %v1278_v7 = vld [vmem:[%s1562_s1 + $0x138] sm:$0xff]   ;;  %v226_v9 = vld [vmem:[%s1433_s11 + $0x10] sm:$0xff]  ;;  %v1043_v19 = vld [vmem:[%s1563_s2] ss:$0 sm:$0xff] }
  0x1e   : > { %1131 = vmatpush3.bf16.msra.mxu0 %v1238_v23  ;;  %v1279_v8 = vld [vmem:[%s1562_s1 + $0x1b8] sm:$0xff]   ;;  %v230_v10 = vld [vmem:[%s1433_s11 + $0x30] sm:$0x11] }
  0x1f   : > { %1153 = vmatpush3.bf16.msra.mxu1 %v1239_v24  ;;  %1132 = vmatprep.subr.bf16.mxu0 %v1240_v25  ;;  %v1048_v11 = vcombine.low %v226_v9, %v230_v10  ;;  %v1049_v12 = vcombine.high %v226_v9, %v230_v10  ;;  %v227_v13 = vld [vmem:[%s1433_s11 + $0x18] sm:$0xff] }
  0x20   : > { %1154 = vmatprep.subr.bf16.mxu1 %v1241_v26  ;;  %v231_v14 = vld [vmem:[%s1433_s11 + $0x38] sm:$0x11] }
  0x21   : > { %v1050_v15 = vcombine.low %v227_v13, %v231_v14  ;;  %v1051_v16 = vcombine.high %v227_v13, %v231_v14 }
  0x22   : > { %1133 = vmatpush3.bf16.msra.mxu0 %v1242_v27 }
  0x23   : > { %1155 = vmatpush3.bf16.msra.mxu1 %v1243_v28  ;;  %1134 = vmatprep.subr.bf16.mxu0 %v1244_v29 }
  0x24   : > { %1156 = vmatprep.subr.bf16.mxu1 %v1245_v30 }
  0x26   : > { %1135 = vmatpush3.bf16.msra.mxu0 %v1246_v31 }
  0x27   : > { %1157 = vmatpush3.bf16.msra.mxu1 %v1247_v32  ;;  %1164 = vmatprep.subr.bf16.mxu0 %v1248_v41 }
  0x28   : > { %1186 = vmatprep.subr.bf16.mxu1 %v1249_v42 }
  0x29   : > { %824 = vmatmul.mubr.bf16.vlgmr.msra.gmra.mrb[0].mxu0 %v1044_v36 }
  0x2a   : > { %865 = vmatmul.mubr.bf16.vlgmr.msra.gmra.mrb[0].mxu1 %v1046_v39  ;;  %1165 = vmatpush3.bf16.msra.mxu0 %v1250_v43 }
  0x2b   : > { %1187 = vmatpush3.bf16.msra.mxu1 %v1251_v44  ;;  %1166 = vmatprep.subr.bf16.mxu0 %v1252_v45 }
  0x2c   : > { %1188 = vmatprep.subr.bf16.mxu1 %v1253_v46  ;;  %905 = vmatprep.mubr.bf16.mxu0 %v1049_v12 }
  0x2d   : > { %946 = vmatprep.mubr.bf16.mxu1 %v1051_v16 }
  0x2e   : > { %1167 = vmatpush3.bf16.msra.mxu0 %v1254_v47 }
  0x2f   : > { %1189 = vmatpush3.bf16.msra.mxu1 %v1255_v48  ;;  %1168 = vmatprep.subr.bf16.mxu0 %v1256_v49 }
  0x30   : > { %1190 = vmatprep.subr.bf16.mxu1 %v1257_v50 }
  0x32   : > { %1169 = vmatpush3.bf16.msra.mxu0 %v1258_v51  ;;  %v961_v51 = vld [vmem:[%s1564_s3] sm:$0xff] }
  0x33   : > { %1191 = vmatpush3.bf16.msra.mxu1 %v1259_v52  ;;  %1170 = vmatprep.subr.bf16.mxu0 %v1260_v53 }
  0x34   : > { %1192 = vmatprep.subr.bf16.mxu1 %v1261_v54  ;;  %v962_v54 = vld [vmem:[%s1564_s3 + $0x8] sm:$0x1] }
  0x36   : > { %1171 = vmatpush3.bf16.msra.mxu0 %v1262_v55 }
  0x37   : > { %1193 = vmatpush3.bf16.msra.mxu1 %v1263_v56  ;;  %1172 = vmatprep.subr.bf16.mxu0 %v1264_v57 }
  0x38   : > { %1194 = vmatprep.subr.bf16.mxu1 %v1265_v58 }
  0x3a   : > { %1173 = vmatpush3.bf16.msra.mxu0 %v1266_v59 }
  0x3b   : > { %1195 = vmatpush3.bf16.msra.mxu1 %v1267_v60  ;;  %1174 = vmatprep.subr.bf16.mxu0 %v1268_v61 }
  0x3c   : > { %1196 = vmatprep.subr.bf16.mxu1 %v1269_v62 }
  0x3e   : > { %1175 = vmatpush3.bf16.msra.mxu0 %v1270_v63 }
  0x3f   : > { %1197 = vmatpush3.bf16.msra.mxu1 %v1271_v0  ;;  %1176 = vmatprep.subr.bf16.mxu0 %v1272_v1 }
  0x40   : > { %1198 = vmatprep.subr.bf16.mxu1 %v1273_v2 }
  0x42   : > { %1177 = vmatpush3.bf16.msra.mxu0 %v1274_v3 }
  0x43   : > { %1199 = vmatpush3.bf16.msra.mxu1 %v1275_v4  ;;  %1178 = vmatprep.subr.bf16.mxu0 %v1276_v5  ;;  %v979_v4 = vld [vmem:[#allocation2] sm:$0x1] }
  0x44   : > { %1200 = vmatprep.subr.bf16.mxu1 %v1277_v6 }
  0x46   : > { %1179 = vmatpush3.bf16.msra.mxu0 %v1278_v7 }
  0x47   : > { %1201 = vmatpush3.bf16.msra.mxu1 %v1279_v8 }
  0x49   : > { %906 = vmatmul.mubr.bf16.vlgmr.msra.gmra.mrb[4].mxu0 %v1048_v11 }
  0x4a   : > { %947 = vmatmul.mubr.bf16.vlgmr.msra.gmra.mrb[4].mxu1 %v1050_v15 }
  0xfc   : > { %v1136_v17 = vpop.f32.mrb[0].mxu0 }
  0xfd   : > { %v1158_v18 = vpop.f32.mrb[0].mxu1  ;;  %v1137_v20 = vpop.f32.mrb[1].mxu0 }
  0xfe   : > { %v1138_v21 = vadd.f32 %v1137_v20, %v1136_v17  ;;  %v1159_v22 = vpop.f32.mrb[1].mxu1  ;;  %v1139_v23 = vpop.f32.mrb[2].mxu0 }
  0xff   : > { %v1160_v24 = vadd.f32 %v1159_v22, %v1158_v18  ;;  %v1161_v25 = vpop.f32.mrb[2].mxu1  ;;  %v1140_v26 = vpop.f32.mrb[3].mxu0 }
 0x100   : > { %v826_v27 = vadd.f32 %v1138_v21, %v1043_v19  ;;  %v1141_v28 = vadd.f32 %v1140_v26, %v1139_v23  ;;  %v1162_v29 = vpop.f32.mrb[3].mxu1 }
 0x101   : > { %v1163_v30 = vadd.f32 %v1162_v29, %v1161_v25 }
 0x102   : > { %v867_v31 = vadd.f32 %v1160_v24, %v826_v27  ;;  %v829_v32 = vadd.f32 %v1141_v28, %v1043_v19 }
 0x104   : > { %v870_v33 = vadd.f32 %v1163_v30, %v829_v32 }
 0x11c   : > { %v1180_v34 = vpop.f32.mrb[4].mxu0 }
 0x11d   : > { %v1202_v35 = vpop.f32.mrb[4].mxu1  ;;  %v1181_v36 = vpop.f32.mrb[5].mxu0 }
 0x11e   : > { %v1182_v37 = vadd.f32 %v1181_v36, %v1180_v34  ;;  %v1203_v38 = vpop.f32.mrb[5].mxu1  ;;  %v1183_v39 = vpop.f32.mrb[6].mxu0 }
 0x11f   : > { %v1204_v40 = vadd.f32 %v1203_v38, %v1202_v35  ;;  %v1205_v41 = vpop.f32.mrb[6].mxu1  ;;  %v1184_v42 = vpop.f32.mrb[7].mxu0 }
 0x120   : > { %v908_v43 = vadd.f32 %v1182_v37, %v867_v31  ;;  %v1185_v44 = vadd.f32 %v1184_v42, %v1183_v39  ;;  %v1206_v45 = vpop.f32.mrb[7].mxu1 }
 0x121   : > { %v1207_v46 = vadd.f32 %v1206_v45, %v1205_v41 }
 0x122   : > { %v949_v47 = vadd.f32 %v1204_v40, %v908_v43  ;;  %v911_v48 = vadd.f32 %v1185_v44, %v870_v33 }
 0x124   : > { %v957_v49 = vmul.f32 0.2, %v949_v47  ;;  %v952_v50 = vadd.f32 %v1207_v46, %v911_v48  ;;  %vm955_vm0 = vcmp.ge.f32.partialorder %v949_v47, 0.0 }
 0x126   : > { %vm956_vm1 = vcmp.ge.f32.partialorder %v952_v50, 0.0  ;;  %v958_v52 = vmul.f32 0.2, %v952_v50  ;;  %v959_v53 = vsel %vm955_vm0, %v949_v47, %v957_v49 }
 0x127   : > { %v963_v55 = vmul.f32 %v961_v51, %v959_v53 }
 0x128   : > { %v960_v56 = vsel %vm956_vm1, %v952_v50, %v958_v52 }
 0x129   : > { %v964_v57 = vmul.f32 %v962_v54, %v960_v56  ;;  %v966_v58 = vsel %vm965_vm2, %v963_v55, 0.0 }
 0x12b   : > { %v968_v59 = vsel %vm967_vm3, %v964_v57, 0.0 }
 0x12c   : > { %v969_v60 = vadd.f32 %v968_v59, %v966_v58 }
 0x12e   : > { %v970_v61 = vrot.slane %v969_v60, 4 }
 0x130   : > { %v971_v62 = vadd.f32 %v970_v61, %v969_v60 }
 0x132   : > { %v972_v63 = vrot.slane %v971_v62, 2 }
 0x134   : > { %v973_v0 = vadd.f32 %v972_v63, %v971_v62 }
 0x136   : > { %v974_v1 = vrot.slane %v973_v0, 1 }
 0x138   : > { %v975_v2 = vadd.f32 %v974_v1, %v973_v0 }
 0x13a   : > { %v976_v3 = vsel %vm965_vm2, %v975_v2, 0.0 }
 0x13b   : > { %977 = vadd.xlane.f32.xlu0 %v976_v3 }
 0x1c8   : > { %v978_v5 = vpop.xlane.xlu0 %977 }
 0x1c9   : > { %v980_v6 = vadd.f32 %v979_v4, %v978_v5 }
 0x1cb   : > { %v1116_v7 = vmul.f32 -1.442695, %v980_v6 }
 0x1cd   : > { %1280 = vpow2.f32 %v1116_v7 }
 0x1d7   : > { %v1281_v8 = vpop.eup %1280 }
 0x1d8   : > { %v984_v9 = vadd.f32 1.0, %v1281_v8 }
 0x1da   : > { %1282 = vrcp.f32 %v984_v9 }
 0x1e4   : > { %v1283_v10 = vpop.eup %1282 }
 0x1e5   : > { %988 = vst.msk [vmem:[%s222_s18] sm:$0x1] %vm987_vm4, %v1283_v10 }
 0x1e6 PF: > { %s17_s20 = sadd.s32 1, %s1290_s20  }
 0x1e7   : > { %p14_p4 = scmp.ge.s32.totalorder %s17_s20, 4  }
 0x1e9   :  { %16 = sbr.rel (!%p14_p4) target bundleno = 3 (0x3), region = 70 }

</bundles_post_ra>
